<compile_context>
chip_gen: v5e
topology: v5e:2x2
jax: 0.10.0
libtpu: 0.0.40
codegen_flags: <defaults>
</compile_context>

<pallas_src>
import functools

import jax
import jax.numpy as jnp
from jax import lax
from jax.experimental import pallas as pl
from jax.experimental.pallas import tpu as pltpu

D_MODEL = 128
N_HEAD = 4
HEAD_DIM = D_MODEL // N_HEAD
D_FF = 256
NUM_LAYERS = 2
NUM_CLASSES = 3
MAX_LEN = 64
LN_EPS = 1e-5
FC_PAD = 128          # lane-dense classifier output width (real logits in [:NUM_CLASSES])
ROW_TARGET = 512      # target merged (batch_tile * seq) rows per grid step

# Order of the stacked per-layer weight arrays (must match the kernel signature).
LAYER_PARAM_NAMES = (
    "wqkv", "bqkv", "wo", "bo", "ln1_g", "ln1_b",
    "w1", "b1", "w2", "b2", "ln2_g", "ln2_b",
)


def _layernorm(x, gamma, beta):
    mu = jnp.mean(x, axis=-1, keepdims=True)
    var = jnp.mean((x - mu) ** 2, axis=-1, keepdims=True)
    return (x - mu) * lax.rsqrt(var + LN_EPS) * gamma + beta


def fused_forward_kernel(x_ref,
                         wqkv_ref, bqkv_ref, wo_ref, bo_ref,
                         ln1_g_ref, ln1_b_ref, w1_ref, b1_ref,
                         w2_ref, b2_ref, ln2_g_ref, ln2_b_ref,
                         fc_w_ref, fc_b_ref,
                         out_ref, *, seq_len):
    """One grid step == one batch tile of `bt` sequences.

    Big matmuls (QKV, per-head Wo, FFN, FC) run over the merged (bt*s_pad, D)
    row view; attention score/softmax/PV is batched over the tile's batch dim
    with a static 4-iteration head loop (no per-element unrolling).
    """
    bt, s_pad, d = x_ref.shape
    rows = bt * s_pad
    scale = 1.0 / float(HEAD_DIM) ** 0.5

    # Residual stream in f32; s_pad % 8 == 0 so this reshape is a free view.
    x = x_ref[...].reshape(rows, d)

    # Compile-time key-padding mask (only materialized when the seq axis was padded).
    if seq_len != s_pad:
        key_ids = lax.broadcasted_iota(jnp.int32, (1, s_pad), 1)
        key_bias = jnp.where(key_ids < seq_len, 0.0, -1e30).astype(jnp.float32)
    else:
        key_bias = None

    for l in range(NUM_LAYERS):                       # static unroll over 2 layers
        # ---- fused QKV projection over the whole tile (MXU: M=rows, K=128, N=384) ----
        qkv = jnp.dot(x.astype(jnp.bfloat16), wqkv_ref[l],
                      preferred_element_type=jnp.float32) + bqkv_ref[l]
        qkv = qkv.astype(jnp.bfloat16).reshape(bt, s_pad, 3 * D_MODEL)

        wo_l = wo_ref[l]                               # (128, 128) bf16, rows grouped by head
        y = x + bo_ref[l]                              # residual + out-proj bias; heads accumulate below
        for h in range(N_HEAD):                        # static 4-iter loop; batched over bt inside
            lo = h * HEAD_DIM
            q_h = qkv[:, :, lo:lo + HEAD_DIM]                              # (bt, s_pad, 32) bf16
            k_h = qkv[:, :, D_MODEL + lo:D_MODEL + lo + HEAD_DIM]
            v_h = qkv[:, :, 2 * D_MODEL + lo:2 * D_MODEL + lo + HEAD_DIM]

            s = jnp.einsum("bqd,bkd->bqk", q_h, k_h,
                           preferred_element_type=jnp.float32) * scale     # (bt, s_pad, s_pad)
            if key_bias is not None:
                s = s + key_bias
            m = jnp.max(s, axis=-1, keepdims=True)
            e = jnp.exp(s - m)
            inv = pl.reciprocal(jnp.sum(e, axis=-1, keepdims=True), approx=True)
            p = (e * inv).astype(jnp.bfloat16)
            pv = jnp.einsum("bqk,bkd->bqd", p, v_h,
                            preferred_element_type=jnp.float32)            # (bt, s_pad, 32)

            # Per-head output projection accumulated into the residual:
            # no head concatenation, no ctx scratch round-trip.
            y = y + jnp.dot(pv.reshape(rows, HEAD_DIM).astype(jnp.bfloat16),
                            wo_l[lo:lo + HEAD_DIM, :],
                            preferred_element_type=jnp.float32)
        x = _layernorm(y, ln1_g_ref[l], ln1_b_ref[l])

        # ---- feed-forward (Linear -> ReLU -> Linear) over the whole tile ----
        h1 = jnp.dot(x.astype(jnp.bfloat16), w1_ref[l],
                     preferred_element_type=jnp.float32) + b1_ref[l]
        h1 = jnp.maximum(h1, 0.0).astype(jnp.bfloat16)
        h2 = jnp.dot(h1, w2_ref[l], preferred_element_type=jnp.float32) + b2_ref[l]
        x = _layernorm(x + h2, ln2_g_ref[l], ln2_b_ref[l])

    # ---- fused epilogue: mean over true sequence length + classifier (lane-padded) ----
    x3 = x.reshape(bt, s_pad, d)
    if seq_len == s_pad:
        pooled = jnp.mean(x3, axis=1)                                       # (bt, D)
    else:
        pooled = jnp.sum(x3[:, :seq_len, :], axis=1) * (1.0 / seq_len)
    out_ref[...] = (jnp.dot(pooled.astype(jnp.bfloat16), fc_w_ref[...],
                            preferred_element_type=jnp.float32) + fc_b_ref[...])


def _pinned_spec(a):
    """Full-array block with a constant index_map -> stays resident in VMEM."""
    zeros = (0,) * a.ndim
    return pl.BlockSpec(a.shape, lambda i, _z=zeros: _z)


def _choose_tiles(batch, seq_pad):
    """Pick (batch_tile, n_tiles, padded_batch).

    Targets ~ROW_TARGET merged rows per grid step, keeps >=2 parallel tiles when
    the batch is big enough (v7x has 2 TensorCores), balances remainder tiles to
    avoid near-full-tile zero padding, and keeps tiled blocks sublane-aligned.
    """
    bt_target = max(8, ROW_TARGET // seq_pad)
    n_tiles = max(1, -(-batch // bt_target))
    if n_tiles == 1 and batch > 8:
        n_tiles = 2                        # let v7x's second TensorCore participate
    if n_tiles == 1:
        return batch, 1, batch             # single tile: block == full array, no padding
    bt = -(-batch // n_tiles)              # balanced tile size
    bt = ((bt + 7) // 8) * 8               # sublane alignment for tiled blocks
    n_tiles = -(-batch // bt)
    return bt, n_tiles, n_tiles * bt


@jax.jit
def transformer_classifier_forward(tokens, params):
    B, S = tokens.shape
    # Glue: embedding gather + positional add (pure JAX); hot path is one Pallas call.
    emb = params["embedding"][tokens] + params["pos_embedding"][:, :S, :]
    x = emb.astype(jnp.float32)

    # Keep the kernel's sequence axis sublane-aligned so merged-row reshapes are free views.
    s_pad = ((S + 7) // 8) * 8
    if s_pad != S:
        x = jnp.pad(x, ((0, 0), (0, s_pad - S), (0, 0)))

    bt, n_tiles, b_pad = _choose_tiles(B, s_pad)
    if b_pad != B:
        x = jnp.pad(x, ((0, b_pad - B), (0, 0), (0, 0)))

    weight_inputs = [params[n] for n in LAYER_PARAM_NAMES] + [
        params["fc_w_pad"], params["fc_b_pad"]]

    logits_padded = pl.pallas_call(
        functools.partial(fused_forward_kernel, seq_len=S),
        out_shape=jax.ShapeDtypeStruct((b_pad, FC_PAD), jnp.float32),
        grid_spec=pltpu.PrefetchScalarGridSpec(
            num_scalar_prefetch=0,
            grid=(n_tiles,),
            in_specs=[pl.BlockSpec((bt, s_pad, D_MODEL), lambda i: (i, 0, 0))]
                     + [_pinned_spec(a) for a in weight_inputs],
            out_specs=pl.BlockSpec((bt, FC_PAD), lambda i: (i, 0)),
        ),
        compiler_params=pltpu.CompilerParams(
            dimension_semantics=("parallel",),
        ),
    )(x, *weight_inputs)

    return logits_padded[:B, :NUM_CLASSES]


def init_params(key, vocab_size):
    def nrm(k, shape, scale):
        return jax.random.normal(k, shape, dtype=jnp.float32) * scale

    keys = jax.random.split(key, 3 + NUM_LAYERS)
    params = {
        # nn.Embedding init ~ N(0, 1)
        "embedding": nrm(keys[0], (vocab_size, D_MODEL), 1.0),
        # torch init is zeros; small values so the add-path is exercised
        "pos_embedding": nrm(keys[1], (1, MAX_LEN, D_MODEL), 0.02),
    }

    per_layer = {n: [] for n in LAYER_PARAM_NAMES}
    for l in range(NUM_LAYERS):
        lk = jax.random.split(keys[2 + l], 6)
        per_layer["wqkv"].append(nrm(lk[0], (D_MODEL, 3 * D_MODEL), 0.02))  # x @ W layout, [Q|K|V]
        per_layer["bqkv"].append(jnp.zeros((1, 3 * D_MODEL), jnp.float32))
        per_layer["wo"].append(nrm(lk[1], (D_MODEL, D_MODEL), 0.02))        # rows grouped by head
        per_layer["bo"].append(jnp.zeros((1, D_MODEL), jnp.float32))
        per_layer["ln1_g"].append(jnp.ones((1, D_MODEL), jnp.float32))
        per_layer["ln1_b"].append(jnp.zeros((1, D_MODEL), jnp.float32))
        per_layer["w1"].append(nrm(lk[2], (D_MODEL, D_FF), 0.02))
        per_layer["b1"].append(nrm(lk[3], (1, D_FF), 0.02))
        per_layer["w2"].append(nrm(lk[4], (D_FF, D_MODEL), 0.02))
        per_layer["b2"].append(nrm(lk[5], (1, D_MODEL), 0.02))
        per_layer["ln2_g"].append(jnp.ones((1, D_MODEL), jnp.float32))
        per_layer["ln2_b"].append(jnp.zeros((1, D_MODEL), jnp.float32))

    matmul_weights = {"wqkv", "wo", "w1", "w2"}   # MXU operands stored in bf16
    for n in LAYER_PARAM_NAMES:
        stacked = jnp.stack(per_layer[n], axis=0)
        params[n] = stacked.astype(jnp.bfloat16) if n in matmul_weights else stacked

    # final classifier, pre-transposed and lane-padded to 128 output columns
    kf = jax.random.split(keys[-1], 1)[0]
    fc_w = nrm(kf, (D_MODEL, NUM_CLASSES), 0.02)
    fc_w_pad = jnp.zeros((D_MODEL, FC_PAD), jnp.float32).at[:, :NUM_CLASSES].set(fc_w)
    params["fc_w_pad"] = fc_w_pad.astype(jnp.bfloat16)
    params["fc_b_pad"] = jnp.zeros((1, FC_PAD), jnp.float32)
    return params


if __name__ == "__main__":
    key = jax.random.PRNGKey(0)
    kp, kt = jax.random.split(key)

    vocab_size = 50
    B, S = 2, 8

    params = init_params(kp, vocab_size)
    tokens = jax.random.randint(kt, (B, S), 0, vocab_size, dtype=jnp.int32)

    logits = transformer_classifier_forward(tokens, params)
    logits = jax.block_until_ready(logits)

    assert logits.shape == (B, NUM_CLASSES), logits.shape
    assert bool(jnp.all(jnp.isfinite(logits)))
    print("KERNEL_OK")
</pallas_src>

<mosaic_0001>
module attributes {stable_mosaic.version = 11 : i64} {
  func.func @fused_forward_kernel(%arg0: i32, %arg1: memref<2x8x128xf32, #tpu.memory_space<vmem>>, %arg2: memref<2x128x384xbf16, #tpu.memory_space<vmem>>, %arg3: memref<2x1x384xf32, #tpu.memory_space<vmem>>, %arg4: memref<2x128x128xbf16, #tpu.memory_space<vmem>>, %arg5: memref<2x1x128xf32, #tpu.memory_space<vmem>>, %arg6: memref<2x1x128xf32, #tpu.memory_space<vmem>>, %arg7: memref<2x1x128xf32, #tpu.memory_space<vmem>>, %arg8: memref<2x128x256xbf16, #tpu.memory_space<vmem>>, %arg9: memref<2x1x256xf32, #tpu.memory_space<vmem>>, %arg10: memref<2x256x128xbf16, #tpu.memory_space<vmem>>, %arg11: memref<2x1x128xf32, #tpu.memory_space<vmem>>, %arg12: memref<2x1x128xf32, #tpu.memory_space<vmem>>, %arg13: memref<2x1x128xf32, #tpu.memory_space<vmem>>, %arg14: memref<128x128xbf16, #tpu.memory_space<vmem>>, %arg15: memref<1x128xf32, #tpu.memory_space<vmem>>, %arg16: memref<2x128xf32, #tpu.memory_space<vmem>>) attributes {dimension_semantics = [#tpu.dimension_semantics<parallel>], iteration_bounds = array<i64: 1>, scalar_prefetch = 0 : i64, scratch_operands = 0 : i64, tpu.core_type = #tpu.core_type<tc>, window_params = [{transform_indices = @transform_0, window_bounds = array<i64: 2, 8, 128>}, {pipeline_mode = #tpu.pipeline_mode<synchronous>, transform_indices = @transform_1, window_bounds = array<i64: 2, 128, 384>}, {pipeline_mode = #tpu.pipeline_mode<synchronous>, transform_indices = @transform_2, window_bounds = array<i64: 2, 1, 384>}, {pipeline_mode = #tpu.pipeline_mode<synchronous>, transform_indices = @transform_3, window_bounds = array<i64: 2, 128, 128>}, {pipeline_mode = #tpu.pipeline_mode<synchronous>, transform_indices = @transform_4, window_bounds = array<i64: 2, 1, 128>}, {pipeline_mode = #tpu.pipeline_mode<synchronous>, transform_indices = @transform_5, window_bounds = array<i64: 2, 1, 128>}, {pipeline_mode = #tpu.pipeline_mode<synchronous>, transform_indices = @transform_6, window_bounds = array<i64: 2, 1, 128>}, {pipeline_mode = #tpu.pipeline_mode<synchronous>, transform_indices = @transform_7, window_bounds = array<i64: 2, 128, 256>}, {pipeline_mode = #tpu.pipeline_mode<synchronous>, transform_indices = @transform_8, window_bounds = array<i64: 2, 1, 256>}, {pipeline_mode = #tpu.pipeline_mode<synchronous>, transform_indices = @transform_9, window_bounds = array<i64: 2, 256, 128>}, {pipeline_mode = #tpu.pipeline_mode<synchronous>, transform_indices = @transform_10, window_bounds = array<i64: 2, 1, 128>}, {pipeline_mode = #tpu.pipeline_mode<synchronous>, transform_indices = @transform_11, window_bounds = array<i64: 2, 1, 128>}, {pipeline_mode = #tpu.pipeline_mode<synchronous>, transform_indices = @transform_12, window_bounds = array<i64: 2, 1, 128>}, {pipeline_mode = #tpu.pipeline_mode<synchronous>, transform_indices = @transform_13, window_bounds = array<i64: 128, 128>}, {pipeline_mode = #tpu.pipeline_mode<synchronous>, transform_indices = @transform_14, window_bounds = array<i64: 1, 128>}, {transform_indices = @transform_15, window_bounds = array<i64: 2, 128>}]} {
    %c0 = arith.constant 0 : index
    %c0_0 = arith.constant 0 : index
    %c0_1 = arith.constant 0 : index
    %0 = vector.load %arg1[%c0, %c0_0, %c0_1] : memref<2x8x128xf32, #tpu.memory_space<vmem>>, vector<2x8x128xf32>
    %1 = vector.shape_cast %0 : vector<2x8x128xf32> to vector<16x128xf32>
    %2 = arith.truncf %1 : vector<16x128xf32> to vector<16x128xbf16>
    %c0_2 = arith.constant 0 : index
    %c0_3 = arith.constant 0 : index
    %c0_4 = arith.constant 0 : index
    %3 = vector.load %arg2[%c0_2, %c0_3, %c0_4] : memref<2x128x384xbf16, #tpu.memory_space<vmem>>, vector<1x128x384xbf16>
    %4 = vector.shape_cast %3 : vector<1x128x384xbf16> to vector<128x384xbf16>
    %cst = arith.constant dense<0.000000e+00> : vector<16x384xf32>
    %5 = tpu.matmul %2, %4, %cst {dimension_numbers = #tpu.dot_dimension_numbers<[1], [0], [0], [1], [0, 0, 1, 1], [], []>} : vector<16x128xbf16>, vector<128x384xbf16>, vector<16x384xf32> -> vector<16x384xf32>
    %c0_5 = arith.constant 0 : index
    %c0_6 = arith.constant 0 : index
    %c0_7 = arith.constant 0 : index
    %6 = vector.load %arg3[%c0_5, %c0_6, %c0_7] : memref<2x1x384xf32, #tpu.memory_space<vmem>>, vector<1x1x384xf32>
    %7 = vector.shape_cast %6 : vector<1x1x384xf32> to vector<1x384xf32>
    %8 = vector.broadcast %7 : vector<1x384xf32> to vector<16x384xf32>
    %9 = arith.addf %5, %8 : vector<16x384xf32>
    %10 = arith.truncf %9 : vector<16x384xf32> to vector<16x384xbf16>
    %11 = vector.shape_cast %10 : vector<16x384xbf16> to vector<2x8x384xbf16>
    %c0_8 = arith.constant 0 : index
    %c0_9 = arith.constant 0 : index
    %c0_10 = arith.constant 0 : index
    %12 = vector.load %arg4[%c0_8, %c0_9, %c0_10] : memref<2x128x128xbf16, #tpu.memory_space<vmem>>, vector<1x128x128xbf16>
    %13 = vector.shape_cast %12 : vector<1x128x128xbf16> to vector<128x128xbf16>
    %c0_11 = arith.constant 0 : index
    %c0_12 = arith.constant 0 : index
    %c0_13 = arith.constant 0 : index
    %14 = vector.load %arg5[%c0_11, %c0_12, %c0_13] : memref<2x1x128xf32, #tpu.memory_space<vmem>>, vector<1x1x128xf32>
    %15 = vector.shape_cast %14 : vector<1x1x128xf32> to vector<1x128xf32>
    %16 = vector.broadcast %15 : vector<1x128xf32> to vector<16x128xf32>
    %17 = arith.addf %1, %16 : vector<16x128xf32>
    %18 = vector.extract_strided_slice %11 {offsets = [0, 0, 0], sizes = [2, 8, 32], strides = [1, 1, 1]} : vector<2x8x384xbf16> to vector<2x8x32xbf16>
    %19 = vector.extract_strided_slice %11 {offsets = [0, 0, 128], sizes = [2, 8, 32], strides = [1, 1, 1]} : vector<2x8x384xbf16> to vector<2x8x32xbf16>
    %20 = vector.extract_strided_slice %11 {offsets = [0, 0, 256], sizes = [2, 8, 32], strides = [1, 1, 1]} : vector<2x8x384xbf16> to vector<2x8x32xbf16>
    "tpu.trace_start"() <{level = 10 : i32, message = "bqd,bkd->bqk"}> : () -> ()
    %cst_14 = arith.constant dense<0.000000e+00> : vector<2x8x8xf32>
    %21 = tpu.matmul %18, %19, %cst_14 {dimension_numbers = #tpu.dot_dimension_numbers<[2], [2], [1], [1], [0, 0, 0, 1, 1, 1], [0], [0]>} : vector<2x8x32xbf16>, vector<2x8x32xbf16>, vector<2x8x8xf32> -> vector<2x8x8xf32>
    "tpu.trace_stop"() : () -> ()
    %cst_15 = arith.constant 0.176776692 : f32
    %22 = vector.broadcast %cst_15 : f32 to vector<2x8x8xf32>
    %23 = arith.mulf %21, %22 : vector<2x8x8xf32>
    %cst_16 = arith.constant dense<0xFF800000> : vector<2x8xf32>
    %24 = vector.multi_reduction <maximumf>, %23, %cst_16 [2] : vector<2x8x8xf32> to vector<2x8xf32>
    %25 = vector.shape_cast %24 : vector<2x8xf32> to vector<2x8x1xf32>
    %26 = vector.broadcast %25 : vector<2x8x1xf32> to vector<2x8x8xf32>
    %27 = arith.subf %23, %26 : vector<2x8x8xf32>
    %28 = math.exp %27 : vector<2x8x8xf32>
    %cst_17 = arith.constant dense<0.000000e+00> : vector<2x8xf32>
    %29 = vector.multi_reduction <add>, %28, %cst_17 [2] : vector<2x8x8xf32> to vector<2x8xf32>
    %30 = vector.shape_cast %29 : vector<2x8xf32> to vector<2x8x1xf32>
    %31 = tpu.reciprocal %30 {approx = true} : vector<2x8x1xf32> -> vector<2x8x1xf32>
    %32 = vector.broadcast %31 : vector<2x8x1xf32> to vector<2x8x8xf32>
    %33 = arith.mulf %28, %32 : vector<2x8x8xf32>
    %34 = arith.truncf %33 : vector<2x8x8xf32> to vector<2x8x8xbf16>
    "tpu.trace_start"() <{level = 10 : i32, message = "bqk,bkd->bqd"}> : () -> ()
    %cst_18 = arith.constant dense<0.000000e+00> : vector<2x8x32xf32>
    %35 = tpu.matmul %34, %20, %cst_18 {dimension_numbers = #tpu.dot_dimension_numbers<[2], [1], [1], [2], [0, 0, 0, 1, 1, 2], [0], [0]>} : vector<2x8x8xbf16>, vector<2x8x32xbf16>, vector<2x8x32xf32> -> vector<2x8x32xf32>
    "tpu.trace_stop"() : () -> ()
    %36 = vector.shape_cast %35 : vector<2x8x32xf32> to vector<16x32xf32>
    %37 = arith.truncf %36 : vector<16x32xf32> to vector<16x32xbf16>
    %38 = vector.extract_strided_slice %13 {offsets = [0, 0], sizes = [32, 128], strides = [1, 1]} : vector<128x128xbf16> to vector<32x128xbf16>
    %cst_19 = arith.constant dense<0.000000e+00> : vector<16x128xf32>
    %39 = tpu.matmul %37, %38, %cst_19 {dimension_numbers = #tpu.dot_dimension_numbers<[1], [0], [0], [1], [0, 0, 1, 1], [], []>} : vector<16x32xbf16>, vector<32x128xbf16>, vector<16x128xf32> -> vector<16x128xf32>
    %40 = arith.addf %17, %39 : vector<16x128xf32>
    %41 = vector.extract_strided_slice %11 {offsets = [0, 0, 32], sizes = [2, 8, 32], strides = [1, 1, 1]} : vector<2x8x384xbf16> to vector<2x8x32xbf16>
    %42 = vector.extract_strided_slice %11 {offsets = [0, 0, 160], sizes = [2, 8, 32], strides = [1, 1, 1]} : vector<2x8x384xbf16> to vector<2x8x32xbf16>
    %43 = vector.extract_strided_slice %11 {offsets = [0, 0, 288], sizes = [2, 8, 32], strides = [1, 1, 1]} : vector<2x8x384xbf16> to vector<2x8x32xbf16>
    "tpu.trace_start"() <{level = 10 : i32, message = "bqd,bkd->bqk"}> : () -> ()
    %cst_20 = arith.constant dense<0.000000e+00> : vector<2x8x8xf32>
    %44 = tpu.matmul %41, %42, %cst_20 {dimension_numbers = #tpu.dot_dimension_numbers<[2], [2], [1], [1], [0, 0, 0, 1, 1, 1], [0], [0]>} : vector<2x8x32xbf16>, vector<2x8x32xbf16>, vector<2x8x8xf32> -> vector<2x8x8xf32>
    "tpu.trace_stop"() : () -> ()
    %cst_21 = arith.constant 0.176776692 : f32
    %45 = vector.broadcast %cst_21 : f32 to vector<2x8x8xf32>
    %46 = arith.mulf %44, %45 : vector<2x8x8xf32>
    %cst_22 = arith.constant dense<0xFF800000> : vector<2x8xf32>
    %47 = vector.multi_reduction <maximumf>, %46, %cst_22 [2] : vector<2x8x8xf32> to vector<2x8xf32>
    %48 = vector.shape_cast %47 : vector<2x8xf32> to vector<2x8x1xf32>
    %49 = vector.broadcast %48 : vector<2x8x1xf32> to vector<2x8x8xf32>
    %50 = arith.subf %46, %49 : vector<2x8x8xf32>
    %51 = math.exp %50 : vector<2x8x8xf32>
    %cst_23 = arith.constant dense<0.000000e+00> : vector<2x8xf32>
    %52 = vector.multi_reduction <add>, %51, %cst_23 [2] : vector<2x8x8xf32> to vector<2x8xf32>
    %53 = vector.shape_cast %52 : vector<2x8xf32> to vector<2x8x1xf32>
    %54 = tpu.reciprocal %53 {approx = true} : vector<2x8x1xf32> -> vector<2x8x1xf32>
    %55 = vector.broadcast %54 : vector<2x8x1xf32> to vector<2x8x8xf32>
    %56 = arith.mulf %51, %55 : vector<2x8x8xf32>
    %57 = arith.truncf %56 : vector<2x8x8xf32> to vector<2x8x8xbf16>
    "tpu.trace_start"() <{level = 10 : i32, message = "bqk,bkd->bqd"}> : () -> ()
    %cst_24 = arith.constant dense<0.000000e+00> : vector<2x8x32xf32>
    %58 = tpu.matmul %57, %43, %cst_24 {dimension_numbers = #tpu.dot_dimension_numbers<[2], [1], [1], [2], [0, 0, 0, 1, 1, 2], [0], [0]>} : vector<2x8x8xbf16>, vector<2x8x32xbf16>, vector<2x8x32xf32> -> vector<2x8x32xf32>
    "tpu.trace_stop"() : () -> ()
    %59 = vector.shape_cast %58 : vector<2x8x32xf32> to vector<16x32xf32>
    %60 = arith.truncf %59 : vector<16x32xf32> to vector<16x32xbf16>
    %61 = vector.extract_strided_slice %13 {offsets = [32, 0], sizes = [32, 128], strides = [1, 1]} : vector<128x128xbf16> to vector<32x128xbf16>
    %cst_25 = arith.constant dense<0.000000e+00> : vector<16x128xf32>
    %62 = tpu.matmul %60, %61, %cst_25 {dimension_numbers = #tpu.dot_dimension_numbers<[1], [0], [0], [1], [0, 0, 1, 1], [], []>} : vector<16x32xbf16>, vector<32x128xbf16>, vector<16x128xf32> -> vector<16x128xf32>
    %63 = arith.addf %40, %62 : vector<16x128xf32>
    %64 = vector.extract_strided_slice %11 {offsets = [0, 0, 64], sizes = [2, 8, 32], strides = [1, 1, 1]} : vector<2x8x384xbf16> to vector<2x8x32xbf16>
    %65 = vector.extract_strided_slice %11 {offsets = [0, 0, 192], sizes = [2, 8, 32], strides = [1, 1, 1]} : vector<2x8x384xbf16> to vector<2x8x32xbf16>
    %66 = vector.extract_strided_slice %11 {offsets = [0, 0, 320], sizes = [2, 8, 32], strides = [1, 1, 1]} : vector<2x8x384xbf16> to vector<2x8x32xbf16>
    "tpu.trace_start"() <{level = 10 : i32, message = "bqd,bkd->bqk"}> : () -> ()
    %cst_26 = arith.constant dense<0.000000e+00> : vector<2x8x8xf32>
    %67 = tpu.matmul %64, %65, %cst_26 {dimension_numbers = #tpu.dot_dimension_numbers<[2], [2], [1], [1], [0, 0, 0, 1, 1, 1], [0], [0]>} : vector<2x8x32xbf16>, vector<2x8x32xbf16>, vector<2x8x8xf32> -> vector<2x8x8xf32>
    "tpu.trace_stop"() : () -> ()
    %cst_27 = arith.constant 0.176776692 : f32
    %68 = vector.broadcast %cst_27 : f32 to vector<2x8x8xf32>
    %69 = arith.mulf %67, %68 : vector<2x8x8xf32>
    %cst_28 = arith.constant dense<0xFF800000> : vector<2x8xf32>
    %70 = vector.multi_reduction <maximumf>, %69, %cst_28 [2] : vector<2x8x8xf32> to vector<2x8xf32>
    %71 = vector.shape_cast %70 : vector<2x8xf32> to vector<2x8x1xf32>
    %72 = vector.broadcast %71 : vector<2x8x1xf32> to vector<2x8x8xf32>
    %73 = arith.subf %69, %72 : vector<2x8x8xf32>
    %74 = math.exp %73 : vector<2x8x8xf32>
    %cst_29 = arith.constant dense<0.000000e+00> : vector<2x8xf32>
    %75 = vector.multi_reduction <add>, %74, %cst_29 [2] : vector<2x8x8xf32> to vector<2x8xf32>
    %76 = vector.shape_cast %75 : vector<2x8xf32> to vector<2x8x1xf32>
    %77 = tpu.reciprocal %76 {approx = true} : vector<2x8x1xf32> -> vector<2x8x1xf32>
    %78 = vector.broadcast %77 : vector<2x8x1xf32> to vector<2x8x8xf32>
    %79 = arith.mulf %74, %78 : vector<2x8x8xf32>
    %80 = arith.truncf %79 : vector<2x8x8xf32> to vector<2x8x8xbf16>
    "tpu.trace_start"() <{level = 10 : i32, message = "bqk,bkd->bqd"}> : () -> ()
    %cst_30 = arith.constant dense<0.000000e+00> : vector<2x8x32xf32>
    %81 = tpu.matmul %80, %66, %cst_30 {dimension_numbers = #tpu.dot_dimension_numbers<[2], [1], [1], [2], [0, 0, 0, 1, 1, 2], [0], [0]>} : vector<2x8x8xbf16>, vector<2x8x32xbf16>, vector<2x8x32xf32> -> vector<2x8x32xf32>
    "tpu.trace_stop"() : () -> ()
    %82 = vector.shape_cast %81 : vector<2x8x32xf32> to vector<16x32xf32>
    %83 = arith.truncf %82 : vector<16x32xf32> to vector<16x32xbf16>
    %84 = vector.extract_strided_slice %13 {offsets = [64, 0], sizes = [32, 128], strides = [1, 1]} : vector<128x128xbf16> to vector<32x128xbf16>
    %cst_31 = arith.constant dense<0.000000e+00> : vector<16x128xf32>
    %85 = tpu.matmul %83, %84, %cst_31 {dimension_numbers = #tpu.dot_dimension_numbers<[1], [0], [0], [1], [0, 0, 1, 1], [], []>} : vector<16x32xbf16>, vector<32x128xbf16>, vector<16x128xf32> -> vector<16x128xf32>
    %86 = arith.addf %63, %85 : vector<16x128xf32>
    %87 = vector.extract_strided_slice %11 {offsets = [0, 0, 96], sizes = [2, 8, 32], strides = [1, 1, 1]} : vector<2x8x384xbf16> to vector<2x8x32xbf16>
    %88 = vector.extract_strided_slice %11 {offsets = [0, 0, 224], sizes = [2, 8, 32], strides = [1, 1, 1]} : vector<2x8x384xbf16> to vector<2x8x32xbf16>
    %89 = vector.extract_strided_slice %11 {offsets = [0, 0, 352], sizes = [2, 8, 32], strides = [1, 1, 1]} : vector<2x8x384xbf16> to vector<2x8x32xbf16>
    "tpu.trace_start"() <{level = 10 : i32, message = "bqd,bkd->bqk"}> : () -> ()
    %cst_32 = arith.constant dense<0.000000e+00> : vector<2x8x8xf32>
    %90 = tpu.matmul %87, %88, %cst_32 {dimension_numbers = #tpu.dot_dimension_numbers<[2], [2], [1], [1], [0, 0, 0, 1, 1, 1], [0], [0]>} : vector<2x8x32xbf16>, vector<2x8x32xbf16>, vector<2x8x8xf32> -> vector<2x8x8xf32>
    "tpu.trace_stop"() : () -> ()
    %cst_33 = arith.constant 0.176776692 : f32
    %91 = vector.broadcast %cst_33 : f32 to vector<2x8x8xf32>
    %92 = arith.mulf %90, %91 : vector<2x8x8xf32>
    %cst_34 = arith.constant dense<0xFF800000> : vector<2x8xf32>
    %93 = vector.multi_reduction <maximumf>, %92, %cst_34 [2] : vector<2x8x8xf32> to vector<2x8xf32>
    %94 = vector.shape_cast %93 : vector<2x8xf32> to vector<2x8x1xf32>
    %95 = vector.broadcast %94 : vector<2x8x1xf32> to vector<2x8x8xf32>
    %96 = arith.subf %92, %95 : vector<2x8x8xf32>
    %97 = math.exp %96 : vector<2x8x8xf32>
    %cst_35 = arith.constant dense<0.000000e+00> : vector<2x8xf32>
    %98 = vector.multi_reduction <add>, %97, %cst_35 [2] : vector<2x8x8xf32> to vector<2x8xf32>
    %99 = vector.shape_cast %98 : vector<2x8xf32> to vector<2x8x1xf32>
    %100 = tpu.reciprocal %99 {approx = true} : vector<2x8x1xf32> -> vector<2x8x1xf32>
    %101 = vector.broadcast %100 : vector<2x8x1xf32> to vector<2x8x8xf32>
    %102 = arith.mulf %97, %101 : vector<2x8x8xf32>
    %103 = arith.truncf %102 : vector<2x8x8xf32> to vector<2x8x8xbf16>
    "tpu.trace_start"() <{level = 10 : i32, message = "bqk,bkd->bqd"}> : () -> ()
    %cst_36 = arith.constant dense<0.000000e+00> : vector<2x8x32xf32>
    %104 = tpu.matmul %103, %89, %cst_36 {dimension_numbers = #tpu.dot_dimension_numbers<[2], [1], [1], [2], [0, 0, 0, 1, 1, 2], [0], [0]>} : vector<2x8x8xbf16>, vector<2x8x32xbf16>, vector<2x8x32xf32> -> vector<2x8x32xf32>
    "tpu.trace_stop"() : () -> ()
    %105 = vector.shape_cast %104 : vector<2x8x32xf32> to vector<16x32xf32>
    %106 = arith.truncf %105 : vector<16x32xf32> to vector<16x32xbf16>
    %107 = vector.extract_strided_slice %13 {offsets = [96, 0], sizes = [32, 128], strides = [1, 1]} : vector<128x128xbf16> to vector<32x128xbf16>
    %cst_37 = arith.constant dense<0.000000e+00> : vector<16x128xf32>
    %108 = tpu.matmul %106, %107, %cst_37 {dimension_numbers = #tpu.dot_dimension_numbers<[1], [0], [0], [1], [0, 0, 1, 1], [], []>} : vector<16x32xbf16>, vector<32x128xbf16>, vector<16x128xf32> -> vector<16x128xf32>
    %109 = arith.addf %86, %108 : vector<16x128xf32>
    %c0_38 = arith.constant 0 : index
    %c0_39 = arith.constant 0 : index
    %c0_40 = arith.constant 0 : index
    %110 = vector.load %arg6[%c0_38, %c0_39, %c0_40] : memref<2x1x128xf32, #tpu.memory_space<vmem>>, vector<1x1x128xf32>
    %111 = vector.shape_cast %110 : vector<1x1x128xf32> to vector<1x128xf32>
    %c0_41 = arith.constant 0 : index
    %c0_42 = arith.constant 0 : index
    %c0_43 = arith.constant 0 : index
    %112 = vector.load %arg7[%c0_41, %c0_42, %c0_43] : memref<2x1x128xf32, #tpu.memory_space<vmem>>, vector<1x1x128xf32>
    %113 = vector.shape_cast %112 : vector<1x1x128xf32> to vector<1x128xf32>
    %cst_44 = arith.constant dense<0.000000e+00> : vector<16xf32>
    %114 = vector.multi_reduction <add>, %109, %cst_44 [1] : vector<16x128xf32> to vector<16xf32>
    %115 = vector.shape_cast %114 : vector<16xf32> to vector<16x1xf32>
    %cst_45 = arith.constant 1.280000e+02 : f32
    %116 = vector.broadcast %cst_45 : f32 to vector<16x1xf32>
    %117 = arith.divf %115, %116 : vector<16x1xf32>
    %118 = vector.broadcast %117 : vector<16x1xf32> to vector<16x128xf32>
    %119 = arith.subf %109, %118 : vector<16x128xf32>
    %120 = arith.mulf %119, %119 : vector<16x128xf32>
    %cst_46 = arith.constant dense<0.000000e+00> : vector<16xf32>
    %121 = vector.multi_reduction <add>, %120, %cst_46 [1] : vector<16x128xf32> to vector<16xf32>
    %122 = vector.shape_cast %121 : vector<16xf32> to vector<16x1xf32>
    %cst_47 = arith.constant 1.280000e+02 : f32
    %123 = vector.broadcast %cst_47 : f32 to vector<16x1xf32>
    %124 = arith.divf %122, %123 : vector<16x1xf32>
    %125 = vector.broadcast %117 : vector<16x1xf32> to vector<16x128xf32>
    %126 = arith.subf %109, %125 : vector<16x128xf32>
    %cst_48 = arith.constant 9.99999974E-6 : f32
    %127 = vector.broadcast %cst_48 : f32 to vector<16x1xf32>
    %128 = arith.addf %124, %127 : vector<16x1xf32>
    %129 = math.rsqrt %128 : vector<16x1xf32>
    %130 = vector.broadcast %129 : vector<16x1xf32> to vector<16x128xf32>
    %131 = arith.mulf %126, %130 : vector<16x128xf32>
    %132 = vector.broadcast %111 : vector<1x128xf32> to vector<16x128xf32>
    %133 = arith.mulf %131, %132 : vector<16x128xf32>
    %134 = vector.broadcast %113 : vector<1x128xf32> to vector<16x128xf32>
    %135 = arith.addf %133, %134 : vector<16x128xf32>
    %136 = arith.truncf %135 : vector<16x128xf32> to vector<16x128xbf16>
    %c0_49 = arith.constant 0 : index
    %c0_50 = arith.constant 0 : index
    %c0_51 = arith.constant 0 : index
    %137 = vector.load %arg8[%c0_49, %c0_50, %c0_51] : memref<2x128x256xbf16, #tpu.memory_space<vmem>>, vector<1x128x256xbf16>
    %138 = vector.shape_cast %137 : vector<1x128x256xbf16> to vector<128x256xbf16>
    %cst_52 = arith.constant dense<0.000000e+00> : vector<16x256xf32>
    %139 = tpu.matmul %136, %138, %cst_52 {dimension_numbers = #tpu.dot_dimension_numbers<[1], [0], [0], [1], [0, 0, 1, 1], [], []>} : vector<16x128xbf16>, vector<128x256xbf16>, vector<16x256xf32> -> vector<16x256xf32>
    %c0_53 = arith.constant 0 : index
    %c0_54 = arith.constant 0 : index
    %c0_55 = arith.constant 0 : index
    %140 = vector.load %arg9[%c0_53, %c0_54, %c0_55] : memref<2x1x256xf32, #tpu.memory_space<vmem>>, vector<1x1x256xf32>
    %141 = vector.shape_cast %140 : vector<1x1x256xf32> to vector<1x256xf32>
    %142 = vector.broadcast %141 : vector<1x256xf32> to vector<16x256xf32>
    %143 = arith.addf %139, %142 : vector<16x256xf32>
    %cst_56 = arith.constant 0.000000e+00 : f32
    %144 = vector.broadcast %cst_56 : f32 to vector<16x256xf32>
    %145 = arith.maximumf %143, %144 : vector<16x256xf32>
    %146 = arith.truncf %145 : vector<16x256xf32> to vector<16x256xbf16>
    %c0_57 = arith.constant 0 : index
    %c0_58 = arith.constant 0 : index
    %c0_59 = arith.constant 0 : index
    %147 = vector.load %arg10[%c0_57, %c0_58, %c0_59] : memref<2x256x128xbf16, #tpu.memory_space<vmem>>, vector<1x256x128xbf16>
    %148 = vector.shape_cast %147 : vector<1x256x128xbf16> to vector<256x128xbf16>
    %cst_60 = arith.constant dense<0.000000e+00> : vector<16x128xf32>
    %149 = tpu.matmul %146, %148, %cst_60 {dimension_numbers = #tpu.dot_dimension_numbers<[1], [0], [0], [1], [0, 0, 1, 1], [], []>} : vector<16x256xbf16>, vector<256x128xbf16>, vector<16x128xf32> -> vector<16x128xf32>
    %c0_61 = arith.constant 0 : index
    %c0_62 = arith.constant 0 : index
    %c0_63 = arith.constant 0 : index
    %150 = vector.load %arg11[%c0_61, %c0_62, %c0_63] : memref<2x1x128xf32, #tpu.memory_space<vmem>>, vector<1x1x128xf32>
    %151 = vector.shape_cast %150 : vector<1x1x128xf32> to vector<1x128xf32>
    %152 = vector.broadcast %151 : vector<1x128xf32> to vector<16x128xf32>
    %153 = arith.addf %149, %152 : vector<16x128xf32>
    %154 = arith.addf %135, %153 : vector<16x128xf32>
    %c0_64 = arith.constant 0 : index
    %c0_65 = arith.constant 0 : index
    %c0_66 = arith.constant 0 : index
    %155 = vector.load %arg12[%c0_64, %c0_65, %c0_66] : memref<2x1x128xf32, #tpu.memory_space<vmem>>, vector<1x1x128xf32>
    %156 = vector.shape_cast %155 : vector<1x1x128xf32> to vector<1x128xf32>
    %c0_67 = arith.constant 0 : index
    %c0_68 = arith.constant 0 : index
    %c0_69 = arith.constant 0 : index
    %157 = vector.load %arg13[%c0_67, %c0_68, %c0_69] : memref<2x1x128xf32, #tpu.memory_space<vmem>>, vector<1x1x128xf32>
    %158 = vector.shape_cast %157 : vector<1x1x128xf32> to vector<1x128xf32>
    %cst_70 = arith.constant dense<0.000000e+00> : vector<16xf32>
    %159 = vector.multi_reduction <add>, %154, %cst_70 [1] : vector<16x128xf32> to vector<16xf32>
    %160 = vector.shape_cast %159 : vector<16xf32> to vector<16x1xf32>
    %cst_71 = arith.constant 1.280000e+02 : f32
    %161 = vector.broadcast %cst_71 : f32 to vector<16x1xf32>
    %162 = arith.divf %160, %161 : vector<16x1xf32>
    %163 = vector.broadcast %162 : vector<16x1xf32> to vector<16x128xf32>
    %164 = arith.subf %154, %163 : vector<16x128xf32>
    %165 = arith.mulf %164, %164 : vector<16x128xf32>
    %cst_72 = arith.constant dense<0.000000e+00> : vector<16xf32>
    %166 = vector.multi_reduction <add>, %165, %cst_72 [1] : vector<16x128xf32> to vector<16xf32>
    %167 = vector.shape_cast %166 : vector<16xf32> to vector<16x1xf32>
    %cst_73 = arith.constant 1.280000e+02 : f32
    %168 = vector.broadcast %cst_73 : f32 to vector<16x1xf32>
    %169 = arith.divf %167, %168 : vector<16x1xf32>
    %170 = vector.broadcast %162 : vector<16x1xf32> to vector<16x128xf32>
    %171 = arith.subf %154, %170 : vector<16x128xf32>
    %cst_74 = arith.constant 9.99999974E-6 : f32
    %172 = vector.broadcast %cst_74 : f32 to vector<16x1xf32>
    %173 = arith.addf %169, %172 : vector<16x1xf32>
    %174 = math.rsqrt %173 : vector<16x1xf32>
    %175 = vector.broadcast %174 : vector<16x1xf32> to vector<16x128xf32>
    %176 = arith.mulf %171, %175 : vector<16x128xf32>
    %177 = vector.broadcast %156 : vector<1x128xf32> to vector<16x128xf32>
    %178 = arith.mulf %176, %177 : vector<16x128xf32>
    %179 = vector.broadcast %158 : vector<1x128xf32> to vector<16x128xf32>
    %180 = arith.addf %178, %179 : vector<16x128xf32>
    %181 = arith.truncf %180 : vector<16x128xf32> to vector<16x128xbf16>
    %c1 = arith.constant 1 : index
    %c0_75 = arith.constant 0 : index
    %c0_76 = arith.constant 0 : index
    %182 = vector.load %arg2[%c1, %c0_75, %c0_76] : memref<2x128x384xbf16, #tpu.memory_space<vmem>>, vector<1x128x384xbf16>
    %183 = vector.shape_cast %182 : vector<1x128x384xbf16> to vector<128x384xbf16>
    %cst_77 = arith.constant dense<0.000000e+00> : vector<16x384xf32>
    %184 = tpu.matmul %181, %183, %cst_77 {dimension_numbers = #tpu.dot_dimension_numbers<[1], [0], [0], [1], [0, 0, 1, 1], [], []>} : vector<16x128xbf16>, vector<128x384xbf16>, vector<16x384xf32> -> vector<16x384xf32>
    %c1_78 = arith.constant 1 : index
    %c0_79 = arith.constant 0 : index
    %c0_80 = arith.constant 0 : index
    %185 = vector.load %arg3[%c1_78, %c0_79, %c0_80] : memref<2x1x384xf32, #tpu.memory_space<vmem>>, vector<1x1x384xf32>
    %186 = vector.shape_cast %185 : vector<1x1x384xf32> to vector<1x384xf32>
    %187 = vector.broadcast %186 : vector<1x384xf32> to vector<16x384xf32>
    %188 = arith.addf %184, %187 : vector<16x384xf32>
    %189 = arith.truncf %188 : vector<16x384xf32> to vector<16x384xbf16>
    %190 = vector.shape_cast %189 : vector<16x384xbf16> to vector<2x8x384xbf16>
    %c1_81 = arith.constant 1 : index
    %c0_82 = arith.constant 0 : index
    %c0_83 = arith.constant 0 : index
    %191 = vector.load %arg4[%c1_81, %c0_82, %c0_83] : memref<2x128x128xbf16, #tpu.memory_space<vmem>>, vector<1x128x128xbf16>
    %192 = vector.shape_cast %191 : vector<1x128x128xbf16> to vector<128x128xbf16>
    %c1_84 = arith.constant 1 : index
    %c0_85 = arith.constant 0 : index
    %c0_86 = arith.constant 0 : index
    %193 = vector.load %arg5[%c1_84, %c0_85, %c0_86] : memref<2x1x128xf32, #tpu.memory_space<vmem>>, vector<1x1x128xf32>
    %194 = vector.shape_cast %193 : vector<1x1x128xf32> to vector<1x128xf32>
    %195 = vector.broadcast %194 : vector<1x128xf32> to vector<16x128xf32>
    %196 = arith.addf %180, %195 : vector<16x128xf32>
    %197 = vector.extract_strided_slice %190 {offsets = [0, 0, 0], sizes = [2, 8, 32], strides = [1, 1, 1]} : vector<2x8x384xbf16> to vector<2x8x32xbf16>
    %198 = vector.extract_strided_slice %190 {offsets = [0, 0, 128], sizes = [2, 8, 32], strides = [1, 1, 1]} : vector<2x8x384xbf16> to vector<2x8x32xbf16>
    %199 = vector.extract_strided_slice %190 {offsets = [0, 0, 256], sizes = [2, 8, 32], strides = [1, 1, 1]} : vector<2x8x384xbf16> to vector<2x8x32xbf16>
    "tpu.trace_start"() <{level = 10 : i32, message = "bqd,bkd->bqk"}> : () -> ()
    %cst_87 = arith.constant dense<0.000000e+00> : vector<2x8x8xf32>
    %200 = tpu.matmul %197, %198, %cst_87 {dimension_numbers = #tpu.dot_dimension_numbers<[2], [2], [1], [1], [0, 0, 0, 1, 1, 1], [0], [0]>} : vector<2x8x32xbf16>, vector<2x8x32xbf16>, vector<2x8x8xf32> -> vector<2x8x8xf32>
    "tpu.trace_stop"() : () -> ()
    %cst_88 = arith.constant 0.176776692 : f32
    %201 = vector.broadcast %cst_88 : f32 to vector<2x8x8xf32>
    %202 = arith.mulf %200, %201 : vector<2x8x8xf32>
    %cst_89 = arith.constant dense<0xFF800000> : vector<2x8xf32>
    %203 = vector.multi_reduction <maximumf>, %202, %cst_89 [2] : vector<2x8x8xf32> to vector<2x8xf32>
    %204 = vector.shape_cast %203 : vector<2x8xf32> to vector<2x8x1xf32>
    %205 = vector.broadcast %204 : vector<2x8x1xf32> to vector<2x8x8xf32>
    %206 = arith.subf %202, %205 : vector<2x8x8xf32>
    %207 = math.exp %206 : vector<2x8x8xf32>
    %cst_90 = arith.constant dense<0.000000e+00> : vector<2x8xf32>
    %208 = vector.multi_reduction <add>, %207, %cst_90 [2] : vector<2x8x8xf32> to vector<2x8xf32>
    %209 = vector.shape_cast %208 : vector<2x8xf32> to vector<2x8x1xf32>
    %210 = tpu.reciprocal %209 {approx = true} : vector<2x8x1xf32> -> vector<2x8x1xf32>
    %211 = vector.broadcast %210 : vector<2x8x1xf32> to vector<2x8x8xf32>
    %212 = arith.mulf %207, %211 : vector<2x8x8xf32>
    %213 = arith.truncf %212 : vector<2x8x8xf32> to vector<2x8x8xbf16>
    "tpu.trace_start"() <{level = 10 : i32, message = "bqk,bkd->bqd"}> : () -> ()
    %cst_91 = arith.constant dense<0.000000e+00> : vector<2x8x32xf32>
    %214 = tpu.matmul %213, %199, %cst_91 {dimension_numbers = #tpu.dot_dimension_numbers<[2], [1], [1], [2], [0, 0, 0, 1, 1, 2], [0], [0]>} : vector<2x8x8xbf16>, vector<2x8x32xbf16>, vector<2x8x32xf32> -> vector<2x8x32xf32>
    "tpu.trace_stop"() : () -> ()
    %215 = vector.shape_cast %214 : vector<2x8x32xf32> to vector<16x32xf32>
    %216 = arith.truncf %215 : vector<16x32xf32> to vector<16x32xbf16>
    %217 = vector.extract_strided_slice %192 {offsets = [0, 0], sizes = [32, 128], strides = [1, 1]} : vector<128x128xbf16> to vector<32x128xbf16>
    %cst_92 = arith.constant dense<0.000000e+00> : vector<16x128xf32>
    %218 = tpu.matmul %216, %217, %cst_92 {dimension_numbers = #tpu.dot_dimension_numbers<[1], [0], [0], [1], [0, 0, 1, 1], [], []>} : vector<16x32xbf16>, vector<32x128xbf16>, vector<16x128xf32> -> vector<16x128xf32>
    %219 = arith.addf %196, %218 : vector<16x128xf32>
    %220 = vector.extract_strided_slice %190 {offsets = [0, 0, 32], sizes = [2, 8, 32], strides = [1, 1, 1]} : vector<2x8x384xbf16> to vector<2x8x32xbf16>
    %221 = vector.extract_strided_slice %190 {offsets = [0, 0, 160], sizes = [2, 8, 32], strides = [1, 1, 1]} : vector<2x8x384xbf16> to vector<2x8x32xbf16>
    %222 = vector.extract_strided_slice %190 {offsets = [0, 0, 288], sizes = [2, 8, 32], strides = [1, 1, 1]} : vector<2x8x384xbf16> to vector<2x8x32xbf16>
    "tpu.trace_start"() <{level = 10 : i32, message = "bqd,bkd->bqk"}> : () -> ()
    %cst_93 = arith.constant dense<0.000000e+00> : vector<2x8x8xf32>
    %223 = tpu.matmul %220, %221, %cst_93 {dimension_numbers = #tpu.dot_dimension_numbers<[2], [2], [1], [1], [0, 0, 0, 1, 1, 1], [0], [0]>} : vector<2x8x32xbf16>, vector<2x8x32xbf16>, vector<2x8x8xf32> -> vector<2x8x8xf32>
    "tpu.trace_stop"() : () -> ()
    %cst_94 = arith.constant 0.176776692 : f32
    %224 = vector.broadcast %cst_94 : f32 to vector<2x8x8xf32>
    %225 = arith.mulf %223, %224 : vector<2x8x8xf32>
    %cst_95 = arith.constant dense<0xFF800000> : vector<2x8xf32>
    %226 = vector.multi_reduction <maximumf>, %225, %cst_95 [2] : vector<2x8x8xf32> to vector<2x8xf32>
    %227 = vector.shape_cast %226 : vector<2x8xf32> to vector<2x8x1xf32>
    %228 = vector.broadcast %227 : vector<2x8x1xf32> to vector<2x8x8xf32>
    %229 = arith.subf %225, %228 : vector<2x8x8xf32>
    %230 = math.exp %229 : vector<2x8x8xf32>
    %cst_96 = arith.constant dense<0.000000e+00> : vector<2x8xf32>
    %231 = vector.multi_reduction <add>, %230, %cst_96 [2] : vector<2x8x8xf32> to vector<2x8xf32>
    %232 = vector.shape_cast %231 : vector<2x8xf32> to vector<2x8x1xf32>
    %233 = tpu.reciprocal %232 {approx = true} : vector<2x8x1xf32> -> vector<2x8x1xf32>
    %234 = vector.broadcast %233 : vector<2x8x1xf32> to vector<2x8x8xf32>
    %235 = arith.mulf %230, %234 : vector<2x8x8xf32>
    %236 = arith.truncf %235 : vector<2x8x8xf32> to vector<2x8x8xbf16>
    "tpu.trace_start"() <{level = 10 : i32, message = "bqk,bkd->bqd"}> : () -> ()
    %cst_97 = arith.constant dense<0.000000e+00> : vector<2x8x32xf32>
    %237 = tpu.matmul %236, %222, %cst_97 {dimension_numbers = #tpu.dot_dimension_numbers<[2], [1], [1], [2], [0, 0, 0, 1, 1, 2], [0], [0]>} : vector<2x8x8xbf16>, vector<2x8x32xbf16>, vector<2x8x32xf32> -> vector<2x8x32xf32>
    "tpu.trace_stop"() : () -> ()
    %238 = vector.shape_cast %237 : vector<2x8x32xf32> to vector<16x32xf32>
    %239 = arith.truncf %238 : vector<16x32xf32> to vector<16x32xbf16>
    %240 = vector.extract_strided_slice %192 {offsets = [32, 0], sizes = [32, 128], strides = [1, 1]} : vector<128x128xbf16> to vector<32x128xbf16>
    %cst_98 = arith.constant dense<0.000000e+00> : vector<16x128xf32>
    %241 = tpu.matmul %239, %240, %cst_98 {dimension_numbers = #tpu.dot_dimension_numbers<[1], [0], [0], [1], [0, 0, 1, 1], [], []>} : vector<16x32xbf16>, vector<32x128xbf16>, vector<16x128xf32> -> vector<16x128xf32>
    %242 = arith.addf %219, %241 : vector<16x128xf32>
    %243 = vector.extract_strided_slice %190 {offsets = [0, 0, 64], sizes = [2, 8, 32], strides = [1, 1, 1]} : vector<2x8x384xbf16> to vector<2x8x32xbf16>
    %244 = vector.extract_strided_slice %190 {offsets = [0, 0, 192], sizes = [2, 8, 32], strides = [1, 1, 1]} : vector<2x8x384xbf16> to vector<2x8x32xbf16>
    %245 = vector.extract_strided_slice %190 {offsets = [0, 0, 320], sizes = [2, 8, 32], strides = [1, 1, 1]} : vector<2x8x384xbf16> to vector<2x8x32xbf16>
    "tpu.trace_start"() <{level = 10 : i32, message = "bqd,bkd->bqk"}> : () -> ()
    %cst_99 = arith.constant dense<0.000000e+00> : vector<2x8x8xf32>
    %246 = tpu.matmul %243, %244, %cst_99 {dimension_numbers = #tpu.dot_dimension_numbers<[2], [2], [1], [1], [0, 0, 0, 1, 1, 1], [0], [0]>} : vector<2x8x32xbf16>, vector<2x8x32xbf16>, vector<2x8x8xf32> -> vector<2x8x8xf32>
    "tpu.trace_stop"() : () -> ()
    %cst_100 = arith.constant 0.176776692 : f32
    %247 = vector.broadcast %cst_100 : f32 to vector<2x8x8xf32>
    %248 = arith.mulf %246, %247 : vector<2x8x8xf32>
    %cst_101 = arith.constant dense<0xFF800000> : vector<2x8xf32>
    %249 = vector.multi_reduction <maximumf>, %248, %cst_101 [2] : vector<2x8x8xf32> to vector<2x8xf32>
    %250 = vector.shape_cast %249 : vector<2x8xf32> to vector<2x8x1xf32>
    %251 = vector.broadcast %250 : vector<2x8x1xf32> to vector<2x8x8xf32>
    %252 = arith.subf %248, %251 : vector<2x8x8xf32>
    %253 = math.exp %252 : vector<2x8x8xf32>
    %cst_102 = arith.constant dense<0.000000e+00> : vector<2x8xf32>
    %254 = vector.multi_reduction <add>, %253, %cst_102 [2] : vector<2x8x8xf32> to vector<2x8xf32>
    %255 = vector.shape_cast %254 : vector<2x8xf32> to vector<2x8x1xf32>
    %256 = tpu.reciprocal %255 {approx = true} : vector<2x8x1xf32> -> vector<2x8x1xf32>
    %257 = vector.broadcast %256 : vector<2x8x1xf32> to vector<2x8x8xf32>
    %258 = arith.mulf %253, %257 : vector<2x8x8xf32>
    %259 = arith.truncf %258 : vector<2x8x8xf32> to vector<2x8x8xbf16>
    "tpu.trace_start"() <{level = 10 : i32, message = "bqk,bkd->bqd"}> : () -> ()
    %cst_103 = arith.constant dense<0.000000e+00> : vector<2x8x32xf32>
    %260 = tpu.matmul %259, %245, %cst_103 {dimension_numbers = #tpu.dot_dimension_numbers<[2], [1], [1], [2], [0, 0, 0, 1, 1, 2], [0], [0]>} : vector<2x8x8xbf16>, vector<2x8x32xbf16>, vector<2x8x32xf32> -> vector<2x8x32xf32>
    "tpu.trace_stop"() : () -> ()
    %261 = vector.shape_cast %260 : vector<2x8x32xf32> to vector<16x32xf32>
    %262 = arith.truncf %261 : vector<16x32xf32> to vector<16x32xbf16>
    %263 = vector.extract_strided_slice %192 {offsets = [64, 0], sizes = [32, 128], strides = [1, 1]} : vector<128x128xbf16> to vector<32x128xbf16>
    %cst_104 = arith.constant dense<0.000000e+00> : vector<16x128xf32>
    %264 = tpu.matmul %262, %263, %cst_104 {dimension_numbers = #tpu.dot_dimension_numbers<[1], [0], [0], [1], [0, 0, 1, 1], [], []>} : vector<16x32xbf16>, vector<32x128xbf16>, vector<16x128xf32> -> vector<16x128xf32>
    %265 = arith.addf %242, %264 : vector<16x128xf32>
    %266 = vector.extract_strided_slice %190 {offsets = [0, 0, 96], sizes = [2, 8, 32], strides = [1, 1, 1]} : vector<2x8x384xbf16> to vector<2x8x32xbf16>
    %267 = vector.extract_strided_slice %190 {offsets = [0, 0, 224], sizes = [2, 8, 32], strides = [1, 1, 1]} : vector<2x8x384xbf16> to vector<2x8x32xbf16>
    %268 = vector.extract_strided_slice %190 {offsets = [0, 0, 352], sizes = [2, 8, 32], strides = [1, 1, 1]} : vector<2x8x384xbf16> to vector<2x8x32xbf16>
    "tpu.trace_start"() <{level = 10 : i32, message = "bqd,bkd->bqk"}> : () -> ()
    %cst_105 = arith.constant dense<0.000000e+00> : vector<2x8x8xf32>
    %269 = tpu.matmul %266, %267, %cst_105 {dimension_numbers = #tpu.dot_dimension_numbers<[2], [2], [1], [1], [0, 0, 0, 1, 1, 1], [0], [0]>} : vector<2x8x32xbf16>, vector<2x8x32xbf16>, vector<2x8x8xf32> -> vector<2x8x8xf32>
    "tpu.trace_stop"() : () -> ()
    %cst_106 = arith.constant 0.176776692 : f32
    %270 = vector.broadcast %cst_106 : f32 to vector<2x8x8xf32>
    %271 = arith.mulf %269, %270 : vector<2x8x8xf32>
    %cst_107 = arith.constant dense<0xFF800000> : vector<2x8xf32>
    %272 = vector.multi_reduction <maximumf>, %271, %cst_107 [2] : vector<2x8x8xf32> to vector<2x8xf32>
    %273 = vector.shape_cast %272 : vector<2x8xf32> to vector<2x8x1xf32>
    %274 = vector.broadcast %273 : vector<2x8x1xf32> to vector<2x8x8xf32>
    %275 = arith.subf %271, %274 : vector<2x8x8xf32>
    %276 = math.exp %275 : vector<2x8x8xf32>
    %cst_108 = arith.constant dense<0.000000e+00> : vector<2x8xf32>
    %277 = vector.multi_reduction <add>, %276, %cst_108 [2] : vector<2x8x8xf32> to vector<2x8xf32>
    %278 = vector.shape_cast %277 : vector<2x8xf32> to vector<2x8x1xf32>
    %279 = tpu.reciprocal %278 {approx = true} : vector<2x8x1xf32> -> vector<2x8x1xf32>
    %280 = vector.broadcast %279 : vector<2x8x1xf32> to vector<2x8x8xf32>
    %281 = arith.mulf %276, %280 : vector<2x8x8xf32>
    %282 = arith.truncf %281 : vector<2x8x8xf32> to vector<2x8x8xbf16>
    "tpu.trace_start"() <{level = 10 : i32, message = "bqk,bkd->bqd"}> : () -> ()
    %cst_109 = arith.constant dense<0.000000e+00> : vector<2x8x32xf32>
    %283 = tpu.matmul %282, %268, %cst_109 {dimension_numbers = #tpu.dot_dimension_numbers<[2], [1], [1], [2], [0, 0, 0, 1, 1, 2], [0], [0]>} : vector<2x8x8xbf16>, vector<2x8x32xbf16>, vector<2x8x32xf32> -> vector<2x8x32xf32>
    "tpu.trace_stop"() : () -> ()
    %284 = vector.shape_cast %283 : vector<2x8x32xf32> to vector<16x32xf32>
    %285 = arith.truncf %284 : vector<16x32xf32> to vector<16x32xbf16>
    %286 = vector.extract_strided_slice %192 {offsets = [96, 0], sizes = [32, 128], strides = [1, 1]} : vector<128x128xbf16> to vector<32x128xbf16>
    %cst_110 = arith.constant dense<0.000000e+00> : vector<16x128xf32>
    %287 = tpu.matmul %285, %286, %cst_110 {dimension_numbers = #tpu.dot_dimension_numbers<[1], [0], [0], [1], [0, 0, 1, 1], [], []>} : vector<16x32xbf16>, vector<32x128xbf16>, vector<16x128xf32> -> vector<16x128xf32>
    %288 = arith.addf %265, %287 : vector<16x128xf32>
    %c1_111 = arith.constant 1 : index
    %c0_112 = arith.constant 0 : index
    %c0_113 = arith.constant 0 : index
    %289 = vector.load %arg6[%c1_111, %c0_112, %c0_113] : memref<2x1x128xf32, #tpu.memory_space<vmem>>, vector<1x1x128xf32>
    %290 = vector.shape_cast %289 : vector<1x1x128xf32> to vector<1x128xf32>
    %c1_114 = arith.constant 1 : index
    %c0_115 = arith.constant 0 : index
    %c0_116 = arith.constant 0 : index
    %291 = vector.load %arg7[%c1_114, %c0_115, %c0_116] : memref<2x1x128xf32, #tpu.memory_space<vmem>>, vector<1x1x128xf32>
    %292 = vector.shape_cast %291 : vector<1x1x128xf32> to vector<1x128xf32>
    %cst_117 = arith.constant dense<0.000000e+00> : vector<16xf32>
    %293 = vector.multi_reduction <add>, %288, %cst_117 [1] : vector<16x128xf32> to vector<16xf32>
    %294 = vector.shape_cast %293 : vector<16xf32> to vector<16x1xf32>
    %cst_118 = arith.constant 1.280000e+02 : f32
    %295 = vector.broadcast %cst_118 : f32 to vector<16x1xf32>
    %296 = arith.divf %294, %295 : vector<16x1xf32>
    %297 = vector.broadcast %296 : vector<16x1xf32> to vector<16x128xf32>
    %298 = arith.subf %288, %297 : vector<16x128xf32>
    %299 = arith.mulf %298, %298 : vector<16x128xf32>
    %cst_119 = arith.constant dense<0.000000e+00> : vector<16xf32>
    %300 = vector.multi_reduction <add>, %299, %cst_119 [1] : vector<16x128xf32> to vector<16xf32>
    %301 = vector.shape_cast %300 : vector<16xf32> to vector<16x1xf32>
    %cst_120 = arith.constant 1.280000e+02 : f32
    %302 = vector.broadcast %cst_120 : f32 to vector<16x1xf32>
    %303 = arith.divf %301, %302 : vector<16x1xf32>
    %304 = vector.broadcast %296 : vector<16x1xf32> to vector<16x128xf32>
    %305 = arith.subf %288, %304 : vector<16x128xf32>
    %cst_121 = arith.constant 9.99999974E-6 : f32
    %306 = vector.broadcast %cst_121 : f32 to vector<16x1xf32>
    %307 = arith.addf %303, %306 : vector<16x1xf32>
    %308 = math.rsqrt %307 : vector<16x1xf32>
    %309 = vector.broadcast %308 : vector<16x1xf32> to vector<16x128xf32>
    %310 = arith.mulf %305, %309 : vector<16x128xf32>
    %311 = vector.broadcast %290 : vector<1x128xf32> to vector<16x128xf32>
    %312 = arith.mulf %310, %311 : vector<16x128xf32>
    %313 = vector.broadcast %292 : vector<1x128xf32> to vector<16x128xf32>
    %314 = arith.addf %312, %313 : vector<16x128xf32>
    %315 = arith.truncf %314 : vector<16x128xf32> to vector<16x128xbf16>
    %c1_122 = arith.constant 1 : index
    %c0_123 = arith.constant 0 : index
    %c0_124 = arith.constant 0 : index
    %316 = vector.load %arg8[%c1_122, %c0_123, %c0_124] : memref<2x128x256xbf16, #tpu.memory_space<vmem>>, vector<1x128x256xbf16>
    %317 = vector.shape_cast %316 : vector<1x128x256xbf16> to vector<128x256xbf16>
    %cst_125 = arith.constant dense<0.000000e+00> : vector<16x256xf32>
    %318 = tpu.matmul %315, %317, %cst_125 {dimension_numbers = #tpu.dot_dimension_numbers<[1], [0], [0], [1], [0, 0, 1, 1], [], []>} : vector<16x128xbf16>, vector<128x256xbf16>, vector<16x256xf32> -> vector<16x256xf32>
    %c1_126 = arith.constant 1 : index
    %c0_127 = arith.constant 0 : index
    %c0_128 = arith.constant 0 : index
    %319 = vector.load %arg9[%c1_126, %c0_127, %c0_128] : memref<2x1x256xf32, #tpu.memory_space<vmem>>, vector<1x1x256xf32>
    %320 = vector.shape_cast %319 : vector<1x1x256xf32> to vector<1x256xf32>
    %321 = vector.broadcast %320 : vector<1x256xf32> to vector<16x256xf32>
    %322 = arith.addf %318, %321 : vector<16x256xf32>
    %cst_129 = arith.constant 0.000000e+00 : f32
    %323 = vector.broadcast %cst_129 : f32 to vector<16x256xf32>
    %324 = arith.maximumf %322, %323 : vector<16x256xf32>
    %325 = arith.truncf %324 : vector<16x256xf32> to vector<16x256xbf16>
    %c1_130 = arith.constant 1 : index
    %c0_131 = arith.constant 0 : index
    %c0_132 = arith.constant 0 : index
    %326 = vector.load %arg10[%c1_130, %c0_131, %c0_132] : memref<2x256x128xbf16, #tpu.memory_space<vmem>>, vector<1x256x128xbf16>
    %327 = vector.shape_cast %326 : vector<1x256x128xbf16> to vector<256x128xbf16>
    %cst_133 = arith.constant dense<0.000000e+00> : vector<16x128xf32>
    %328 = tpu.matmul %325, %327, %cst_133 {dimension_numbers = #tpu.dot_dimension_numbers<[1], [0], [0], [1], [0, 0, 1, 1], [], []>} : vector<16x256xbf16>, vector<256x128xbf16>, vector<16x128xf32> -> vector<16x128xf32>
    %c1_134 = arith.constant 1 : index
    %c0_135 = arith.constant 0 : index
    %c0_136 = arith.constant 0 : index
    %329 = vector.load %arg11[%c1_134, %c0_135, %c0_136] : memref<2x1x128xf32, #tpu.memory_space<vmem>>, vector<1x1x128xf32>
    %330 = vector.shape_cast %329 : vector<1x1x128xf32> to vector<1x128xf32>
    %331 = vector.broadcast %330 : vector<1x128xf32> to vector<16x128xf32>
    %332 = arith.addf %328, %331 : vector<16x128xf32>
    %333 = arith.addf %314, %332 : vector<16x128xf32>
    %c1_137 = arith.constant 1 : index
    %c0_138 = arith.constant 0 : index
    %c0_139 = arith.constant 0 : index
    %334 = vector.load %arg12[%c1_137, %c0_138, %c0_139] : memref<2x1x128xf32, #tpu.memory_space<vmem>>, vector<1x1x128xf32>
    %335 = vector.shape_cast %334 : vector<1x1x128xf32> to vector<1x128xf32>
    %c1_140 = arith.constant 1 : index
    %c0_141 = arith.constant 0 : index
    %c0_142 = arith.constant 0 : index
    %336 = vector.load %arg13[%c1_140, %c0_141, %c0_142] : memref<2x1x128xf32, #tpu.memory_space<vmem>>, vector<1x1x128xf32>
    %337 = vector.shape_cast %336 : vector<1x1x128xf32> to vector<1x128xf32>
    %cst_143 = arith.constant dense<0.000000e+00> : vector<16xf32>
    %338 = vector.multi_reduction <add>, %333, %cst_143 [1] : vector<16x128xf32> to vector<16xf32>
    %339 = vector.shape_cast %338 : vector<16xf32> to vector<16x1xf32>
    %cst_144 = arith.constant 1.280000e+02 : f32
    %340 = vector.broadcast %cst_144 : f32 to vector<16x1xf32>
    %341 = arith.divf %339, %340 : vector<16x1xf32>
    %342 = vector.broadcast %341 : vector<16x1xf32> to vector<16x128xf32>
    %343 = arith.subf %333, %342 : vector<16x128xf32>
    %344 = arith.mulf %343, %343 : vector<16x128xf32>
    %cst_145 = arith.constant dense<0.000000e+00> : vector<16xf32>
    %345 = vector.multi_reduction <add>, %344, %cst_145 [1] : vector<16x128xf32> to vector<16xf32>
    %346 = vector.shape_cast %345 : vector<16xf32> to vector<16x1xf32>
    %cst_146 = arith.constant 1.280000e+02 : f32
    %347 = vector.broadcast %cst_146 : f32 to vector<16x1xf32>
    %348 = arith.divf %346, %347 : vector<16x1xf32>
    %349 = vector.broadcast %341 : vector<16x1xf32> to vector<16x128xf32>
    %350 = arith.subf %333, %349 : vector<16x128xf32>
    %cst_147 = arith.constant 9.99999974E-6 : f32
    %351 = vector.broadcast %cst_147 : f32 to vector<16x1xf32>
    %352 = arith.addf %348, %351 : vector<16x1xf32>
    %353 = math.rsqrt %352 : vector<16x1xf32>
    %354 = vector.broadcast %353 : vector<16x1xf32> to vector<16x128xf32>
    %355 = arith.mulf %350, %354 : vector<16x128xf32>
    %356 = vector.broadcast %335 : vector<1x128xf32> to vector<16x128xf32>
    %357 = arith.mulf %355, %356 : vector<16x128xf32>
    %358 = vector.broadcast %337 : vector<1x128xf32> to vector<16x128xf32>
    %359 = arith.addf %357, %358 : vector<16x128xf32>
    %360 = vector.shape_cast %359 : vector<16x128xf32> to vector<2x8x128xf32>
    %cst_148 = arith.constant dense<0.000000e+00> : vector<2x128xf32>
    %361 = vector.multi_reduction <add>, %360, %cst_148 [1] : vector<2x8x128xf32> to vector<2x128xf32>
    %cst_149 = arith.constant 8.000000e+00 : f32
    %362 = vector.broadcast %cst_149 : f32 to vector<2x128xf32>
    %363 = arith.divf %361, %362 : vector<2x128xf32>
    %364 = arith.truncf %363 : vector<2x128xf32> to vector<2x128xbf16>
    %c0_150 = arith.constant 0 : index
    %c0_151 = arith.constant 0 : index
    %365 = vector.load %arg14[%c0_150, %c0_151] : memref<128x128xbf16, #tpu.memory_space<vmem>>, vector<128x128xbf16>
    %cst_152 = arith.constant dense<0.000000e+00> : vector<2x128xf32>
    %366 = tpu.matmul %364, %365, %cst_152 {dimension_numbers = #tpu.dot_dimension_numbers<[1], [0], [0], [1], [0, 0, 1, 1], [], []>} : vector<2x128xbf16>, vector<128x128xbf16>, vector<2x128xf32> -> vector<2x128xf32>
    %c0_153 = arith.constant 0 : index
    %c0_154 = arith.constant 0 : index
    %367 = vector.load %arg15[%c0_153, %c0_154] : memref<1x128xf32, #tpu.memory_space<vmem>>, vector<1x128xf32>
    %368 = vector.broadcast %367 : vector<1x128xf32> to vector<2x128xf32>
    %369 = arith.addf %366, %368 : vector<2x128xf32>
    %c0_155 = arith.constant 0 : index
    %c0_156 = arith.constant 0 : index
    %370 = vector.load %arg16[%c0_155, %c0_156] : memref<2x128xf32, #tpu.memory_space<vmem>>, vector<2x128xf32>
    tpu.vector_store %arg16[%c0_155, %c0_156], %369 {strides = array<i32>} : memref<2x128xf32, #tpu.memory_space<vmem>>, vector<2x128xf32>,
    return
  }
  func.func @transform_0(%arg0: i32) -> (i32, i32, i32) {
    %c0_i32 = arith.constant 0 : i32
    %c0_i32_0 = arith.constant 0 : i32
    %c0_i32_1 = arith.constant 0 : i32
    return %arg0, %c0_i32, %c0_i32_0 : i32, i32, i32
  }
  func.func @transform_1(%arg0: i32) -> (i32, i32, i32) {
    %c0_i32 = arith.constant 0 : i32
    %c0_i32_0 = arith.constant 0 : i32
    %c0_i32_1 = arith.constant 0 : i32
    %c0_i32_2 = arith.constant 0 : i32
    return %c0_i32, %c0_i32_0, %c0_i32_1 : i32, i32, i32
  }
  func.func @transform_2(%arg0: i32) -> (i32, i32, i32) {
    %c0_i32 = arith.constant 0 : i32
    %c0_i32_0 = arith.constant 0 : i32
    %c0_i32_1 = arith.constant 0 : i32
    %c0_i32_2 = arith.constant 0 : i32
    return %c0_i32, %c0_i32_0, %c0_i32_1 : i32, i32, i32
  }
  func.func @transform_3(%arg0: i32) -> (i32, i32, i32) {
    %c0_i32 = arith.constant 0 : i32
    %c0_i32_0 = arith.constant 0 : i32
    %c0_i32_1 = arith.constant 0 : i32
    %c0_i32_2 = arith.constant 0 : i32
    return %c0_i32, %c0_i32_0, %c0_i32_1 : i32, i32, i32
  }
  func.func @transform_4(%arg0: i32) -> (i32, i32, i32) {
    %c0_i32 = arith.constant 0 : i32
    %c0_i32_0 = arith.constant 0 : i32
    %c0_i32_1 = arith.constant 0 : i32
    %c0_i32_2 = arith.constant 0 : i32
    return %c0_i32, %c0_i32_0, %c0_i32_1 : i32, i32, i32
  }
  func.func @transform_5(%arg0: i32) -> (i32, i32, i32) {
    %c0_i32 = arith.constant 0 : i32
    %c0_i32_0 = arith.constant 0 : i32
    %c0_i32_1 = arith.constant 0 : i32
    %c0_i32_2 = arith.constant 0 : i32
    return %c0_i32, %c0_i32_0, %c0_i32_1 : i32, i32, i32
  }
  func.func @transform_6(%arg0: i32) -> (i32, i32, i32) {
    %c0_i32 = arith.constant 0 : i32
    %c0_i32_0 = arith.constant 0 : i32
    %c0_i32_1 = arith.constant 0 : i32
    %c0_i32_2 = arith.constant 0 : i32
    return %c0_i32, %c0_i32_0, %c0_i32_1 : i32, i32, i32
  }
  func.func @transform_7(%arg0: i32) -> (i32, i32, i32) {
    %c0_i32 = arith.constant 0 : i32
    %c0_i32_0 = arith.constant 0 : i32
    %c0_i32_1 = arith.constant 0 : i32
    %c0_i32_2 = arith.constant 0 : i32
    return %c0_i32, %c0_i32_0, %c0_i32_1 : i32, i32, i32
  }
  func.func @transform_8(%arg0: i32) -> (i32, i32, i32) {
    %c0_i32 = arith.constant 0 : i32
    %c0_i32_0 = arith.constant 0 : i32
    %c0_i32_1 = arith.constant 0 : i32
    %c0_i32_2 = arith.constant 0 : i32
    return %c0_i32, %c0_i32_0, %c0_i32_1 : i32, i32, i32
  }
  func.func @transform_9(%arg0: i32) -> (i32, i32, i32) {
    %c0_i32 = arith.constant 0 : i32
    %c0_i32_0 = arith.constant 0 : i32
    %c0_i32_1 = arith.constant 0 : i32
    %c0_i32_2 = arith.constant 0 : i32
    return %c0_i32, %c0_i32_0, %c0_i32_1 : i32, i32, i32
  }
  func.func @transform_10(%arg0: i32) -> (i32, i32, i32) {
    %c0_i32 = arith.constant 0 : i32
    %c0_i32_0 = arith.constant 0 : i32
    %c0_i32_1 = arith.constant 0 : i32
    %c0_i32_2 = arith.constant 0 : i32
    return %c0_i32, %c0_i32_0, %c0_i32_1 : i32, i32, i32
  }
  func.func @transform_11(%arg0: i32) -> (i32, i32, i32) {
    %c0_i32 = arith.constant 0 : i32
    %c0_i32_0 = arith.constant 0 : i32
    %c0_i32_1 = arith.constant 0 : i32
    %c0_i32_2 = arith.constant 0 : i32
    return %c0_i32, %c0_i32_0, %c0_i32_1 : i32, i32, i32
  }
  func.func @transform_12(%arg0: i32) -> (i32, i32, i32) {
    %c0_i32 = arith.constant 0 : i32
    %c0_i32_0 = arith.constant 0 : i32
    %c0_i32_1 = arith.constant 0 : i32
    %c0_i32_2 = arith.constant 0 : i32
    return %c0_i32, %c0_i32_0, %c0_i32_1 : i32, i32, i32
  }
  func.func @transform_13(%arg0: i32) -> (i32, i32) {
    %c0_i32 = arith.constant 0 : i32
    %c0_i32_0 = arith.constant 0 : i32
    %c0_i32_1 = arith.constant 0 : i32
    return %c0_i32, %c0_i32_0 : i32, i32
  }
  func.func @transform_14(%arg0: i32) -> (i32, i32) {
    %c0_i32 = arith.constant 0 : i32
    %c0_i32_0 = arith.constant 0 : i32
    %c0_i32_1 = arith.constant 0 : i32
    return %c0_i32, %c0_i32_0 : i32, i32
  }
  func.func @transform_15(%arg0: i32) -> (i32, i32) {
    %c0_i32 = arith.constant 0 : i32
    %c0_i32_0 = arith.constant 0 : i32
    return %arg0, %c0_i32 : i32, i32
  }
}

</mosaic_0001>

<bundles_post_ra>
// kernel: transformer_classifier_forward.1
= control target key start
LH: loop header
LB: loop body
LE: loop exit
PB: predicated region body
PF: predicated region fallthrough
CT: control target
= control target key end

     0   :  { %20 = vsyncpa [#allocation3], 0  ;;  %s4221_s0 = inlined_call_operand.vmem [shape: f32[2,8,128], index: 0, kind: input, shape index: {}]   ;;  %s4222_s1 = inlined_call_operand.hbm [shape: bf16[2,128,384], index: 1, kind: input, shape index: {}]   ;;  %s4223_s2 = inlined_call_operand.vmem [shape: f32[2,1,384], index: 2, kind: input, shape index: {}]   ;;  %s4224_s3 = inlined_call_operand.vmem [shape: bf16[2,128,128], index: 3, kind: input, shape index: {}]   ;;  %s4225_s4 = inlined_call_operand.vmem [shape: f32[2,1,128], index: 4, kind: input, shape index: {}]   ;;  %s4226_s5 = inlined_call_operand.vmem [shape: f32[2,1,128], index: 5, kind: input, shape index: {}]   ;;  %s4227_s6 = inlined_call_operand.vmem [shape: f32[2,1,128], index: 6, kind: input, shape index: {}]   ;;  %s4228_s7 = inlined_call_operand.hbm [shape: bf16[2,128,256], index: 7, kind: input, shape index: {}]   ;;  %s4229_s8 = inlined_call_operand.vmem [shape: f32[2,1,256], index: 8, kind: input, shape index: {}]   ;;  %s4230_s9 = inlined_call_operand.hbm [shape: bf16[2,256,128], index: 9, kind: input, shape index: {}]   ;;  %s4231_s10 = inlined_call_operand.vmem [shape: f32[2,1,128], index: 10, kind: input, shape index: {}]   ;;  %s4232_s11 = inlined_call_operand.vmem [shape: f32[2,1,128], index: 11, kind: input, shape index: {}]   ;;  %s4233_s12 = inlined_call_operand.vmem [shape: f32[2,1,128], index: 12, kind: input, shape index: {}]   ;;  %s4234_s13 = inlined_call_operand.vmem [shape: bf16[128,128], index: 13, kind: input, shape index: {}]   ;;  %s4235_s14 = inlined_call_operand.vmem [shape: f32[1,128], index: 14, kind: input, shape index: {}]   ;;  %s4236_s15 = inlined_call_operand.hbm [shape: f32[2,128], index: 15, kind: output, shape index: {}]  }
   0x1   :  { %21 = vsyncpa [#allocation6], 0  ;;  %s52_s20 = sshll.u32 %s4228_s7, 4  ;;  %s53_s20 = int_to_ptr.hbm [resolvable:$true] %s52_s20 }
   0x2   :  { %22 = vsyncpa [#allocation4], 0  ;;  %s3675_s21 = smov [#allocation5]   ;;  %s29_s25 = sshll.u32 %s4222_s1, 4  ;;  %s30_s25 = int_to_ptr.hbm [resolvable:$true] %s29_s25 }
   0x3   :  { %s54_s22 = sshll.u32 %s3675_s21, 4  ;;  %s3676_s26 = smov 128   ;;  %s55_s22 = int_to_ptr.vmem [resolvable:$true] %s54_s22 }
   0x4   :  { %s3677_s27 = smov 8   ;;  %s3678_s28 = smov [#allocation2]  }
   0x5   :  { %60 = dma.hbm_to_vmem [thread:$0]  %s53_s20, 4096, %s55_s22, [#allocation6], %s3676_s26, %s3676_s26, %s3677_s27  }
   0x6   :  { %s31_s29 = sshll.u32 %s3678_s28, 4  ;;  %s3679_s30 = smov 192   ;;  %s32_s29 = int_to_ptr.vmem [resolvable:$true] %s31_s29 }
   0x7   :  { %s3680_s16 = smov 12   ;;  %s67_s18 = sshll.u32 %s4230_s9, 4  ;;  %s68_s18 = int_to_ptr.hbm [resolvable:$true] %s67_s18 }
   0x8   :  { %37 = dma.hbm_to_vmem [thread:$0]  %s30_s25, 6144, %s32_s29, [#allocation3], %s3679_s30, %s3679_s30, %s3680_s16  }
   0x9   :  { %s3681_s19 = smov [#allocation7]   ;;  %s3682_s23 = smov 64  }
   0xa   :  { %s69_s21 = sshll.u32 %s3681_s19, 4  ;;  %s3683_s1 = smov 4   ;;  %s70_s21 = int_to_ptr.vmem [resolvable:$true] %s69_s21 }
   0xb   :  { %75 = dma.hbm_to_vmem [thread:$0]  %s68_s18, 4096, %s70_s21, [#allocation6], %s3682_s23, %s3682_s23, %s3683_s1  }
   0xc   :  { %3669 = dma.done.wait [#allocation3], 6144  }
   0xd   :  { %3670 = vsyncadd [#allocation3], 4294961152 }
   0xe   :  { %3671 = dma.done.wait [#allocation6], 8192  }
   0xf   :  { %3672 = vsyncadd [#allocation6], 4294959104  ;;  %v2804_v0 = vld [vmem:[#allocation2 + $0xa8] sm:$0xf]  ;;  %v3348_v1 = vld [vmem:[#allocation2 + $0xb0] sm:$0xf0] }
  0x10   :  { %v3347_v2 = vld [vmem:[#allocation2 + $0xac] sm:$0xf]  ;;  %v2805_v3 = vor.u32 %v3348_v1, %v2804_v0  ;;  %v2806_v4 = vld [vmem:[#allocation2 + $0xb4] sm:$0xf0]  ;;  %v2792_v5 = vld [vmem:[#allocation2 + $0x90] sm:$0xf] }
  0x11   :  { %v3345_v6 = vld [vmem:[#allocation2 + $0x98] sm:$0xf0]  ;;  %v2809_v7 = vor.u32 %v3347_v2, %v2806_v4  ;;  %v3344_v8 = vld [vmem:[#allocation2 + $0x94] sm:$0xf]  ;;  %v2794_v9 = vld [vmem:[#allocation2 + $0x9c] sm:$0xf0] }
  0x12   :  { %270 = vmatpush.bf16.msra.mxu0 %v2805_v3  ;;  %v2793_v10 = vor.u32 %v3345_v6, %v2792_v5  ;;  %v2797_v11 = vor.u32 %v3344_v8, %v2794_v9  ;;  %v2780_v12 = vld [vmem:[#allocation2 + $0x78] sm:$0xf]  ;;  %v3342_v13 = vld [vmem:[#allocation2 + $0x80] sm:$0xf0]  ;;  %v3341_v14 = vld [vmem:[#allocation2 + $0x7c] sm:$0xf] }
  0x13   :  { %284 = vmatpush.bf16.msra.mxu1 %v2809_v7  ;;  %v2782_v15 = vld [vmem:[#allocation2 + $0x84] sm:$0xf0]  ;;  %v2781_v16 = vor.u32 %v3342_v13, %v2780_v12  ;;  %v2768_v18 = vld [vmem:[#allocation2 + $0x60] sm:$0xf]  ;;  %v3339_v19 = vld [vmem:[#allocation2 + $0x68] sm:$0xf0] }
  0x14   :  { %v2785_v17 = vor.u32 %v3341_v14, %v2782_v15  ;;  %v3338_v20 = vld [vmem:[#allocation2 + $0x64] sm:$0xf]  ;;  %v2770_v21 = vld [vmem:[#allocation2 + $0x6c] sm:$0xf0]  ;;  %v2769_v22 = vor.u32 %v3339_v19, %v2768_v18  ;;  %v2756_v23 = vld [vmem:[#allocation2 + $0x48] sm:$0xf] }
  0x15   :  { %v2812_v24 = vld [vmem:[#allocation2 + $0xb0] sm:$0xf]  ;;  %v3349_v25 = vld [vmem:[#allocation2 + $0xb8] sm:$0xf0]  ;;  %v2773_v26 = vor.u32 %v3338_v20, %v2770_v21  ;;  %v3336_v27 = vld [vmem:[#allocation2 + $0x50] sm:$0xf0] }
  0x16   :  { %271 = vmatpush.bf16.msra.mxu0 %v2793_v10  ;;  %v2813_v28 = vor.u32 %v3349_v25, %v2812_v24  ;;  %v2800_v29 = vld [vmem:[#allocation2 + $0x98] sm:$0xf]  ;;  %v3346_v30 = vld [vmem:[#allocation2 + $0xa0] sm:$0xf0]  ;;  %v3335_v31 = vld [vmem:[#allocation2 + $0x4c] sm:$0xf]  ;;  %v2757_v34 = vor.u32 %v3336_v27, %v2756_v23 }
  0x17   :  { %285 = vmatpush.bf16.msra.mxu1 %v2797_v11  ;;  %v2758_v32 = vld [vmem:[#allocation2 + $0x54] sm:$0xf0]  ;;  %v2801_v33 = vor.u32 %v3346_v30, %v2800_v29  ;;  %v2744_v35 = vld [vmem:[#allocation2 + $0x30] sm:$0xf]  ;;  %v2788_v36 = vld [vmem:[#allocation2 + $0x80] sm:$0xf] }
  0x18   :  { %298 = vmatpush.bf16.msra.mxu2 %v2813_v28  ;;  %v3343_v37 = vld [vmem:[#allocation2 + $0x88] sm:$0xf0]  ;;  %v2761_v38 = vor.u32 %v3335_v31, %v2758_v32  ;;  %v3333_v39 = vld [vmem:[#allocation2 + $0x38] sm:$0xf0]  ;;  %v3332_v40 = vld [vmem:[#allocation2 + $0x34] sm:$0xf] }
  0x19   :  { %v2746_v41 = vld [vmem:[#allocation2 + $0x3c] sm:$0xf0]  ;;  %v2776_v42 = vld [vmem:[#allocation2 + $0x68] sm:$0xf]  ;;  %v3340_v43 = vld [vmem:[#allocation2 + $0x70] sm:$0xf0]  ;;  %v2789_v46 = vor.u32 %v3343_v37, %v2788_v36  ;;  %v2745_v47 = vor.u32 %v3333_v39, %v2744_v35 }
  0x1a   :  { %272 = vmatpush.bf16.msra.mxu0 %v2781_v16  ;;  %v2732_v44 = vld [vmem:[#allocation2 + $0x18] sm:$0xf]  ;;  %v3330_v45 = vld [vmem:[#allocation2 + $0x20] sm:$0xf0]  ;;  %v3329_v48 = vld [vmem:[#allocation2 + $0x1c] sm:$0xf]  ;;  %v2749_v49 = vor.u32 %v3332_v40, %v2746_v41  ;;  %v2777_v51 = vor.u32 %v3340_v43, %v2776_v42 }
  0x1b   :  { %286 = vmatpush.bf16.msra.mxu1 %v2785_v17  ;;  %v2734_v50 = vld [vmem:[#allocation2 + $0x24] sm:$0xf0]  ;;  %v2733_v52 = vor.u32 %v3330_v45, %v2732_v44  ;;  %v2764_v53 = vld [vmem:[#allocation2 + $0x50] sm:$0xf]  ;;  %v3337_v54 = vld [vmem:[#allocation2 + $0x58] sm:$0xf0] }
  0x1c   :  { %299 = vmatpush.bf16.msra.mxu2 %v2801_v33  ;;  %v2737_v55 = vor.u32 %v3329_v48, %v2734_v50  ;;  %v2720_v56 = vld [vmem:[#allocation2] sm:$0xf]  ;;  %v3327_v57 = vld [vmem:[#allocation2 + $0x8] sm:$0xf0]  ;;  %v3326_v58 = vld [vmem:[#allocation2 + $0x4] sm:$0xf]  ;;  %v2765_v61 = vor.u32 %v3337_v54, %v2764_v53 }
  0x1d   :  { %v2722_v59 = vld [vmem:[#allocation2 + $0xc] sm:$0xf0]  ;;  %v3783_v60 = vld [vmem:[%s4221_s0] sm:$0xff]  ;;  %v2721_v62 = vor.u32 %v3327_v57, %v2720_v56  ;;  %v3788_v63 = vld [vmem:[%s4221_s0 + $0x8] sm:$0xff]  ;;  %vm340_vm0 = vcmask 261120   ;;  %s3684_s26 = smov 96  }
  0x1e   :  { %273 = vmatpush.bf16.msra.mxu0 %v2769_v22  ;;  %v2752_v0 = vld [vmem:[#allocation2 + $0x38] sm:$0xf]  ;;  %v3334_v1 = vld [vmem:[#allocation2 + $0x40] sm:$0xf0]  ;;  %v2725_v2 = vor.u32 %v3326_v58, %v2722_v59  ;;  %v101_v3 = vpack.c.bf16 %v3788_v63, %v3783_v60  ;;  %v2740_v5 = vld [vmem:[#allocation2 + $0x20] sm:$0xf] }
  0x1f   :  { %287 = vmatpush.bf16.msra.mxu1 %v2773_v26  ;;  %v2753_v4 = vor.u32 %v3334_v1, %v2752_v0  ;;  %v3331_v6 = vld [vmem:[#allocation2 + $0x28] sm:$0xf0]  ;;  %v2728_v8 = vld [vmem:[#allocation2 + $0x8] sm:$0xf]  ;;  %v3328_v9 = vld [vmem:[#allocation2 + $0x10] sm:$0xf0] }
  0x20   :  { %300 = vmatpush.bf16.msra.mxu2 %v2789_v46  ;;  %v2741_v7 = vor.u32 %v3331_v6, %v2740_v5  ;;  %v2729_v10 = vor.u32 %v3328_v9, %v2728_v8  ;;  %v3795_v11 = vld [vmem:[%s4223_s2] sm:$0x7]  ;;  %vm411_vm1 = vcmask 1043456   ;;  %vm383_vm2 = vcmask 64512   ;;  %s3685_s16 = smov 32  }
  0x21   :  { %v136_v12 = vperm.slane %v3795_v11, 0  ;;  %v137_v13 = vperm.slane %v3795_v11, 1  ;;  %v138_v32 = vperm.slane %v3795_v11, 2 }
  0x22   :  { %274 = vmatpush.bf16.msra.mxu0 %v2757_v34 }
  0x23   :  { %288 = vmatpush.bf16.msra.mxu1 %v2761_v38 }
  0x24   :  { %301 = vmatpush.bf16.msra.mxu2 %v2777_v51 }
  0x26   :  { %275 = vmatpush.bf16.msra.mxu0 %v2745_v47 }
  0x27   :  { %289 = vmatpush.bf16.msra.mxu1 %v2749_v49 }
  0x28   :  { %302 = vmatpush.bf16.msra.mxu2 %v2765_v61 }
  0x2a   :  { %276 = vmatpush.bf16.msra.mxu0 %v2733_v52 }
  0x2b   :  { %290 = vmatpush.bf16.msra.mxu1 %v2737_v55 }
  0x2c   :  { %303 = vmatpush.bf16.msra.mxu2 %v2753_v4 }
  0x2e   :  { %277 = vmatpush.bf16.msra.mxu0 %v2721_v62 }
  0x2f   :  { %291 = vmatpush.bf16.msra.mxu1 %v2725_v2 }
  0x30   :  { %304 = vmatpush.bf16.msra.mxu2 %v2741_v7 }
  0x31   :  { %278 = vmatmul.bf16.vlgmr.msra.gmra.mxu0 %v101_v3 }
  0x32   :  { %292 = vmatmul.bf16.vlgmr.msra.gmra.mxu1 %v101_v3 }
  0x34   :  { %305 = vmatpush.bf16.msra.mxu2 %v2729_v10 }
  0x37   :  { %306 = vmatmul.bf16.vlgmr.msra.gmra.mxu2 %v101_v3 }
  0xae   :  { %v279_v14 = vpop.f32.mrf.mxu0 }
  0xaf   :  { %v280_v15 = vadd.f32 %v279_v14, %v136_v12  ;;  %v293_v16 = vpop.f32.mrf.mxu1 }
  0xb0   :  { %v294_v17 = vadd.f32 %v293_v16, %v137_v13 }
  0xb2   :  { %v3799_v18 = vpack.c.bf16 %v294_v17, %v280_v15 }
  0xb4   :  { %479 = vrot.lane.b32.xlu0 %v3799_v18, %s3684_s26  ;;  %v339_v19 = vrot.slane %v3799_v18, 4  ;;  %v482_v22 = vunpack.c.l.b16 %v3799_v18 }
  0xb6   :  { %v281_v20 = vpop.f32.mrf.mxu0  ;;  %v345_v21 = vsel %vm340_vm0, %v339_v19, 0  ;;  %v3808_v27 = vpack.c.b16 %v482_v22, %v482_v22 }
  0xb7   :  { %v282_v23 = vadd.f32 %v281_v20, %v136_v12  ;;  %v295_v24 = vpop.f32.mrf.mxu1  ;;  %354 = vmatpush.bf16.xpose.msrb.mxu0 %v345_v21 }
  0xb8   :  { %v296_v25 = vadd.f32 %v295_v24, %v137_v13 }
  0xba   :  { %v3806_v26 = vpack.c.bf16 %v296_v25, %v282_v23  ;;  %v307_v33 = vpop.f32.mrf.mxu2 }
  0xbb   :  { %v308_v34 = vadd.f32 %v307_v33, %v138_v32 }
  0xbc   :  { %505 = vrot.lane.b32.xlu2 %v3806_v26, %s3684_s26  ;;  %484 = vrot.lane.b32.xlu0 %v3808_v27, %s3684_s26  ;;  %v361_v28 = vrot.slane %v3806_v26, 4  ;;  %v508_v30 = vunpack.c.l.b16 %v3806_v26 }
  0xbd   :  { %v313_v35 = vpack.c.bf16 %v308_v34, %v308_v34 }
  0xbe   :  { %2814 = vmatmul.msk.bf16.vlgmr.msrb.gmra.mxu0 %vm340_vm0, %v3799_v18  ;;  %v366_v29 = vsel %vm340_vm0, %v361_v28, 0  ;;  %v3819_v31 = vpack.c.b16 %v508_v30, %v508_v30 }
  0xbf   :  { %375 = vmatpush.bf16.xpose.msra.mxu3 %v366_v29  ;;  %v413_v36 = vsel %vm411_vm1, %v313_v35, 0  ;;  %v558_v0 = vunpack.c.l.b16 %v313_v35 }
  0xc1   :  { %v3836_v1 = vpack.c.b16 %v558_v0, %v558_v0 }
  0xc2   :  { %v309_v52 = vpop.f32.mrf.mxu2 }
  0xc3   :  { %v310_v2 = vadd.f32 %v309_v52, %v138_v32 }
  0xc4   :  { %510 = vrot.lane.b32.xlu2 %v3819_v31, %s3684_s26 }
  0xc5   :  { %v3842_v3 = vpack.c.bf16 %v310_v2, %v310_v2 }
  0xc6   :  { %2815 = vmatmul.msk.bf16.vlgmr.msra.gmra.mxu3 %vm340_vm0, %v3806_v26 }
  0xc7   :  { %422 = vmatpush.bf16.msrb.mxu3 %v413_v36  ;;  %v432_v4 = vsel %vm411_vm1, %v3842_v3, 0  ;;  %v582_v52 = vunpack.c.l.b16 %v3842_v3 }
  0xc8   :  { %441 = vmatpush.bf16.msra.mxu0 %v432_v4 }
  0xcc   :  { %640 = vrot.lane.b32.xlu2 %v3808_v27, %s3682_s23 }
 0x116   :  { %v506_v37 = vpop.permute.xlu2 %505 }
 0x117   :  { %v507_v38 = vrot.slane %v506_v37, 4 }
 0x119   :  { %v516_v39 = vsel %vm340_vm0, %v507_v38, 0 }
 0x11a   :  { %525 = vmatpush.bf16.xpose.msra.mxu3 %v516_v39 }
 0x11e   :  { %v511_v10 = vpop.permute.xlu2 %510 }
 0x126   :  { %v480_v40 = vpop.permute.xlu0 %479  ;;  %v641_v11 = vpop.permute.xlu2 %640 }
 0x127   :  { %v481_v41 = vrot.slane %v480_v40, 4 }
 0x129   :  { %v490_v42 = vsel %vm340_vm0, %v481_v41, 0 }
 0x12a   :  { %499 = vmatpush.bf16.xpose.msrb.mxu2 %v490_v42 }
 0x12e   :  { %v485_v43 = vpop.permute.xlu0 %484 }
 0x131   :  { %2827 = vmatmul.msk.bf16.vlgmr.msrb.gmra.mxu2 %vm340_vm0, %v485_v43 }
 0x13b   :  { %v356_v44 = vpop.f32.mrf.mxu0 }
 0x13c   :  { %v381_v45 = vmul.f32 0.17677669, %v356_v44 }
 0x13e   :  { %v384_v46 = vsel %vm383_vm2, %v381_v45, -inf }
 0x13f   :  { %385 = vmax.xlane.f32.xlu1 %v384_v46 }
 0x143   :  { %v358_v47 = vpop.f32.mrf.mxu0 }
 0x149   :  { %v377_v48 = vpop.f32.mrf.mxu3 }
 0x14a   :  { %v382_v49 = vmul.f32 0.17677669, %v377_v48  ;;  %v3351_v48 = vld [vmem:[%s4224_s3 + $0x8] sm:$0xff] }
 0x14b   :  { %469 = vmatpush.bf16.msrb.mxu1 %v3351_v48 }
 0x14c   :  { %v387_v50 = vsel %vm383_vm2, %v382_v49, -inf }
 0x14d   :  { %388 = vmax.xlane.f32.xlu0 %v387_v50 }
 0x151   :  { %v379_v51 = vpop.f32.mrf.mxu3 }
 0x1b2   :  { %v386_v53 = vpop.xlane.xlu1 %385 }
 0x1b3   :  { %v390_v54 = vsub.f32 %v381_v45, %v386_v53 }
 0x1b4   :  { %v501_v55 = vpop.f32.mrf.mxu2 }
 0x1b5   :  { %v392_v56 = vmul.f32 1.442695, %v390_v54  ;;  %v531_v57 = vmul.f32 0.17677669, %v501_v55  ;;  %v3870_v54 = vpack.c.b16 %v582_v52, %v582_v52 }
 0x1b7   :  { %3489 = vpow2.f32 %v392_v56  ;;  %v533_v58 = vsel %vm383_vm2, %v531_v57, -inf }
 0x1b8   :  { %534 = vmax.xlane.f32.xlu2 %v533_v58 }
 0x1bc   :  { %v503_v59 = vpop.f32.mrf.mxu2 }
 0x1bd   :  { %v3490_v61 = vpop.eup %3489 }
 0x1be   :  { %v396_v62 = vsel %vm383_vm2, %v3490_v61, 0.0 }
 0x1bf   :  { %397 = vadd.xlane.f32.xlu1 %v396_v62 }
 0x1c0   :  { %v389_v5 = vpop.xlane.xlu0 %388 }
 0x1c1   :  { %v391_v6 = vsub.f32 %v382_v49, %v389_v5  ;;  %v3350_v49 = vld [vmem:[%s4224_s3] sm:$0xff] }
 0x1c2   :  { %470 = vmatpush.bf16.msrb.mxu1 %v3350_v49 }
 0x1c3   :  { %v394_v7 = vmul.f32 1.442695, %v391_v6 }
 0x1c5   :  { %3491 = vpow2.f32 %v394_v7 }
 0x1cb   :  { %v3492_v8 = vpop.eup %3491 }
 0x1cc   :  { %v399_v9 = vsel %vm383_vm2, %v3492_v8, 0.0 }
 0x1d0   :  { %560 = vrot.lane.b32.xlu2 %v3836_v1, %s3684_s26 }
 0x1d8   :  { %637 = vrot.lane.b32.xlu1 %v3799_v18, %s3682_s23 }
 0x202   :  { %400 = vadd.xlane.f32.xlu1 %v399_v9 }
 0x21b   :  { %664 = vrot.lane.b32.xlu1 %v3819_v31, %s3682_s23 }
 0x22b   :  { %v535_v12 = vpop.xlane.xlu2 %534 }
 0x22c   :  { %v539_v13 = vsub.f32 %v531_v57, %v535_v12 }
 0x22e   :  { %v541_v14 = vmul.f32 1.442695, %v539_v13 }
 0x230   :  { %3493 = vpow2.f32 %v541_v14 }
 0x232   :  { %v398_v15 = vpop.xlane.xlu1 %397 }
 0x233   :  { %3495 = vrcp.f32 %v398_v15  ;;  %v561_v22 = vpop.permute.xlu2 %560 }
 0x234   :  { %v566_v23 = vsel %vm411_vm1, %v561_v22, 0 }
 0x235   :  { %575 = vmatpush.bf16.msrb.mxu0 %v566_v23 }
 0x236   :  { %v3494_v16 = vpop.eup %3493 }
 0x237   :  { %v545_v17 = vsel %vm383_vm2, %v3494_v16, 0.0 }
 0x238   :  { %546 = vadd.xlane.f32.xlu0 %v545_v17 }
 0x239   :  { %v3496_v19 = vpop.eup %3495 }
 0x23a   :  { %v404_v20 = vmul.f32 %v3496_v19, %v3490_v61 }
 0x23c   :  { %v406_v21 = vpack.c.bf16 %v404_v20, %v404_v20 }
 0x23e   :  { %2816 = vmatmul.msk.bf16.vlgmr.msrb.gmra.mxu3 %vm383_vm2, %v406_v21 }
 0x24a   :  { %v638_v24 = vpop.permute.xlu1 %637 }
 0x24b   :  { %v639_v25 = vrot.slane %v638_v24, 4  ;;  %v3353_v24 = vld [vmem:[%s4224_s3 + $0x18] sm:$0xff] }
 0x24c   :  { %661 = vrot.lane.b32.xlu0 %v3806_v26, %s3682_s23  ;;  %627 = vmatpush.bf16.msra.mxu2 %v3353_v24 }
 0x24d   :  { %v646_v28 = vsel %vm340_vm0, %v639_v25, 0 }
 0x24e   :  { %2828 = vmatmul.msk.bf16.vlgmr.msra.gmra.mxu3 %vm340_vm0, %v511_v10 }
 0x24f   :  { %655 = vmatpush.bf16.xpose.msrb.mxu3 %v646_v28 }
 0x25e   :  { %2840 = vmatmul.msk.bf16.vlgmr.msrb.gmra.mxu3 %vm340_vm0, %v641_v11 }
 0x275   :  { %v401_v29 = vpop.xlane.xlu1 %400 }
 0x276   :  { %3497 = vrcp.f32 %v401_v29 }
 0x27c   :  { %v3498_v30 = vpop.eup %3497 }
 0x27d   :  { %v405_v32 = vmul.f32 %v3498_v30, %v3492_v8 }
 0x27f   :  { %v407_v33 = vpack.c.bf16 %v405_v32, %v405_v32 }
 0x281   :  { %2817 = vmatmul.msk.bf16.vlgmr.msra.gmra.mxu0 %vm383_vm2, %v407_v33 }
 0x28d   :  { %v665_v42 = vpop.permute.xlu1 %664 }
 0x2ab   :  { %v547_v34 = vpop.xlane.xlu0 %546 }
 0x2ac   :  { %3499 = vrcp.f32 %v547_v34 }
 0x2b2   :  { %v3500_v35 = vpop.eup %3499 }
 0x2b3   :  { %v553_v36 = vmul.f32 %v3500_v35, %v3494_v16 }
 0x2b5   :  { %v555_v37 = vpack.c.bf16 %v553_v36, %v553_v36 }
 0x2b7   :  { %2829 = vmatmul.msk.bf16.vlgmr.msrb.gmra.mxu0 %vm383_vm2, %v555_v37 }
 0x2be   :  { %v662_v38 = vpop.permute.xlu0 %661 }
 0x2bf   :  { %v663_v39 = vrot.slane %v662_v38, 4 }
 0x2c1   :  { %v670_v40 = vsel %vm340_vm0, %v663_v39, 0  ;;  %v424_v41 = vpop.f32.mrf.mxu3 }
 0x2c2   :  { %679 = vmatpush.bf16.xpose.msra.mxu0 %v670_v40 }
 0x2c9   :  { %v426_v43 = vpop.f32.mrf.mxu3  ;;  %2841 = vmatmul.msk.bf16.vlgmr.msra.gmra.mxu0 %vm340_vm0, %v665_v42 }
 0x2d1   :  { %v527_v44 = vpop.f32.mrf.mxu3 }
 0x2d2   :  { %v532_v45 = vmul.f32 0.17677669, %v527_v44 }
 0x2d4   :  { %v536_v46 = vsel %vm383_vm2, %v532_v45, -inf }
 0x2d5   :  { %537 = vmax.xlane.f32.xlu0 %v536_v46 }
 0x2d9   :  { %v529_v47 = vpop.f32.mrf.mxu3 }
 0x2e1   :  { %v657_v50 = vpop.f32.mrf.mxu3 }
 0x2e2   :  { %v685_v51 = vmul.f32 0.17677669, %v657_v50 }
 0x2e4   :  { %v687_v53 = vsel %vm383_vm2, %v685_v51, -inf }
 0x2e5   :  { %688 = vmax.xlane.f32.xlu2 %v687_v53 }
 0x2e9   :  { %584 = vrot.lane.b32.xlu0 %v3870_v54, %s3684_s26  ;;  %v659_v55 = vpop.f32.mrf.mxu3 }
 0x2f1   :  { %785 = vrot.lane.b32.xlu0 %v3799_v18, %s3685_s16 }
 0x2f9   :  { %788 = vrot.lane.b32.xlu0 %v3808_v27, %s3685_s16 }
 0x2fd   :  { %711 = vrot.lane.b32.xlu2 %v3836_v1, %s3682_s23 }
 0x2fe   :  { %v443_v56 = vpop.f32.mrf.mxu0 }
 0x2ff   :  { %v447_v57 = vpack.c.bf16 %v443_v56, %v424_v41 }
 0x301   :  { %2826 = vmatmul.msk.bf16.vlgmr.msrb.gmra.mxu1 %vm340_vm0, %v447_v57 }
 0x306   :  { %v445_v58 = vpop.f32.mrf.mxu0 }
 0x334   :  { %v3881_v59 = vpop.f32.mrf.mxu0 }
 0x33c   :  { %v579_v61 = vpop.f32.mrf.mxu0 }
 0x346   :  { %v681_v62 = vpop.f32.mrf.mxu0 }
 0x347   :  { %v686_v0 = vmul.f32 0.17677669, %v681_v62 }
 0x348   :  { %v538_v2 = vpop.xlane.xlu0 %537 }
 0x349   :  { %v540_v3 = vsub.f32 %v532_v45, %v538_v2  ;;  %v690_v18 = vsel %vm383_vm2, %v686_v0, -inf }
 0x34a   :  { %691 = vmax.xlane.f32.xlu0 %v690_v18 }
 0x34b   :  { %v543_v4 = vmul.f32 1.442695, %v540_v3 }
 0x34d   :  { %3501 = vpow2.f32 %v543_v4 }
 0x34e   :  { %v683_v27 = vpop.f32.mrf.mxu0 }
 0x353   :  { %v3502_v5 = vpop.eup %3501 }
 0x354   :  { %v548_v6 = vsel %vm383_vm2, %v3502_v5, 0.0 }
 0x355   :  { %549 = vadd.xlane.f32.xlu1 %v548_v6  ;;  %v3354_v6 = vld [vmem:[%s4224_s3 + $0x20] sm:$0xff] }
 0x358   :  { %v689_v7 = vpop.xlane.xlu2 %688 }
 0x359   :  { %v693_v8 = vsub.f32 %v685_v51, %v689_v7  ;;  %v3476_v7 = vld [vmem:[%s4225_s4] ss:$0 sm:$0xff] }
 0x35b   :  { %v695_v9 = vmul.f32 1.442695, %v693_v8  ;;  %v585_v10 = vpop.permute.xlu0 %584  ;;  %v336_v8 = vadd.f32 %v3476_v7, %v3783_v60 }
 0x35c   :  { %v590_v11 = vsel %vm411_vm1, %v585_v10, 0 }
 0x35d   :  { %3503 = vpow2.f32 %v695_v9  ;;  %599 = vmatpush.bf16.msra.mxu1 %v590_v11 }
 0x360   :  { %v712_v12 = vpop.permute.xlu2 %711 }
 0x361   :  { %v717_v13 = vsel %vm411_vm1, %v712_v12, 0 }
 0x362   :  { %726 = vmatpush.bf16.msrb.mxu1 %v717_v13 }
 0x363   :  { %v3504_v14 = vpop.eup %3503  ;;  %v786_v15 = vpop.permute.xlu0 %785 }
 0x364   :  { %v787_v16 = vrot.slane %v786_v15, 4  ;;  %v699_v17 = vsel %vm383_vm2, %v3504_v14, 0.0 }
 0x365   :  { %700 = vadd.xlane.f32.xlu2 %v699_v17 }
 0x366   :  { %v794_v19 = vsel %vm340_vm0, %v787_v16, 0 }
 0x367   :  { %803 = vmatpush.bf16.xpose.msrb.mxu0 %v794_v19 }
 0x36b   :  { %v789_v20 = vpop.permute.xlu0 %788 }
 0x36e   :  { %809 = vrot.lane.b32.xlu1 %v3806_v26, %s3685_s16  ;;  %2853 = vmatmul.msk.bf16.vlgmr.msrb.gmra.mxu0 %vm340_vm0, %v789_v20  ;;  %v3352_v26 = vld [vmem:[%s4224_s3 + $0x10] sm:$0xff] }
 0x36f   :  { %628 = vmatpush.bf16.msra.mxu2 %v3352_v26 }
 0x376   :  { %732 = vrot.lane.b32.xlu1 %v3870_v54, %s3682_s23 }
 0x37d   :  { %812 = vrot.lane.b32.xlu2 %v3819_v31, %s3685_s16 }
 0x37e   :  { %v472_v47 = vpop.f32.mrf.mxu1 }
 0x37f   :  { %v477_v9 = vadd.f32 %v472_v47, %v336_v8  ;;  %v2916_v8 = vld [vmem:[#allocation5 + $0x60] sm:$0xf] }
 0x386   :  { %v3909_v48 = vpop.f32.mrf.mxu1 }
 0x3bd   :  { %v692_v21 = vpop.xlane.xlu0 %691 }
 0x3be   :  { %v694_v22 = vsub.f32 %v686_v0, %v692_v21 }
 0x3c0   :  { %v697_v23 = vmul.f32 1.442695, %v694_v22 }
 0x3c2   :  { %3505 = vpow2.f32 %v697_v23 }
 0x3c8   :  { %v3506_v25 = vpop.eup %3505  ;;  %v550_v28 = vpop.xlane.xlu1 %549 }
 0x3c9   :  { %3507 = vrcp.f32 %v550_v28  ;;  %v702_v29 = vsel %vm383_vm2, %v3506_v25, 0.0  ;;  %v3357_v28 = vld [vmem:[%s4224_s3 + $0x38] sm:$0xff] }
 0x3ca   :  { %703 = vadd.xlane.f32.xlu2 %v702_v29  ;;  %923 = vmatpush.bf16.msra.mxu0 %v3357_v28  ;;  %v3365_v28 = vld [vmem:[#allocation5 + $0x34] sm:$0xf0] }
 0x3cf   :  { %v3508_v31 = vpop.eup %3507 }
 0x3d0   :  { %v554_v30 = vmul.f32 %v3508_v31, %v3502_v5  ;;  %v3355_v5 = vld [vmem:[%s4224_s3 + $0x28] sm:$0xff] }
 0x3d1   :  { %775 = vmatpush.bf16.msra.mxu3 %v3355_v5 }
 0x3d2   :  { %v556_v32 = vpack.c.bf16 %v554_v30, %v554_v30 }
 0x3d4   :  { %2830 = vmatmul.msk.bf16.vlgmr.msra.gmra.mxu1 %vm383_vm2, %v556_v32 }
 0x3d5   :  { %776 = vmatpush.bf16.msra.mxu3 %v3354_v6  ;;  %v2926_v6 = vld [vmem:[#allocation5 + $0x78] sm:$0xf0] }
 0x3d8   :  { %v701_v33 = vpop.xlane.xlu2 %700 }
 0x3d9   :  { %3509 = vrcp.f32 %v701_v33 }
 0x3df   :  { %v3510_v34 = vpop.eup %3509 }
 0x3e0   :  { %v707_v35 = vmul.f32 %v3510_v34, %v3504_v14  ;;  %v810_v36 = vpop.permute.xlu1 %809  ;;  %v813_v45 = vpop.permute.xlu2 %812 }
 0x3e1   :  { %v811_v37 = vrot.slane %v810_v36, 4 }
 0x3e2   :  { %v709_v38 = vpack.c.bf16 %v707_v35, %v707_v35 }
 0x3e3   :  { %v818_v39 = vsel %vm340_vm0, %v811_v37, 0 }
 0x3e4   :  { %2842 = vmatmul.msk.bf16.vlgmr.msrb.gmra.mxu1 %vm383_vm2, %v709_v38 }
 0x3e5   :  { %827 = vmatpush.bf16.xpose.msra.mxu1 %v818_v39 }
 0x3e8   :  { %v733_v40 = vpop.permute.xlu1 %732 }
 0x3e9   :  { %v738_v41 = vsel %vm411_vm1, %v733_v40, 0 }
 0x3ea   :  { %747 = vmatpush.bf16.msrb.mxu2 %v738_v41 }
 0x3eb   :  { %v805_v42 = vpop.f32.mrf.mxu0 }
 0x3ec   :  { %v833_v43 = vmul.f32 0.17677669, %v805_v42  ;;  %v337_v42 = vadd.f32 %v3476_v7, %v3788_v63 }
 0x3ee   :  { %v835_v44 = vsel %vm383_vm2, %v833_v43, -inf }
 0x3ef   :  { %836 = vmax.xlane.f32.xlu1 %v835_v44 }
 0x3f3   :  { %v807_v46 = vpop.f32.mrf.mxu0 }
 0x3f4   :  { %2854 = vmatmul.msk.bf16.vlgmr.msra.gmra.mxu1 %vm340_vm0, %v813_v45  ;;  %v478_v45 = vadd.f32 %v3909_v48, %v337_v42  ;;  %v2868_v42 = vld [vmem:[#allocation5] sm:$0xf] }
 0x43d   :  { %v704_v50 = vpop.xlane.xlu2 %703 }
 0x43e   :  { %3511 = vrcp.f32 %v704_v50 }
 0x444   :  { %v3512_v53 = vpop.eup %3511 }
 0x445   :  { %v708_v55 = vmul.f32 %v3512_v53, %v3506_v25 }
 0x447   :  { %v710_v57 = vpack.c.bf16 %v708_v55, %v708_v55 }
 0x451   :  { %v601_v49 = vpop.f32.mrf.mxu1 }
 0x452   :  { %v605_v51 = vpack.c.bf16 %v601_v49, %v3881_v59 }
 0x454   :  { %2839 = vmatmul.msk.bf16.vlgmr.msra.gmra.mxu2 %vm340_vm0, %v605_v51  ;;  %v3686_v51 = vmov 128.0  }
 0x459   :  { %v603_v52 = vpop.f32.mrf.mxu1 }
 0x461   :  { %v728_v56 = vpop.f32.mrf.mxu1 }
 0x462   :  { %v837_v58 = vpop.xlane.xlu1 %836 }
 0x463   :  { %v841_v61 = vsub.f32 %v833_v43, %v837_v58 }
 0x464   :  { %2843 = vmatmul.msk.bf16.vlgmr.msrb.gmra.mxu2 %vm383_vm2, %v710_v57 }
 0x465   :  { %v843_v62 = vmul.f32 1.442695, %v841_v61 }
 0x467   :  { %3513 = vpow2.f32 %v843_v62 }
 0x469   :  { %v730_v0 = vpop.f32.mrf.mxu1 }
 0x46d   :  { %v3514_v2 = vpop.eup %3513 }
 0x46e   :  { %v847_v3 = vsel %vm383_vm2, %v3514_v2, 0.0 }
 0x46f   :  { %848 = vadd.xlane.f32.xlu2 %v847_v3 }
 0x471   :  { %v829_v59 = vpop.f32.mrf.mxu1 }
 0x472   :  { %v834_v18 = vmul.f32 0.17677669, %v829_v59 }
 0x474   :  { %v838_v4 = vsel %vm383_vm2, %v834_v18, -inf }
 0x475   :  { %839 = vmax.xlane.f32.xlu0 %v838_v4  ;;  %v3373_v4 = vld [vmem:[#allocation5 + $0x74] sm:$0xf0] }
 0x479   :  { %v831_v27 = vpop.f32.mrf.mxu1 }
 0x47a   :  { %v3372_v27 = vld [vmem:[#allocation5 + $0x74] sm:$0xf] }
 0x47b   :  { %v2929_v7 = vor.u32 %v3372_v27, %v2926_v6 }
 0x487   :  { %859 = vrot.lane.b32.xlu2 %v3836_v1, %s3685_s16 }
 0x4d7   :  { %v630_v10 = vpop.f32.mrf.mxu2 }
 0x4d8   :  { %v635_v11 = vadd.f32 %v630_v10, %v477_v9  ;;  %v3371_v9 = vld [vmem:[#allocation5 + $0x64] sm:$0xf0]  ;;  %v3370_v10 = vld [vmem:[#allocation5 + $0x64] sm:$0xf] }
 0x4df   :  { %v632_v1 = vpop.f32.mrf.mxu2 }
 0x4e0   :  { %v636_v46 = vadd.f32 %v632_v1, %v478_v45  ;;  %v2918_v1 = vld [vmem:[#allocation5 + $0x68] sm:$0xf0] }
 0x4e2   :  { %v849_v12 = vpop.xlane.xlu2 %848 }
 0x4e3   :  { %3515 = vrcp.f32 %v849_v12  ;;  %v2921_v12 = vor.u32 %v3370_v10, %v2918_v1 }
 0x4e7   :  { %v749_v13 = vpop.f32.mrf.mxu2 }
 0x4e8   :  { %v753_v14 = vpack.c.bf16 %v749_v13, %v728_v56  ;;  %v840_v15 = vpop.xlane.xlu0 %839  ;;  %v2908_v13 = vld [vmem:[#allocation5 + $0x50] sm:$0xf] }
 0x4e9   :  { %v3516_v16 = vpop.eup %3515  ;;  %v842_v17 = vsub.f32 %v834_v18, %v840_v15  ;;  %v2924_v18 = vld [vmem:[#allocation5 + $0x70] sm:$0xf]  ;;  %v3368_v15 = vld [vmem:[#allocation5 + $0x54] sm:$0xf] }
 0x4ea   :  { %v855_v19 = vmul.f32 %v3516_v16, %v3514_v2  ;;  %2852 = vmatmul.msk.bf16.vlgmr.msra.gmra.mxu3 %vm340_vm0, %v753_v14  ;;  %v860_v20 = vpop.permute.xlu2 %859  ;;  %v2925_v5 = vor.u32 %v3373_v4, %v2924_v18  ;;  %v3369_v14 = vld [vmem:[#allocation5 + $0x54] sm:$0xf0]  ;;  %v3387_v18 = vld [vmem:[#allocation7 + $0x68] sm:$0xff] }
 0x4eb   :  { %v845_v21 = vmul.f32 1.442695, %v842_v17  ;;  %v865_v22 = vsel %vm411_vm1, %v860_v20, 0  ;;  %v2909_v16 = vor.u32 %v3369_v14, %v2908_v13  ;;  %v2910_v17 = vld [vmem:[#allocation5 + $0x58] sm:$0xf0] }
 0x4ec   :  { %v857_v23 = vpack.c.bf16 %v855_v19, %v855_v19  ;;  %874 = vmatpush.bf16.msra.mxu2 %v865_v22  ;;  %1095 = vmatpush.bf16.msrb.mxu1 %v2925_v5  ;;  %v2913_v19 = vor.u32 %v3368_v15, %v2910_v17  ;;  %v2900_v20 = vld [vmem:[#allocation5 + $0x40] sm:$0xf]  ;;  %v3366_v22 = vld [vmem:[#allocation5 + $0x44] sm:$0xf] }
 0x4ed   :  { %3517 = vpow2.f32 %v845_v21  ;;  %v3367_v21 = vld [vmem:[#allocation5 + $0x44] sm:$0xf0]  ;;  %v3378_v5 = vld [vmem:[#allocation7 + $0x20] sm:$0xff] }
 0x4ee   :  { %v3477_v14 = vld [vmem:[%s4226_s5] ss:$0 sm:$0xff] }
 0x4ef   :  { %v751_v60 = vpop.f32.mrf.mxu2  ;;  %2855 = vmatmul.msk.bf16.vlgmr.msra.gmra.mxu2 %vm383_vm2, %v857_v23  ;;  %v2901_v23 = vor.u32 %v3367_v21, %v2900_v20  ;;  %v3478_v20 = vld [vmem:[%s4227_s6] ss:$0 sm:$0xff] }
 0x4f0   :  { %1109 = vmatpush.bf16.msrb.mxu2 %v2929_v7  ;;  %v2902_v60 = vld [vmem:[#allocation5 + $0x48] sm:$0xf0] }
 0x4f3   :  { %v3518_v24 = vpop.eup %3517 }
 0x4f4   :  { %v850_v25 = vsel %vm383_vm2, %v3518_v24, 0.0  ;;  %1110 = vmatpush.bf16.msrb.mxu2 %v2921_v12 }
 0x4f5   :  { %851 = vadd.xlane.f32.xlu0 %v850_v25  ;;  %v2892_v25 = vld [vmem:[#allocation5 + $0x30] sm:$0xf] }
 0x4f8   :  { %1111 = vmatpush.bf16.msrb.mxu2 %v2913_v19 }
 0x509   :  { %880 = vrot.lane.b32.xlu0 %v3870_v54, %s3685_s16  ;;  %v3356_v54 = vld [vmem:[%s4224_s3 + $0x30] sm:$0xff] }
 0x50a   :  { %924 = vmatpush.bf16.msra.mxu0 %v3356_v54  ;;  %v2876_v54 = vld [vmem:[#allocation5 + $0x10] sm:$0xf] }
 0x568   :  { %v852_v29 = vpop.xlane.xlu0 %851 }
 0x569   :  { %3519 = vrcp.f32 %v852_v29  ;;  %v2893_v29 = vor.u32 %v3365_v28, %v2892_v25  ;;  %v3376_v25 = vld [vmem:[#allocation7 + $0x10] sm:$0xff]  ;;  %v3385_v28 = vld [vmem:[#allocation7 + $0x58] sm:$0xff] }
 0x56a   :  { %3521 = vrcp.f32 %v3686_v51 }
 0x56d   :  { %v778_v26 = vpop.f32.mrf.mxu3 }
 0x56e   :  { %v783_v31 = vadd.f32 %v778_v26, %v635_v11  ;;  %v2917_v11 = vor.u32 %v3371_v9, %v2916_v8  ;;  %v3364_v26 = vld [vmem:[#allocation5 + $0x34] sm:$0xf] }
 0x56f   :  { %v3520_v32 = vpop.eup %3519 }
 0x570   :  { %v856_v33 = vmul.f32 %v3520_v32, %v3518_v24  ;;  %v3522_v52 = vpop.eup %3521  ;;  %1096 = vmatpush.bf16.msrb.mxu1 %v2917_v11  ;;  %v2905_v24 = vor.u32 %v3366_v22, %v2902_v60  ;;  %v2884_v32 = vld [vmem:[#allocation5 + $0x20] sm:$0xf] }
 0x571   :  { %v940_v53 = vmul.f32 128.0, %v3522_v52  ;;  %vm944_vm3 = vweird.f32 %v3522_v52 }
 0x572   :  { %v876_v30 = vpop.f32.mrf.mxu2  ;;  %v858_v37 = vpack.c.bf16 %v856_v33, %v856_v33  ;;  %1112 = vmatpush.bf16.msrb.mxu2 %v2905_v24  ;;  %v3363_v33 = vld [vmem:[#allocation5 + $0x24] sm:$0xf0]  ;;  %v3386_v24 = vld [vmem:[#allocation7 + $0x60] sm:$0xff] }
 0x573   :  { %v941_v55 = vsub.f32 1.0, %v940_v53  ;;  %v3381_v53 = vld [vmem:[#allocation7 + $0x38] sm:$0xff] }
 0x574   :  { %1097 = vmatpush.bf16.msrb.mxu1 %v2909_v16 }
 0x575   :  { %v780_v38 = vpop.f32.mrf.mxu3  ;;  %v942_v56 = vmul.f32 %v3522_v52, %v941_v55  ;;  %v3389_v55 = vld [vmem:[#allocation7 + $0x78] sm:$0xff] }
 0x576   :  { %v784_v47 = vadd.f32 %v780_v38, %v636_v46  ;;  %v3361_v38 = vld [vmem:[#allocation5 + $0x14] sm:$0xf0]  ;;  %v3358_v46 = vld [vmem:[#allocation5 + $0x4] sm:$0xf]  ;;  %1275 = vmatpush.bf16.msrb.mxu0 %v3389_v55 }
 0x577   :  { %v943_v57 = vadd.f32 %v3522_v52, %v942_v56 }
 0x578   :  { %1098 = vmatpush.bf16.msrb.mxu1 %v2901_v23 }
 0x579   :  { %v3945_v58 = vsel %vm944_vm3, %v3522_v52, %v943_v57 }
 0x57a   :  { %v878_v34 = vpop.f32.mrf.mxu2 }
 0x57b   :  { %v881_v35 = vpop.permute.xlu0 %880  ;;  %v3362_v34 = vld [vmem:[#allocation5 + $0x24] sm:$0xf] }
 0x57c   :  { %v886_v36 = vsel %vm411_vm1, %v881_v35, 0  ;;  %1099 = vmatpush.bf16.msrb.mxu1 %v2893_v29  ;;  %v2885_v35 = vor.u32 %v3363_v33, %v2884_v32  ;;  %v3374_v29 = vld [vmem:[#allocation7] sm:$0xff] }
 0x57d   :  { %895 = vmatpush.bf16.msrb.mxu3 %v886_v36  ;;  %v2886_v36 = vld [vmem:[#allocation5 + $0x28] sm:$0xf0]  ;;  %v1009_v32 = vld [vmem:[%s4229_s8] sm:$0x3] }
 0x580   :  { %2856 = vmatmul.msk.bf16.vlgmr.msrb.gmra.mxu3 %vm383_vm2, %v858_v37  ;;  %v2889_v37 = vor.u32 %v3362_v34, %v2886_v36  ;;  %1100 = vmatpush.bf16.msrb.mxu1 %v2885_v35  ;;  %v1011_v34 = vperm.slane %v1009_v32, 0 }
 0x581   :  { %1261 = vmatpush.bf16.msra.mxu3 %v3381_v53 }
 0x603   :  { %v897_v39 = vpop.f32.mrf.mxu3 }
 0x604   :  { %v901_v40 = vpack.c.bf16 %v897_v39, %v876_v30  ;;  %v3360_v39 = vld [vmem:[#allocation5 + $0x14] sm:$0xf] }
 0x606   :  { %2865 = vmatmul.msk.bf16.vlgmr.msra.gmra.mxu0 %vm340_vm0, %v901_v40  ;;  %v2877_v40 = vor.u32 %v3361_v38, %v2876_v54  ;;  %v1012_v54 = vperm.slane %v1009_v32, 1  ;;  %v3045_v32 = vld [vmem:[#allocation2 + $0x120] sm:$0xf] }
 0x608   :  { %1101 = vmatpush.bf16.msrb.mxu1 %v2877_v40 }
 0x60b   :  { %v899_v41 = vpop.f32.mrf.mxu3 }
 0x60c   :  { %v2878_v41 = vld [vmem:[#allocation5 + $0x18] sm:$0xf0] }
 0x60d   :  { %v2881_v45 = vor.u32 %v3360_v39, %v2878_v41 }
 0x683   :  { %v926_v43 = vpop.f32.mrf.mxu0 }
 0x684   :  { %v931_v44 = vadd.f32 %v926_v43, %v783_v31  ;;  %v2894_v31 = vld [vmem:[#allocation5 + $0x38] sm:$0xf0]  ;;  %v3359_v43 = vld [vmem:[#allocation5 + $0x4] sm:$0xf0] }
 0x685   :  { %v2897_v30 = vor.u32 %v3364_v26, %v2894_v31  ;;  %v3384_v26 = vld [vmem:[#allocation7 + $0x50] sm:$0xff]  ;;  %v3383_v31 = vld [vmem:[#allocation7 + $0x48] sm:$0xff] }
 0x686   :  { %935 = vadd.xlane.f32.xlu1 %v931_v44 }
 0x687   :  { %1113 = vmatpush.bf16.msrb.mxu2 %v2897_v30  ;;  %v3382_v30 = vld [vmem:[#allocation7 + $0x40] sm:$0xff] }
 0x68b   :  { %v928_v49 = vpop.f32.mrf.mxu0  ;;  %1114 = vmatpush.bf16.msrb.mxu2 %v2889_v37 }
 0x68c   :  { %v932_v50 = vadd.f32 %v928_v49, %v784_v47  ;;  %v2870_v47 = vld [vmem:[#allocation5 + $0x8] sm:$0xf0] }
 0x68d   :  { %v2873_v51 = vor.u32 %v3358_v46, %v2870_v47 }
 0x68e   :  { %937 = vadd.xlane.f32.xlu1 %v932_v50 }
 0x68f   :  { %1115 = vmatpush.bf16.msrb.mxu2 %v2881_v45 }
 0x693   :  { %1116 = vmatpush.bf16.msrb.mxu2 %v2873_v51 }
 0x6f9   :  { %v936_v63 = vpop.xlane.xlu1 %935 }
 0x6fa   :  { %v946_v61 = vmul.f32 %v3945_v58, %v936_v63  ;;  %v3380_v63 = vld [vmem:[#allocation7 + $0x30] sm:$0xff] }
 0x6fb   :  { %1262 = vmatpush.bf16.msra.mxu3 %v3380_v63 }
 0x6fc   :  { %v3948_v48 = vsub.f32 %v931_v44, %v946_v61  ;;  %v3388_v61 = vld [vmem:[#allocation7 + $0x70] sm:$0xff] }
 0x6fd   :  { %1276 = vmatpush.bf16.msrb.mxu0 %v3388_v61 }
 0x6fe   :  { %v950_v62 = vmul.f32 %v3948_v48, %v3948_v48 }
 0x700   :  { %952 = vadd.xlane.f32.xlu1 %v950_v62 }
 0x701   :  { %v938_v0 = vpop.xlane.xlu1 %937  ;;  %1277 = vmatpush.bf16.msrb.mxu0 %v3387_v18 }
 0x702   :  { %v947_v2 = vmul.f32 %v3945_v58, %v938_v0 }
 0x704   :  { %v3953_v3 = vsub.f32 %v932_v50, %v947_v2  ;;  %v2869_v50 = vor.u32 %v3359_v43, %v2868_v42 }
 0x705   :  { %1278 = vmatpush.bf16.msrb.mxu0 %v3386_v24  ;;  %v3406_v24 = vld [vmem:[#allocation2 + $0x140] sm:$0xf0] }
 0x706   :  { %v951_v59 = vmul.f32 %v3953_v3, %v3953_v3  ;;  %1102 = vmatpush.bf16.msrb.mxu1 %v2869_v50 }
 0x708   :  { %954 = vadd.xlane.f32.xlu0 %v951_v59  ;;  %v3379_v59 = vld [vmem:[#allocation7 + $0x28] sm:$0xff] }
 0x709   :  { %1263 = vmatpush.bf16.msra.mxu3 %v3379_v59  ;;  %1279 = vmatpush.bf16.msrb.mxu0 %v3385_v28 }
 0x70d   :  { %1264 = vmatpush.bf16.msra.mxu3 %v3378_v5  ;;  %1280 = vmatpush.bf16.msrb.mxu0 %v3384_v26  ;;  %v3065_v26 = vld [vmem:[#allocation2 + $0x140] sm:$0xf] }
 0x711   :  { %1281 = vmatpush.bf16.msrb.mxu0 %v3383_v31 }
 0x715   :  { %1282 = vmatpush.bf16.msrb.mxu0 %v3382_v30 }
 0x773   :  { %v953_v44 = vpop.xlane.xlu1 %952 }
 0x774   :  { %v956_v49 = vmul.f32 %v953_v44, %v3945_v58 }
 0x776   :  { %v958_v52 = vadd.f32 1e-05, %v956_v49  ;;  %v3479_v49 = vld [vmem:[%s4231_s10] ss:$0 sm:$0xff] }
 0x778   :  { %3523 = vrsqrt.f32 %v958_v52  ;;  %vm966_vm5 = vweird.f32 %v958_v52 }
 0x77b   :  { %v955_v56 = vpop.xlane.xlu0 %954 }
 0x77c   :  { %v957_v57 = vmul.f32 %v955_v56, %v3945_v58 }
 0x77e   :  { %v3524_v62 = vpop.eup %3523  ;;  %v959_v0 = vadd.f32 1e-05, %v957_v57 }
 0x77f   :  { %v961_v2 = vmul.f32 %v3524_v62, %v958_v52  ;;  %vm967_vm4 = vweird.f32 %v3524_v62 }
 0x780   :  { %3525 = vrsqrt.f32 %v959_v0  ;;  %vm968_vm6 = vmor %vm966_vm5, %vm967_vm4  ;;  %vm976_vm8 = vweird.f32 %v959_v0 }
 0x781   :  { %v962_v4 = vmul.f32 %v3524_v62, %v961_v2 }
 0x783   :  { %v963_v27 = vmul.f32 0.5, %v962_v4 }
 0x785   :  { %v964_v6 = vsub.f32 1.5, %v963_v27 }
 0x786   :  { %v3526_v7 = vpop.eup %3525 }
 0x787   :  { %v965_v8 = vmul.f32 %v3524_v62, %v964_v6  ;;  %v971_v9 = vmul.f32 %v3526_v7, %v959_v0  ;;  %vm977_vm7 = vweird.f32 %v3526_v7 }
 0x788   :  { %vm978_vm9 = vmor %vm976_vm8, %vm977_vm7 }
 0x789   :  { %v972_v10 = vmul.f32 %v3526_v7, %v971_v9  ;;  %v969_v11 = vsel %vm968_vm6, %v3524_v62, %v965_v8  ;;  %v3412_v8 = vld [vmem:[#allocation2 + $0x170] sm:$0xf0]  ;;  %v3411_v9 = vld [vmem:[#allocation2 + $0x16c] sm:$0xf] }
 0x78a   :  { %v980_v13 = vmul.f32 %v969_v11, %v3948_v48  ;;  %v3377_v48 = vld [vmem:[#allocation7 + $0x18] sm:$0xff] }
 0x78b   :  { %v973_v1 = vmul.f32 0.5, %v972_v10  ;;  %1265 = vmatpush.bf16.msra.mxu3 %v3377_v48  ;;  %v3083_v11 = vld [vmem:[#allocation2 + $0x174] sm:$0xf0] }
 0x78c   :  { %v985_v19 = vmul.f32 %v3477_v14, %v980_v13  ;;  %v3086_v13 = vor.u32 %v3411_v9, %v3083_v11  ;;  %v3057_v48 = vld [vmem:[#allocation2 + $0x138] sm:$0xf]  ;;  %v3391_v11 = vld [vmem:[#allocation2 + $0xc8] sm:$0xf0] }
 0x78d   :  { %v974_v12 = vsub.f32 1.5, %v973_v1  ;;  %v3089_v1 = vld [vmem:[#allocation2 + $0x170] sm:$0xf]  ;;  %v3058_v28 = vor.u32 %v3406_v24, %v3057_v48 }
 0x78e   :  { %v990_v22 = vadd.f32 %v3478_v20, %v985_v19  ;;  %1528 = vmatpush.bf16.msra.mxu2 %v3086_v13 }
 0x78f   :  { %v975_v15 = vmul.f32 %v3526_v7, %v974_v12  ;;  %1266 = vmatpush.bf16.msra.mxu3 %v3376_v25  ;;  %v3413_v12 = vld [vmem:[#allocation2 + $0x178] sm:$0xf0] }
 0x790   :  { %v3405_v25 = vld [vmem:[#allocation2 + $0x13c] sm:$0xf] }
 0x791   :  { %v979_v16 = vsel %vm978_vm9, %v3526_v7, %v975_v15  ;;  %v3081_v7 = vld [vmem:[#allocation2 + $0x168] sm:$0xf]  ;;  %v3069_v15 = vld [vmem:[#allocation2 + $0x150] sm:$0xf] }
 0x792   :  { %v981_v17 = vmul.f32 %v979_v16, %v3953_v3  ;;  %v3375_v3 = vld [vmem:[#allocation7 + $0x8] sm:$0xff]  ;;  %v3082_v10 = vor.u32 %v3412_v8, %v3081_v7  ;;  %v3409_v16 = vld [vmem:[#allocation2 + $0x158] sm:$0xf0] }
 0x793   :  { %1267 = vmatpush.bf16.msra.mxu3 %v3375_v3  ;;  %v3070_v19 = vor.u32 %v3409_v16, %v3069_v15  ;;  %v3059_v3 = vld [vmem:[#allocation2 + $0x144] sm:$0xf0]  ;;  %v3392_v16 = vld [vmem:[#allocation2 + $0xd0] sm:$0xf0] }
 0x794   :  { %v986_v21 = vmul.f32 %v3477_v14, %v981_v17  ;;  %v3090_v14 = vor.u32 %v3413_v12, %v3089_v1  ;;  %1514 = vmatpush.bf16.msra.mxu1 %v3082_v10  ;;  %v3408_v17 = vld [vmem:[#allocation2 + $0x154] sm:$0xf]  ;;  %v3062_v31 = vor.u32 %v3405_v25, %v3059_v3  ;;  %v2997_v10 = vld [vmem:[#allocation2 + $0xc0] sm:$0xf]  ;;  %v3390_v1 = vld [vmem:[#allocation2 + $0xc4] sm:$0xf] }
 0x795   :  { %v2998_v13 = vor.u32 %v3391_v11, %v2997_v10  ;;  %v3005_v15 = vld [vmem:[#allocation2 + $0xc8] sm:$0xf] }
 0x796   :  { %v991_v23 = vadd.f32 %v3478_v20, %v986_v21  ;;  %v3071_v20 = vld [vmem:[#allocation2 + $0x15c] sm:$0xf0]  ;;  %v3077_v21 = vld [vmem:[#allocation2 + $0x158] sm:$0xf] }
 0x797   :  { %1268 = vmatpush.bf16.msra.mxu3 %v3374_v29  ;;  %v3407_v29 = vld [vmem:[#allocation2 + $0x148] sm:$0xf0] }
 0x798   :  { %v992_v60 = vpack.c.bf16 %v991_v23, %v990_v22  ;;  %1515 = vmatpush.bf16.msra.mxu1 %v3070_v19  ;;  %v3066_v30 = vor.u32 %v3407_v29, %v3065_v26  ;;  %v3006_v19 = vor.u32 %v3392_v16, %v3005_v15 }
 0x79a   :  { %1103 = vmatmul.bf16.vlgmr.msrb.gmra.mxu1 %v992_v60  ;;  %1117 = vmatmul.bf16.vlgmr.msrb.gmra.mxu2 %v992_v60 }
 0x79b   :  { %1542 = vmatpush.bf16.msrb.mxu3 %v3090_v14  ;;  %v2999_v14 = vld [vmem:[#allocation2 + $0xcc] sm:$0xf0] }
 0x79c   :  { %1516 = vmatpush.bf16.msra.mxu1 %v3058_v28 }
 0x817   :  { %v1104_v33 = vpop.f32.mrf.mxu1 }
 0x818   :  { %v1105_v36 = vadd.f32 %v1104_v33, %v1011_v34  ;;  %v3403_v33 = vld [vmem:[#allocation2 + $0x128] sm:$0xf0] }
 0x81a   :  { %v1123_v39 = vmax.f32 %v1105_v36, 0.0  ;;  %v3047_v36 = vld [vmem:[#allocation2 + $0x12c] sm:$0xf0] }
 0x81d   :  { %v1118_v35 = vpop.f32.mrf.mxu2 }
 0x81e   :  { %v1119_v41 = vadd.f32 %v1118_v35, %v1012_v54  ;;  %v3046_v35 = vor.u32 %v3403_v33, %v3045_v32 }
 0x81f   :  { %v1106_v37 = vpop.f32.mrf.mxu1 }
 0x820   :  { %v1107_v38 = vadd.f32 %v1106_v37, %v1011_v34  ;;  %v1124_v45 = vmax.f32 %v1119_v41, 0.0  ;;  %v3402_v34 = vld [vmem:[#allocation2 + $0x124] sm:$0xf]  ;;  %v3053_v37 = vld [vmem:[#allocation2 + $0x128] sm:$0xf]  ;;  %1517 = vmatpush.bf16.msra.mxu1 %v3046_v35 }
 0x821   :  { %v3400_v41 = vld [vmem:[#allocation2 + $0x110] sm:$0xf0]  ;;  %v3480_v35 = vld [vmem:[%s4232_s11] ss:$0 sm:$0xff] }
 0x822   :  { %v1125_v40 = vmax.f32 %v1107_v38, 0.0  ;;  %v3050_v38 = vor.u32 %v3402_v34, %v3047_v36 }
 0x824   :  { %v1127_v42 = vpack.c.bf16 %v1125_v40, %v1123_v39  ;;  %v3033_v40 = vld [vmem:[#allocation2 + $0x108] sm:$0xf] }
 0x825   :  { %v1120_v43 = vpop.f32.mrf.mxu2 }
 0x826   :  { %v1121_v44 = vadd.f32 %v1120_v43, %v1012_v54  ;;  %1269 = vmatmul.bf16.vlgmr.msra.gmra.mxu3 %v1127_v42  ;;  %v3404_v54 = vld [vmem:[#allocation2 + $0x130] sm:$0xf0]  ;;  %v3399_v42 = vld [vmem:[#allocation2 + $0x10c] sm:$0xf]  ;;  %v3034_v43 = vor.u32 %v3400_v41, %v3033_v40 }
 0x827   :  { %v3054_v39 = vor.u32 %v3404_v54, %v3053_v37 }
 0x828   :  { %v1126_v46 = vmax.f32 %v1121_v44, 0.0  ;;  %v3035_v44 = vld [vmem:[#allocation2 + $0x114] sm:$0xf0]  ;;  %1518 = vmatpush.bf16.msra.mxu1 %v3034_v43 }
 0x82a   :  { %v1128_v47 = vpack.c.bf16 %v1126_v46, %v1124_v45  ;;  %v3041_v45 = vld [vmem:[#allocation2 + $0x110] sm:$0xf]  ;;  %v3401_v46 = vld [vmem:[#allocation2 + $0x118] sm:$0xf0] }
 0x82c   :  { %1283 = vmatmul.bf16.vlgmr.msrb.gmra.mxu0 %v1128_v47  ;;  %v3038_v47 = vor.u32 %v3399_v42, %v3035_v44 }
 0x8a9   :  { %v1270_v50 = vpop.f32.mrf.mxu3  ;;  %v1284_v51 = vpop.f32.mrf.mxu0 }
 0x8aa   :  { %v1271_v52 = vadd.f32 %v3479_v49, %v1270_v50  ;;  %v3021_v50 = vld [vmem:[#allocation2 + $0xf0] sm:$0xf] }
 0x8ac   :  { %v1285_v53 = vadd.f32 %v1284_v51, %v1271_v52  ;;  %v3397_v51 = vld [vmem:[#allocation2 + $0xf8] sm:$0xf0]  ;;  %v3396_v52 = vld [vmem:[#allocation2 + $0xf4] sm:$0xf] }
 0x8ae   :  { %v1289_v55 = vadd.f32 %v1285_v53, %v990_v22  ;;  %v3410_v22 = vld [vmem:[#allocation2 + $0x160] sm:$0xf0]  ;;  %v3022_v53 = vor.u32 %v3397_v51, %v3021_v50 }
 0x8af   :  { %v3078_v60 = vor.u32 %v3410_v22, %v3077_v21 }
 0x8b0   :  { %1293 = vadd.xlane.f32.xlu2 %v1289_v55  ;;  %1519 = vmatpush.bf16.msra.mxu1 %v3022_v53 }
 0x8b1   :  { %v1272_v56 = vpop.f32.mrf.mxu3  ;;  %v1286_v63 = vpop.f32.mrf.mxu0  ;;  %1543 = vmatpush.bf16.msrb.mxu3 %v3078_v60 }
 0x8b2   :  { %v1273_v57 = vadd.f32 %v3479_v49, %v1272_v56  ;;  %v3042_v49 = vor.u32 %v3401_v46, %v3041_v45  ;;  %v3029_v56 = vld [vmem:[#allocation2 + $0xf8] sm:$0xf] }
 0x8b4   :  { %v1287_v61 = vadd.f32 %v1286_v63, %v1273_v57  ;;  %v3398_v57 = vld [vmem:[#allocation2 + $0x100] sm:$0xf0] }
 0x8b5   :  { %1544 = vmatpush.bf16.msrb.mxu3 %v3066_v30 }
 0x8b6   :  { %v1290_v62 = vadd.f32 %v1287_v61, %v991_v23  ;;  %v3074_v23 = vor.u32 %v3408_v17, %v3071_v20  ;;  %v3030_v61 = vor.u32 %v3398_v57, %v3029_v56  ;;  %v3002_v17 = vor.u32 %v3390_v1, %v2999_v14 }
 0x8b8   :  { %1295 = vadd.xlane.f32.xlu1 %v1290_v62  ;;  %1529 = vmatpush.bf16.msra.mxu2 %v3074_v23 }
 0x8b9   :  { %1545 = vmatpush.bf16.msrb.mxu3 %v3054_v39  ;;  %v3481_v39 = vld [vmem:[%s4233_s12] ss:$0 sm:$0xff] }
 0x8bc   :  { %1530 = vmatpush.bf16.msra.mxu2 %v3062_v31 }
 0x8bd   :  { %1546 = vmatpush.bf16.msrb.mxu3 %v3042_v49 }
 0x8c0   :  { %1531 = vmatpush.bf16.msra.mxu2 %v3050_v38 }
 0x8c1   :  { %1547 = vmatpush.bf16.msrb.mxu3 %v3030_v61 }
 0x8c4   :  { %1532 = vmatpush.bf16.msra.mxu2 %v3038_v47 }
 0x923   :  { %v1294_v0 = vpop.xlane.xlu2 %1293 }
 0x924   :  { %v1297_v2 = vmul.f32 %v1294_v0, %v3945_v58  ;;  %v3394_v0 = vld [vmem:[#allocation2 + $0xe0] sm:$0xf0] }
 0x926   :  { %v3974_v59 = vsub.f32 %v1289_v55, %v1297_v2  ;;  %v3023_v55 = vld [vmem:[#allocation2 + $0xfc] sm:$0xf0]  ;;  %v3393_v2 = vld [vmem:[#allocation2 + $0xdc] sm:$0xf] }
 0x927   :  { %v3026_v63 = vor.u32 %v3396_v52, %v3023_v55 }
 0x928   :  { %v1301_v18 = vmul.f32 %v3974_v59, %v3974_v59 }
 0x929   :  { %1533 = vmatpush.bf16.msra.mxu2 %v3026_v63 }
 0x92a   :  { %1303 = vadd.xlane.f32.xlu1 %v1301_v18 }
 0x92b   :  { %v1296_v4 = vpop.xlane.xlu1 %1295 }
 0x92c   :  { %v1298_v27 = vmul.f32 %v1296_v4, %v3945_v58  ;;  %v3011_v4 = vld [vmem:[#allocation2 + $0xe4] sm:$0xf0] }
 0x92d   :  { %v3014_v8 = vor.u32 %v3393_v2, %v3011_v4 }
 0x92e   :  { %v3979_v5 = vsub.f32 %v1290_v62, %v1298_v27  ;;  %v3009_v62 = vld [vmem:[#allocation2 + $0xd8] sm:$0xf]  ;;  %v3017_v27 = vld [vmem:[#allocation2 + $0xe0] sm:$0xf] }
 0x92f   :  { %v3010_v18 = vor.u32 %v3394_v0, %v3009_v62  ;;  %1534 = vmatpush.bf16.msra.mxu2 %v3014_v8 }
 0x930   :  { %v1302_v6 = vmul.f32 %v3979_v5, %v3979_v5 }
 0x931   :  { %1520 = vmatpush.bf16.msra.mxu1 %v3010_v18 }
 0x932   :  { %1305 = vadd.xlane.f32.xlu1 %v1302_v6  ;;  %v3395_v6 = vld [vmem:[#allocation2 + $0xe8] sm:$0xf0] }
 0x933   :  { %v3018_v9 = vor.u32 %v3395_v6, %v3017_v27  ;;  %1535 = vmatpush.bf16.msra.mxu2 %v3002_v17 }
 0x935   :  { %1548 = vmatpush.bf16.msrb.mxu3 %v3018_v9  ;;  %1521 = vmatpush.bf16.msra.mxu1 %v2998_v13 }
 0x939   :  { %1549 = vmatpush.bf16.msrb.mxu3 %v3006_v19 }
 0x99d   :  { %v1304_v7 = vpop.xlane.xlu1 %1303 }
 0x99e   :  { %v1307_v12 = vmul.f32 %v1304_v7, %v3945_v58 }
 0x9a0   :  { %v1309_v20 = vadd.f32 1e-05, %v1307_v12 }
 0x9a2   :  { %3527 = vrsqrt.f32 %v1309_v20  ;;  %vm1317_vm11 = vweird.f32 %v1309_v20 }
 0x9a5   :  { %v1306_v21 = vpop.xlane.xlu1 %1305 }
 0x9a6   :  { %v1308_v22 = vmul.f32 %v1306_v21, %v3945_v58 }
 0x9a8   :  { %v3528_v23 = vpop.eup %3527  ;;  %v1310_v60 = vadd.f32 1e-05, %v1308_v22 }
 0x9a9   :  { %v1312_v48 = vmul.f32 %v3528_v23, %v1309_v20  ;;  %vm1318_vm10 = vweird.f32 %v3528_v23 }
 0x9aa   :  { %3529 = vrsqrt.f32 %v1310_v60  ;;  %vm1319_vm12 = vmor %vm1317_vm11, %vm1318_vm10  ;;  %vm1327_vm14 = vweird.f32 %v1310_v60 }
 0x9ab   :  { %v1313_v24 = vmul.f32 %v3528_v23, %v1312_v48 }
 0x9ad   :  { %v1314_v25 = vmul.f32 0.5, %v1313_v24 }
 0x9af   :  { %v1315_v28 = vsub.f32 1.5, %v1314_v25 }
 0x9b0   :  { %v3530_v3 = vpop.eup %3529 }
 0x9b1   :  { %v1316_v26 = vmul.f32 %v3528_v23, %v1315_v28  ;;  %v1322_v29 = vmul.f32 %v3530_v3, %v1310_v60  ;;  %vm1328_vm13 = vweird.f32 %v3530_v3 }
 0x9b2   :  { %vm1329_vm15 = vmor %vm1327_vm14, %vm1328_vm13  ;;  %vm2634_vm13 = vcmask 1041409  }
 0x9b3   :  { %v1323_v31 = vmul.f32 %v3530_v3, %v1322_v29  ;;  %v1320_v30 = vsel %vm1319_vm12, %v3528_v23, %v1316_v26 }
 0x9b4   :  { %v1331_v34 = vmul.f32 %v1320_v30, %v3974_v59 }
 0x9b5   :  { %v1324_v32 = vmul.f32 0.5, %v1323_v31 }
 0x9b6   :  { %v1336_v38 = vmul.f32 %v3480_v35, %v1331_v34 }
 0x9b7   :  { %v1325_v33 = vsub.f32 1.5, %v1324_v32 }
 0x9b8   :  { %v3993_v41 = vadd.f32 %v3481_v39, %v1336_v38 }
 0x9b9   :  { %v1326_v36 = vmul.f32 %v3530_v3, %v1325_v33 }
 0x9bb   :  { %v1330_v37 = vsel %vm1329_vm15, %v3530_v3, %v1326_v36 }
 0x9bc   :  { %v1332_v54 = vmul.f32 %v1330_v37, %v3979_v5  ;;  %v2994_v5 = vld [vmem:[%s4223_s2 + $0x3] sm:$0x7] }
 0x9bd   :  { %v1380_v44 = vperm.slane %v2994_v5, 0  ;;  %v1381_v45 = vperm.slane %v2994_v5, 1  ;;  %v1382_v46 = vperm.slane %v2994_v5, 2 }
 0x9be   :  { %v1337_v40 = vmul.f32 %v3480_v35, %v1332_v54 }
 0x9c0   :  { %v3995_v42 = vadd.f32 %v3481_v39, %v1337_v40 }
 0x9c2   :  { %v1343_v59 = vpack.c.bf16 %v3995_v42, %v3993_v41 }
 0x9c4   :  { %1522 = vmatmul.bf16.vlgmr.msra.gmra.mxu1 %v1343_v59  ;;  %1536 = vmatmul.bf16.vlgmr.msra.gmra.mxu2 %v1343_v59 }
 0x9c5   :  { %1550 = vmatmul.bf16.vlgmr.msrb.gmra.mxu3 %v1343_v59 }
 0xa41   :  { %v1523_v43 = vpop.f32.mrf.mxu1 }
 0xa42   :  { %v1524_v49 = vadd.f32 %v1523_v43, %v1380_v44 }
 0xa47   :  { %v1537_v47 = vpop.f32.mrf.mxu2 }
 0xa48   :  { %v1538_v50 = vadd.f32 %v1537_v47, %v1381_v45  ;;  %v1551_v51 = vpop.f32.mrf.mxu3 }
 0xa49   :  { %v1552_v52 = vadd.f32 %v1551_v51, %v1382_v46  ;;  %v1525_v61 = vpop.f32.mrf.mxu1 }
 0xa4a   :  { %v4002_v53 = vpack.c.bf16 %v1538_v50, %v1524_v49  ;;  %v1526_v18 = vadd.f32 %v1525_v61, %v1380_v44 }
 0xa4b   :  { %v4004_v55 = vpack.c.bf16 %v1552_v52, %v1552_v52 }
 0xa4c   :  { %1722 = vrot.lane.b32.xlu1 %v4002_v53, %s3684_s26  ;;  %v1585_v56 = vrot.slane %v4002_v53, 4  ;;  %v1725_v57 = vunpack.c.l.b16 %v4002_v53 }
 0xa4d   :  { %v1656_v63 = vsel %vm411_vm1, %v4004_v55, 0 }
 0xa4e   :  { %1665 = vmatpush.bf16.msrb.mxu1 %v1656_v63  ;;  %v1590_v62 = vsel %vm340_vm0, %v1585_v56, 0  ;;  %v4013_v0 = vpack.c.b16 %v1725_v57, %v1725_v57  ;;  %v1801_v57 = vunpack.c.l.b16 %v4004_v55 }
 0xa4f   :  { %v1539_v2 = vpop.f32.mrf.mxu2  ;;  %1599 = vmatpush.bf16.xpose.msra.mxu0 %v1590_v62 }
 0xa50   :  { %v1540_v4 = vadd.f32 %v1539_v2, %v1381_v45  ;;  %v1553_v27 = vpop.f32.mrf.mxu3  ;;  %1727 = vrot.lane.b32.xlu0 %v4013_v0, %s3684_s26  ;;  %v4056_v63 = vpack.c.b16 %v1801_v57, %v1801_v57 }
 0xa51   :  { %v1554_v6 = vadd.f32 %v1553_v27, %v1382_v46 }
 0xa52   :  { %v4017_v7 = vpack.c.bf16 %v1540_v4, %v1526_v18 }
 0xa53   :  { %v4019_v8 = vpack.c.bf16 %v1554_v6, %v1554_v6 }
 0xa54   :  { %1748 = vrot.lane.b32.xlu1 %v4017_v7, %s3684_s26  ;;  %v1606_v9 = vrot.slane %v4017_v7, 4  ;;  %v1751_v34 = vunpack.c.l.b16 %v4017_v7 }
 0xa55   :  { %v1675_v10 = vsel %vm411_vm1, %v4019_v8, 0 }
 0xa56   :  { %1684 = vmatpush.bf16.msrb.mxu2 %v1675_v10  ;;  %3108 = vmatmul.msk.bf16.vlgmr.msra.gmra.mxu0 %vm340_vm0, %v4002_v53  ;;  %v1611_v11 = vsel %vm340_vm0, %v1606_v9, 0  ;;  %v4045_v35 = vpack.c.b16 %v1751_v34, %v1751_v34 }
 0xa57   :  { %1620 = vmatpush.bf16.xpose.msrb.mxu0 %v1611_v11 }
 0xa5c   :  { %1880 = vrot.lane.b32.xlu1 %v4002_v53, %s3682_s23 }
 0xa64   :  { %1883 = vrot.lane.b32.xlu1 %v4013_v0, %s3682_s23 }
 0xa66   :  { %3109 = vmatmul.msk.bf16.vlgmr.msrb.gmra.mxu0 %vm340_vm0, %v4017_v7 }
 0xabe   :  { %v1723_v1 = vpop.permute.xlu1 %1722 }
 0xabf   :  { %v1724_v12 = vrot.slane %v1723_v1, 4 }
 0xac1   :  { %v1733_v13 = vsel %vm340_vm0, %v1724_v12, 0 }
 0xac2   :  { %1742 = vmatpush.bf16.xpose.msra.mxu0 %v1733_v13  ;;  %v1728_v16 = vpop.permute.xlu0 %1727 }
 0xac6   :  { %v1749_v14 = vpop.permute.xlu1 %1748 }
 0xac7   :  { %v1750_v15 = vrot.slane %v1749_v14, 4 }
 0xac9   :  { %v1759_v17 = vsel %vm340_vm0, %v1750_v15, 0  ;;  %3121 = vmatmul.msk.bf16.vlgmr.msra.gmra.mxu0 %vm340_vm0, %v1728_v16 }
 0xaca   :  { %1768 = vmatpush.bf16.xpose.msra.mxu1 %v1759_v17 }
 0xace   :  { %v1881_v40 = vpop.permute.xlu1 %1880 }
 0xacf   :  { %v1882_v50 = vrot.slane %v1881_v40, 4 }
 0xad1   :  { %v1889_v56 = vsel %vm340_vm0, %v1882_v50, 0 }
 0xad3   :  { %v1601_v19 = vpop.f32.mrf.mxu0 }
 0xad4   :  { %v1626_v20 = vmul.f32 0.17677669, %v1601_v19 }
 0xad6   :  { %v1628_v21 = vsel %vm383_vm2, %v1626_v20, -inf  ;;  %v1884_v59 = vpop.permute.xlu1 %1883 }
 0xad7   :  { %1629 = vmax.xlane.f32.xlu2 %v1628_v21 }
 0xadb   :  { %v1603_v22 = vpop.f32.mrf.mxu0 }
 0xae3   :  { %v1622_v23 = vpop.f32.mrf.mxu0 }
 0xae4   :  { %v1627_v60 = vmul.f32 0.17677669, %v1622_v23  ;;  %v3415_v23 = vld [vmem:[%s4224_s3 + $0x48] sm:$0xff] }
 0xae5   :  { %1712 = vmatpush.bf16.msra.mxu3 %v3415_v23 }
 0xae6   :  { %v1631_v48 = vsel %vm383_vm2, %v1627_v60, -inf }
 0xae7   :  { %1632 = vmax.xlane.f32.xlu0 %v1631_v48  ;;  %v1825_v48 = vunpack.c.l.b16 %v4019_v8 }
 0xaeb   :  { %v1624_v24 = vpop.f32.mrf.mxu0 }
 0xb46   :  { %v1744_v25 = vpop.f32.mrf.mxu0 }
 0xb47   :  { %v1774_v28 = vmul.f32 0.17677669, %v1744_v25  ;;  %v4073_v25 = vpack.c.b16 %v1825_v48, %v1825_v48  ;;  %v3419_v48 = vld [vmem:[%s4224_s3 + $0x68] sm:$0xff] }
 0xb49   :  { %v1776_v3 = vsel %vm383_vm2, %v1774_v28, -inf }
 0xb4a   :  { %v1630_v26 = vpop.xlane.xlu2 %1629  ;;  %1777 = vmax.xlane.f32.xlu1 %v1776_v3 }
 0xb4b   :  { %v1634_v29 = vsub.f32 %v1626_v20, %v1630_v26 }
 0xb4d   :  { %v1636_v31 = vmul.f32 1.442695, %v1634_v29 }
 0xb4e   :  { %v1746_v30 = vpop.f32.mrf.mxu0 }
 0xb4f   :  { %3531 = vpow2.f32 %v1636_v31 }
 0xb55   :  { %v3532_v32 = vpop.eup %3531 }
 0xb56   :  { %v1640_v33 = vsel %vm383_vm2, %v3532_v32, 0.0 }
 0xb57   :  { %1641 = vadd.xlane.f32.xlu2 %v1640_v33 }
 0xb5a   :  { %v1633_v36 = vpop.xlane.xlu0 %1632 }
 0xb5b   :  { %v1635_v37 = vsub.f32 %v1627_v60, %v1633_v36 }
 0xb5d   :  { %v1638_v54 = vmul.f32 1.442695, %v1635_v37 }
 0xb5f   :  { %3533 = vpow2.f32 %v1638_v54 }
 0xb63   :  { %1904 = vrot.lane.b32.xlu1 %v4017_v7, %s3682_s23 }
 0xb65   :  { %v3534_v38 = vpop.eup %3533 }
 0xb66   :  { %v1643_v39 = vsel %vm383_vm2, %v3534_v38, 0.0 }
 0xb6f   :  { %1753 = vrot.lane.b32.xlu2 %v4045_v35, %s3684_s26 }
 0xb98   :  { %1644 = vadd.xlane.f32.xlu2 %v1643_v39 }
 0xbb0   :  { %1907 = vrot.lane.b32.xlu2 %v4045_v35, %s3682_s23 }
 0xbbd   :  { %v1778_v5 = vpop.xlane.xlu1 %1777 }
 0xbbe   :  { %v1782_v43 = vsub.f32 %v1774_v28, %v1778_v5  ;;  %v3414_v28 = vld [vmem:[%s4224_s3 + $0x40] sm:$0xff] }
 0xbbf   :  { %1713 = vmatpush.bf16.msra.mxu3 %v3414_v28  ;;  %v3418_v28 = vld [vmem:[%s4224_s3 + $0x60] sm:$0xff] }
 0xbc0   :  { %v1784_v44 = vmul.f32 1.442695, %v1782_v43 }
 0xbc2   :  { %3535 = vpow2.f32 %v1784_v44 }
 0xbc8   :  { %v3536_v45 = vpop.eup %3535 }
 0xbc9   :  { %v1788_v46 = vsel %vm383_vm2, %v3536_v45, 0.0 }
 0xbca   :  { %v1642_v47 = vpop.xlane.xlu2 %1641  ;;  %1789 = vadd.xlane.f32.xlu0 %v1788_v46 }
 0xbcb   :  { %3537 = vrcp.f32 %v1642_v47 }
 0xbd1   :  { %v3538_v49 = vpop.eup %3537 }
 0xbd2   :  { %v1648_v51 = vmul.f32 %v3538_v49, %v3532_v32  ;;  %v1754_v61 = vpop.permute.xlu2 %1753 }
 0xbd4   :  { %v1650_v52 = vpack.c.bf16 %v1648_v51, %v1648_v51 }
 0xbd5   :  { %v1905_v55 = vpop.permute.xlu1 %1904 }
 0xbd6   :  { %3110 = vmatmul.msk.bf16.vlgmr.msrb.gmra.mxu1 %vm383_vm2, %v1650_v52  ;;  %v1906_v9 = vrot.slane %v1905_v55, 4  ;;  %v4105_v52 = vld [vmem:[%s4225_s4 + $0x1] ss:$0 sm:$0xff] }
 0xbd7   :  { %1898 = vmatpush.bf16.xpose.msrb.mxu1 %v1889_v56  ;;  %v1582_v56 = vadd.f32 %v4105_v52, %v3993_v41 }
 0xbd8   :  { %v1913_v12 = vsel %vm340_vm0, %v1906_v9, 0 }
 0xbde   :  { %1803 = vrot.lane.b32.xlu0 %v4056_v63, %s3684_s26 }
 0xbe6   :  { %3122 = vmatmul.msk.bf16.vlgmr.msra.gmra.mxu1 %vm340_vm0, %v1754_v61 }
 0xbe7   :  { %2018 = vmatpush.bf16.msra.mxu1 %v3419_v48 }
 0xbeb   :  { %2019 = vmatpush.bf16.msra.mxu1 %v3418_v28 }
 0xbf6   :  { %3134 = vmatmul.msk.bf16.vlgmr.msrb.gmra.mxu1 %vm340_vm0, %v1884_v59 }
 0xc0b   :  { %v1645_v62 = vpop.xlane.xlu2 %1644 }
 0xc0c   :  { %3539 = vrcp.f32 %v1645_v62  ;;  %v3417_v62 = vld [vmem:[%s4224_s3 + $0x58] sm:$0xff] }
 0xc0d   :  { %1870 = vmatpush.bf16.msrb.mxu0 %v3417_v62 }
 0xc12   :  { %v3540_v2 = vpop.eup %3539 }
 0xc13   :  { %v1649_v18 = vmul.f32 %v3540_v2, %v3534_v38  ;;  %v1908_v17 = vpop.permute.xlu2 %1907  ;;  %v3416_v2 = vld [vmem:[%s4224_s3 + $0x50] sm:$0xff] }
 0xc14   :  { %1871 = vmatpush.bf16.msrb.mxu0 %v3416_v2 }
 0xc15   :  { %v1651_v4 = vpack.c.bf16 %v1649_v18, %v1649_v18 }
 0xc17   :  { %3111 = vmatmul.msk.bf16.vlgmr.msrb.gmra.mxu2 %vm383_vm2, %v1651_v4 }
 0xc3d   :  { %v1790_v27 = vpop.xlane.xlu0 %1789 }
 0xc3e   :  { %3541 = vrcp.f32 %v1790_v27 }
 0xc44   :  { %v3542_v6 = vpop.eup %3541 }
 0xc45   :  { %v1796_v10 = vmul.f32 %v3542_v6, %v3536_v45 }
 0xc47   :  { %v1798_v13 = vpack.c.bf16 %v1796_v10, %v1796_v10 }
 0xc50   :  { %v1804_v11 = vpop.permute.xlu0 %1803 }
 0xc51   :  { %v1809_v1 = vsel %vm411_vm1, %v1804_v11, 0 }
 0xc52   :  { %1818 = vmatpush.bf16.msra.mxu2 %v1809_v1 }
 0xc53   :  { %v1667_v14 = vpop.f32.mrf.mxu1 }
 0xc55   :  { %3123 = vmatmul.msk.bf16.vlgmr.msra.gmra.mxu2 %vm383_vm2, %v1798_v13 }
 0xc56   :  { %1922 = vmatpush.bf16.xpose.msrb.mxu2 %v1913_v12 }
 0xc5b   :  { %v1669_v15 = vpop.f32.mrf.mxu1 }
 0xc63   :  { %v1770_v16 = vpop.f32.mrf.mxu1 }
 0xc64   :  { %v1775_v19 = vmul.f32 0.17677669, %v1770_v16 }
 0xc65   :  { %3135 = vmatmul.msk.bf16.vlgmr.msrb.gmra.mxu2 %vm340_vm0, %v1908_v17 }
 0xc66   :  { %v1779_v20 = vsel %vm383_vm2, %v1775_v19, -inf }
 0xc67   :  { %1780 = vmax.xlane.f32.xlu0 %v1779_v20 }
 0xc6b   :  { %v1772_v21 = vpop.f32.mrf.mxu1 }
 0xc73   :  { %v1900_v22 = vpop.f32.mrf.mxu1 }
 0xc74   :  { %v1928_v60 = vmul.f32 0.17677669, %v1900_v22 }
 0xc76   :  { %v1930_v24 = vsel %vm383_vm2, %v1928_v60, -inf }
 0xc77   :  { %1931 = vmax.xlane.f32.xlu1 %v1930_v24 }
 0xc7b   :  { %v1902_v3 = vpop.f32.mrf.mxu1  ;;  %1827 = vrot.lane.b32.xlu0 %v4073_v25, %s3684_s26 }
 0xc83   :  { %2028 = vrot.lane.b32.xlu0 %v4002_v53, %s3685_s16 }
 0xc8b   :  { %2031 = vrot.lane.b32.xlu0 %v4013_v0, %s3685_s16 }
 0xc90   :  { %1954 = vrot.lane.b32.xlu1 %v4056_v63, %s3682_s23 }
 0xc93   :  { %2055 = vrot.lane.b32.xlu0 %v4045_v35, %s3685_s16 }
 0xc9a   :  { %v1686_v8 = vpop.f32.mrf.mxu2 }
 0xc9b   :  { %v1690_v26 = vpack.c.bf16 %v1686_v8, %v1667_v14 }
 0xc9d   :  { %3120 = vmatmul.msk.bf16.vlgmr.msra.gmra.mxu3 %vm340_vm0, %v1690_v26 }
 0xca2   :  { %v1688_v29 = vpop.f32.mrf.mxu2 }
 0xcd8   :  { %v4089_v31 = vpop.f32.mrf.mxu2 }
 0xcda   :  { %v1781_v30 = vpop.xlane.xlu0 %1780 }
 0xcdb   :  { %v1783_v32 = vsub.f32 %v1775_v19, %v1781_v30 }
 0xcdd   :  { %v1786_v33 = vmul.f32 1.442695, %v1783_v32 }
 0xcdf   :  { %3543 = vpow2.f32 %v1786_v33 }
 0xce0   :  { %v1822_v53 = vpop.f32.mrf.mxu2 }
 0xce5   :  { %v3544_v34 = vpop.eup %3543 }
 0xce6   :  { %v1791_v0 = vsel %vm383_vm2, %v3544_v34, 0.0 }
 0xce7   :  { %1792 = vadd.xlane.f32.xlu2 %v1791_v0 }
 0xce8   :  { %v1924_v36 = vpop.f32.mrf.mxu2 }
 0xce9   :  { %v1929_v37 = vmul.f32 0.17677669, %v1924_v36 }
 0xcea   :  { %v1932_v54 = vpop.xlane.xlu1 %1931 }
 0xceb   :  { %v1936_v35 = vsub.f32 %v1928_v60, %v1932_v54  ;;  %v1933_v38 = vsel %vm383_vm2, %v1929_v37, -inf }
 0xcec   :  { %1934 = vmax.xlane.f32.xlu1 %v1933_v38 }
 0xced   :  { %v1938_v39 = vmul.f32 1.442695, %v1936_v35  ;;  %v1828_v40 = vpop.permute.xlu0 %1827 }
 0xcee   :  { %v1833_v59 = vsel %vm411_vm1, %v1828_v40, 0 }
 0xcef   :  { %3545 = vpow2.f32 %v1938_v39  ;;  %1842 = vmatpush.bf16.msrb.mxu3 %v1833_v59 }
 0xcf0   :  { %v1926_v5 = vpop.f32.mrf.mxu2 }
 0xcf5   :  { %v3546_v43 = vpop.eup %3545  ;;  %v2029_v44 = vpop.permute.xlu0 %2028 }
 0xcf6   :  { %v2030_v45 = vrot.slane %v2029_v44, 4  ;;  %v1942_v46 = vsel %vm383_vm2, %v3546_v43, 0.0  ;;  %v1583_v44 = vadd.f32 %v4105_v52, %v3995_v42 }
 0xcf7   :  { %1943 = vadd.xlane.f32.xlu2 %v1942_v46 }
 0xcf8   :  { %v2037_v47 = vsel %vm340_vm0, %v2030_v45, 0 }
 0xcf9   :  { %2046 = vmatpush.bf16.xpose.msra.mxu2 %v2037_v47 }
 0xcfd   :  { %v2032_v49 = vpop.permute.xlu0 %2031 }
 0xd00   :  { %3147 = vmatmul.msk.bf16.vlgmr.msra.gmra.mxu2 %vm340_vm0, %v2032_v49 }
 0xd02   :  { %v1955_v50 = vpop.permute.xlu1 %1954 }
 0xd03   :  { %v1960_v51 = vsel %vm411_vm1, %v1955_v50, 0 }
 0xd04   :  { %1969 = vmatpush.bf16.msra.mxu3 %v1960_v51 }
 0xd05   :  { %v2056_v22 = vpop.permute.xlu0 %2055 }
 0xd0f   :  { %2052 = vrot.lane.b32.xlu2 %v4017_v7, %s3685_s16 }
 0xd17   :  { %1975 = vrot.lane.b32.xlu2 %v4073_v25, %s3682_s23 }
 0xd20   :  { %v1715_v57 = vpop.f32.mrf.mxu3 }
 0xd21   :  { %v4109_v61 = vadd.f32 %v1715_v57, %v1582_v56 }
 0xd28   :  { %v1717_v24 = vpop.f32.mrf.mxu3 }
 0xd29   :  { %v1721_v45 = vadd.f32 %v1717_v24, %v1583_v44  ;;  %v3197_v44 = vld [vmem:[#allocation5 + $0xc0] sm:$0xf] }
 0xd5a   :  { %v1793_v7 = vpop.xlane.xlu2 %1792 }
 0xd5b   :  { %3547 = vrcp.f32 %v1793_v7 }
 0xd5f   :  { %v1935_v18 = vpop.xlane.xlu1 %1934 }
 0xd60   :  { %v1937_v4 = vsub.f32 %v1929_v37, %v1935_v18 }
 0xd61   :  { %v3548_v27 = vpop.eup %3547 }
 0xd62   :  { %v1797_v55 = vmul.f32 %v3548_v27, %v3544_v34  ;;  %v1940_v41 = vmul.f32 1.442695, %v1937_v4  ;;  %v3421_v27 = vld [vmem:[%s4224_s3 + $0x78] sm:$0xff] }
 0xd63   :  { %2166 = vmatpush.bf16.msrb.mxu2 %v3421_v27  ;;  %v3173_v27 = vld [vmem:[#allocation5 + $0x90] sm:$0xf] }
 0xd64   :  { %v1799_v6 = vpack.c.bf16 %v1797_v55, %v1797_v55  ;;  %3549 = vpow2.f32 %v1940_v41 }
 0xd66   :  { %3124 = vmatmul.msk.bf16.vlgmr.msrb.gmra.mxu3 %vm383_vm2, %v1799_v6 }
 0xd6a   :  { %v3550_v9 = vpop.eup %3549  ;;  %v1944_v10 = vpop.xlane.xlu2 %1943 }
 0xd6b   :  { %3551 = vrcp.f32 %v1944_v10  ;;  %v1945_v11 = vsel %vm383_vm2, %v3550_v9, 0.0 }
 0xd6c   :  { %1946 = vadd.xlane.f32.xlu0 %v1945_v11 }
 0xd71   :  { %v3552_v1 = vpop.eup %3551 }
 0xd72   :  { %v1950_v12 = vmul.f32 %v3552_v1, %v3546_v43  ;;  %v2053_v13 = vpop.permute.xlu2 %2052 }
 0xd73   :  { %v2054_v14 = vrot.slane %v2053_v13, 4  ;;  %v3420_v13 = vld [vmem:[%s4224_s3 + $0x70] sm:$0xff] }
 0xd74   :  { %v1952_v15 = vpack.c.bf16 %v1950_v12, %v1950_v12  ;;  %2167 = vmatpush.bf16.msrb.mxu2 %v3420_v13  ;;  %v3423_v13 = vld [vmem:[#allocation5 + $0x84] sm:$0xf0] }
 0xd75   :  { %v2061_v16 = vsel %vm340_vm0, %v2054_v14, 0 }
 0xd76   :  { %3136 = vmatmul.msk.bf16.vlgmr.msra.gmra.mxu3 %vm383_vm2, %v1952_v15 }
 0xd77   :  { %2070 = vmatpush.bf16.xpose.msrb.mxu3 %v2061_v16 }
 0xd7a   :  { %v1976_v17 = vpop.permute.xlu2 %1975 }
 0xd7b   :  { %v1981_v19 = vsel %vm411_vm1, %v1976_v17, 0 }
 0xd7c   :  { %1990 = vmatpush.bf16.msra.mxu0 %v1981_v19 }
 0xd83   :  { %v2048_v20 = vpop.f32.mrf.mxu2 }
 0xd84   :  { %v2076_v21 = vmul.f32 0.17677669, %v2048_v20 }
 0xd86   :  { %3148 = vmatmul.msk.bf16.vlgmr.msrb.gmra.mxu3 %vm340_vm0, %v2056_v22  ;;  %v2078_v23 = vsel %vm383_vm2, %v2076_v21, -inf }
 0xd87   :  { %2079 = vmax.xlane.f32.xlu2 %v2078_v23 }
 0xd8b   :  { %v2050_v60 = vpop.f32.mrf.mxu2 }
 0xd9f   :  { %2123 = vrot.lane.b32.xlu2 %v4073_v25, %s3685_s16 }
 0xddf   :  { %v1947_v8 = vpop.xlane.xlu0 %1946 }
 0xde0   :  { %3553 = vrcp.f32 %v1947_v8 }
 0xde6   :  { %v3554_v25 = vpop.eup %3553 }
 0xde7   :  { %v1951_v30 = vmul.f32 %v3554_v25, %v3550_v9  ;;  %v3221_v25 = vld [vmem:[#allocation5 + $0xf0] sm:$0xf] }
 0xde9   :  { %v1844_v3 = vpop.f32.mrf.mxu3  ;;  %v1953_v33 = vpack.c.bf16 %v1951_v30, %v1951_v30  ;;  %v3437_v30 = vld [vmem:[#allocation5 + $0xf4] sm:$0xf0] }
 0xdea   :  { %v1848_v26 = vpack.c.bf16 %v1844_v3, %v4089_v31 }
 0xdec   :  { %3133 = vmatmul.msk.bf16.vlgmr.msrb.gmra.mxu0 %vm340_vm0, %v1848_v26 }
 0xdf1   :  { %v1846_v29 = vpop.f32.mrf.mxu3 }
 0xdf9   :  { %v1971_v32 = vpop.f32.mrf.mxu3 }
 0xdfa   :  { %v2080_v53 = vpop.xlane.xlu2 %2079 }
 0xdfb   :  { %v2084_v34 = vsub.f32 %v2076_v21, %v2080_v53  ;;  %v3223_v53 = vld [vmem:[#allocation5 + $0xf8] sm:$0xf0] }
 0xdfc   :  { %3137 = vmatmul.msk.bf16.vlgmr.msra.gmra.mxu0 %vm383_vm2, %v1953_v33  ;;  %v3222_v33 = vor.u32 %v3437_v30, %v3221_v25  ;;  %v3443_v25 = vld [vmem:[#allocation7 + $0xa8] sm:$0xff] }
 0xdfd   :  { %v2086_v0 = vmul.f32 1.442695, %v2084_v34 }
 0xdfe   :  { %2335 = vmatpush.bf16.msra.mxu3 %v3222_v33  ;;  %v3450_v33 = vld [vmem:[#allocation7 + $0xe0] sm:$0xff] }
 0xdff   :  { %3555 = vpow2.f32 %v2086_v0  ;;  %v3213_v0 = vld [vmem:[#allocation5 + $0xe0] sm:$0xf] }
 0xe01   :  { %v1973_v36 = vpop.f32.mrf.mxu3 }
 0xe02   :  { %v2124_v37 = vpop.permute.xlu2 %2123  ;;  %v3435_v36 = vld [vmem:[#allocation5 + $0xe4] sm:$0xf0] }
 0xe03   :  { %v2129_v54 = vsel %vm411_vm1, %v2124_v37, 0  ;;  %v3434_v37 = vld [vmem:[#allocation5 + $0xe4] sm:$0xf] }
 0xe04   :  { %2138 = vmatpush.bf16.msrb.mxu1 %v2129_v54  ;;  %v3214_v54 = vor.u32 %v3435_v36, %v3213_v0 }
 0xe05   :  { %v3556_v31 = vpop.eup %3555 }
 0xe06   :  { %v2090_v35 = vsel %vm383_vm2, %v3556_v31, 0.0  ;;  %2336 = vmatpush.bf16.msra.mxu3 %v3214_v54 }
 0xe07   :  { %2091 = vadd.xlane.f32.xlu0 %v2090_v35 }
 0xe09   :  { %v2072_v38 = vpop.f32.mrf.mxu3 }
 0xe0a   :  { %v2077_v39 = vmul.f32 0.17677669, %v2072_v38  ;;  %v3205_v38 = vld [vmem:[#allocation5 + $0xd0] sm:$0xf] }
 0xe0c   :  { %v2081_v40 = vsel %vm383_vm2, %v2077_v39, -inf }
 0xe0d   :  { %2082 = vmax.xlane.f32.xlu1 %v2081_v40  ;;  %v3432_v40 = vld [vmem:[#allocation5 + $0xd4] sm:$0xf] }
 0xe11   :  { %v2074_v59 = vpop.f32.mrf.mxu3 }
 0xe1b   :  { %2102 = vrot.lane.b32.xlu0 %v4056_v63, %s3685_s16 }
 0xe69   :  { %v1873_v5 = vpop.f32.mrf.mxu0 }
 0xe6a   :  { %v1878_v43 = vadd.f32 %v1873_v5, %v4109_v61  ;;  %v3207_v5 = vld [vmem:[#allocation5 + $0xd8] sm:$0xf0] }
 0xe71   :  { %v1875_v46 = vpop.f32.mrf.mxu0 }
 0xe72   :  { %v1879_v47 = vadd.f32 %v1875_v46, %v1721_v45  ;;  %v3431_v45 = vld [vmem:[#allocation5 + $0xc4] sm:$0xf0]  ;;  %v3430_v46 = vld [vmem:[#allocation5 + $0xc4] sm:$0xf] }
 0xe79   :  { %v1992_v49 = vpop.f32.mrf.mxu0 }
 0xe7a   :  { %v1996_v50 = vpack.c.bf16 %v1992_v49, %v1971_v32  ;;  %v2092_v51 = vpop.xlane.xlu0 %2091  ;;  %v3436_v32 = vld [vmem:[#allocation5 + $0xf4] sm:$0xf]  ;;  %v3199_v49 = vld [vmem:[#allocation5 + $0xc8] sm:$0xf0] }
 0xe7b   :  { %3557 = vrcp.f32 %v2092_v51  ;;  %v3226_v34 = vor.u32 %v3436_v32, %v3223_v53  ;;  %v3189_v51 = vld [vmem:[#allocation5 + $0xb0] sm:$0xf] }
 0xe7c   :  { %3146 = vmatmul.msk.bf16.vlgmr.msra.gmra.mxu1 %vm340_vm0, %v1996_v50  ;;  %v3202_v50 = vor.u32 %v3430_v46, %v3199_v49 }
 0xe80   :  { %v2083_v56 = vpop.xlane.xlu1 %2082 }
 0xe81   :  { %v2085_v57 = vsub.f32 %v2077_v39, %v2083_v56  ;;  %v1994_v62 = vpop.f32.mrf.mxu0  ;;  %v3558_v63 = vpop.eup %3557  ;;  %v3433_v39 = vld [vmem:[#allocation5 + $0xd4] sm:$0xf0] }
 0xe82   :  { %v2098_v61 = vmul.f32 %v3558_v63, %v3556_v31  ;;  %v3215_v31 = vld [vmem:[#allocation5 + $0xe8] sm:$0xf0]  ;;  %v3206_v59 = vor.u32 %v3433_v39, %v3205_v38  ;;  %v3429_v56 = vld [vmem:[#allocation5 + $0xb4] sm:$0xf0]  ;;  %v3483_v38 = vld [vmem:[%s4226_s5 + $0x1] ss:$0 sm:$0xff] }
 0xe83   :  { %v2088_v7 = vmul.f32 1.442695, %v2085_v57  ;;  %v3218_v35 = vor.u32 %v3434_v37, %v3215_v31  ;;  %v3428_v57 = vld [vmem:[#allocation5 + $0xb4] sm:$0xf]  ;;  %v3190_v62 = vor.u32 %v3429_v56, %v3189_v51  ;;  %v3441_v56 = vld [vmem:[#allocation7 + $0x98] sm:$0xff] }
 0xe84   :  { %v2100_v4 = vpack.c.bf16 %v2098_v61, %v2098_v61  ;;  %2337 = vmatpush.bf16.msra.mxu3 %v3206_v59  ;;  %v3427_v61 = vld [vmem:[#allocation5 + $0xa4] sm:$0xf0]  ;;  %v3448_v51 = vld [vmem:[#allocation7 + $0xd0] sm:$0xff] }
 0xe85   :  { %3559 = vpow2.f32 %v2088_v7  ;;  %v3191_v7 = vld [vmem:[#allocation5 + $0xb8] sm:$0xf0] }
 0xe86   :  { %v3194_v63 = vor.u32 %v3428_v57, %v3191_v7  ;;  %v3447_v57 = vld [vmem:[#allocation7 + $0xc8] sm:$0xff]  ;;  %v3446_v7 = vld [vmem:[#allocation7 + $0xc0] sm:$0xff] }
 0xe8b   :  { %v3560_v2 = vpop.eup %3559 }
 0xe8c   :  { %v2093_v18 = vsel %vm383_vm2, %v3560_v2, 0.0 }
 0xe8d   :  { %v2103_v42 = vpop.permute.xlu0 %2102  ;;  %2094 = vadd.xlane.f32.xlu1 %v2093_v18  ;;  %v3426_v18 = vld [vmem:[#allocation5 + $0xa4] sm:$0xf] }
 0xe8e   :  { %v2108_v52 = vsel %vm411_vm1, %v2103_v42, 0 }
 0xe8f   :  { %2117 = vmatpush.bf16.msrb.mxu0 %v2108_v52  ;;  %v3183_v52 = vld [vmem:[#allocation5 + $0xa8] sm:$0xf0] }
 0xe92   :  { %3149 = vmatmul.msk.bf16.vlgmr.msrb.gmra.mxu0 %vm383_vm2, %v2100_v4  ;;  %v3186_v4 = vor.u32 %v3426_v18, %v3183_v52 }
 0xe93   :  { %2349 = vmatpush.bf16.msra.mxu0 %v3226_v34 }
 0xe97   :  { %2350 = vmatpush.bf16.msra.mxu0 %v3218_v35 }
 0xef9   :  { %v2021_v55 = vpop.f32.mrf.mxu1 }
 0xefa   :  { %v2026_v41 = vadd.f32 %v2021_v55, %v1878_v43  ;;  %v3210_v43 = vor.u32 %v3432_v40, %v3207_v5  ;;  %v3425_v55 = vld [vmem:[#allocation5 + $0x94] sm:$0xf0]  ;;  %v3484_v5 = vld [vmem:[%s4227_s6 + $0x1] ss:$0 sm:$0xff]  ;;  %s2707_s6 = sshll.u32 %s4236_s15, 4  ;;  %s2708_s6 = int_to_ptr.hbm [resolvable:$true] %s2707_s6 }
 0xefc   :  { %2351 = vmatpush.bf16.msra.mxu0 %v3210_v43 }
 0xf00   :  { %v2095_v6 = vpop.xlane.xlu1 %2094  ;;  %2352 = vmatpush.bf16.msra.mxu0 %v3202_v50  ;;  %v3449_v50 = vld [vmem:[#allocation7 + $0xd8] sm:$0xff] }
 0xf01   :  { %3561 = vrcp.f32 %v2095_v6  ;;  %v2023_v14 = vpop.f32.mrf.mxu1  ;;  %v3174_v6 = vor.u32 %v3425_v55, %v3173_v27 }
 0xf02   :  { %v2027_v21 = vadd.f32 %v2023_v14, %v1879_v47  ;;  %v3198_v47 = vor.u32 %v3431_v45, %v3197_v44  ;;  %v3422_v14 = vld [vmem:[#allocation5 + $0x84] sm:$0xf] }
 0xf04   :  { %2338 = vmatpush.bf16.msra.mxu3 %v3198_v47  ;;  %2353 = vmatpush.bf16.msra.mxu0 %v3194_v63  ;;  %v3438_v63 = vld [vmem:[#allocation7 + $0x80] sm:$0xff] }
 0xf07   :  { %v3562_v9 = vpop.eup %3561 }
 0xf08   :  { %v2099_v10 = vmul.f32 %v3562_v9, %v3560_v2  ;;  %2339 = vmatpush.bf16.msra.mxu3 %v3190_v62  ;;  %v3181_v2 = vld [vmem:[#allocation5 + $0xa0] sm:$0xf]  ;;  %2354 = vmatpush.bf16.msra.mxu0 %v3186_v4  ;;  %v3175_v9 = vld [vmem:[#allocation5 + $0x98] sm:$0xf0]  ;;  %v3440_v62 = vld [vmem:[#allocation7 + $0x90] sm:$0xff] }
 0xf09   :  { %v3182_v42 = vor.u32 %v3427_v61, %v3181_v2  ;;  %v3162_v2 = vld [vmem:[%s4229_s8 + $0x2] sm:$0x3] }
 0xf0a   :  { %v2101_v11 = vpack.c.bf16 %v2099_v10, %v2099_v10  ;;  %v2252_v18 = vperm.slane %v3162_v2, 1  ;;  %v2251_v27 = vperm.slane %v3162_v2, 0 }
 0xf0c   :  { %3150 = vmatmul.msk.bf16.vlgmr.msrb.gmra.mxu1 %vm383_vm2, %v2101_v11  ;;  %2340 = vmatpush.bf16.msra.mxu3 %v3182_v42 }
 0xf0f   :  { %v2119_v1 = vpop.f32.mrf.mxu0 }
 0xf10   :  { %2341 = vmatpush.bf16.msra.mxu3 %v3174_v6 }
 0xf17   :  { %v2121_v12 = vpop.f32.mrf.mxu0 }
 0xf18   :  { %v3165_v12 = vld [vmem:[#allocation5 + $0x80] sm:$0xf] }
 0xf89   :  { %v2140_v15 = vpop.f32.mrf.mxu1 }
 0xf8a   :  { %v2144_v16 = vpack.c.bf16 %v2140_v15, %v2119_v1 }
 0xf8c   :  { %3159 = vmatmul.msk.bf16.vlgmr.msrb.gmra.mxu2 %vm340_vm0, %v2144_v16  ;;  %v3166_v16 = vor.u32 %v3423_v13, %v3165_v12 }
 0xf8e   :  { %2342 = vmatpush.bf16.msra.mxu3 %v3166_v16 }
 0xf91   :  { %v2142_v17 = vpop.f32.mrf.mxu1 }
 0xf92   :  { %v3167_v17 = vld [vmem:[#allocation5 + $0x88] sm:$0xf0] }
0x100f   :  { %v2169_v19 = vpop.f32.mrf.mxu2 }
0x1010   :  { %v2174_v20 = vadd.f32 %v2169_v19, %v2026_v41  ;;  %v3424_v41 = vld [vmem:[#allocation5 + $0x94] sm:$0xf]  ;;  %v3170_v19 = vor.u32 %v3422_v14, %v3167_v17 }
0x1011   :  { %v3178_v11 = vor.u32 %v3424_v41, %v3175_v9 }
0x1012   :  { %2180 = vadd.xlane.f32.xlu1 %v2174_v20 }
0x1013   :  { %2355 = vmatpush.bf16.msra.mxu0 %v3178_v11 }
0x1017   :  { %v2171_v22 = vpop.f32.mrf.mxu2  ;;  %2356 = vmatpush.bf16.msra.mxu0 %v3170_v19 }
0x1018   :  { %v2175_v23 = vadd.f32 %v2171_v22, %v2027_v21  ;;  %v3445_v21 = vld [vmem:[#allocation7 + $0xb8] sm:$0xff] }
0x1019   :  { %2503 = vmatpush.bf16.msra.mxu1 %v3445_v21 }
0x101a   :  { %2182 = vadd.xlane.f32.xlu1 %v2175_v23 }
0x1085   :  { %v2181_v60 = vpop.xlane.xlu1 %2180 }
0x1086   :  { %v2184_v48 = vmul.f32 %v2181_v60, %v3945_v58  ;;  %v3452_v60 = vld [vmem:[#allocation7 + $0xf0] sm:$0xff] }
0x1088   :  { %v4156_v24 = vsub.f32 %v2174_v20, %v2184_v48  ;;  %v3453_v20 = vld [vmem:[#allocation7 + $0xf8] sm:$0xff]  ;;  %v3444_v48 = vld [vmem:[#allocation7 + $0xb0] sm:$0xff] }
0x1089   :  { %2517 = vmatpush.bf16.msra.mxu2 %v3453_v20  ;;  %2504 = vmatpush.bf16.msra.mxu1 %v3444_v48 }
0x108a   :  { %v2188_v28 = vmul.f32 %v4156_v24, %v4156_v24 }
0x108c   :  { %2190 = vadd.xlane.f32.xlu0 %v2188_v28 }
0x108d   :  { %v2183_v3 = vpop.xlane.xlu1 %2182  ;;  %2518 = vmatpush.bf16.msra.mxu2 %v3452_v60  ;;  %2505 = vmatpush.bf16.msra.mxu1 %v3443_v25 }
0x108e   :  { %v2185_v8 = vmul.f32 %v2183_v3, %v3945_v58 }
0x1090   :  { %v4161_v26 = vsub.f32 %v2175_v23, %v2185_v8 }
0x1092   :  { %v2189_v29 = vmul.f32 %v4161_v26, %v4161_v26 }
0x1094   :  { %2192 = vadd.xlane.f32.xlu1 %v2189_v29  ;;  %v3451_v29 = vld [vmem:[#allocation7 + $0xe8] sm:$0xff] }
0x1095   :  { %2519 = vmatpush.bf16.msra.mxu2 %v3451_v29 }
0x1099   :  { %2520 = vmatpush.bf16.msra.mxu2 %v3450_v33 }
0x109d   :  { %2521 = vmatpush.bf16.msra.mxu2 %v3449_v50 }
0x10a1   :  { %2522 = vmatpush.bf16.msra.mxu2 %v3448_v51 }
0x10a5   :  { %2523 = vmatpush.bf16.msra.mxu2 %v3447_v57  ;;  %v3486_v57 = vld [vmem:[%s4232_s11 + $0x1] ss:$0 sm:$0xff] }
0x10a9   :  { %2524 = vmatpush.bf16.msra.mxu2 %v3446_v7 }
0x10ff   :  { %v2191_v10 = vpop.xlane.xlu0 %2190 }
0x1100   :  { %v2194_v1 = vmul.f32 %v2191_v10, %v3945_v58 }
0x1102   :  { %v2196_v15 = vadd.f32 1e-05, %v2194_v1 }
0x1104   :  { %3563 = vrsqrt.f32 %v2196_v15  ;;  %vm2204_vm1 = vweird.f32 %v2196_v15 }
0x1107   :  { %v2193_v22 = vpop.xlane.xlu1 %2192 }
0x1108   :  { %v2195_v23 = vmul.f32 %v2193_v22, %v3945_v58 }
0x110a   :  { %v3564_v28 = vpop.eup %3563  ;;  %v2197_v3 = vadd.f32 1e-05, %v2195_v23 }
0x110b   :  { %v2199_v8 = vmul.f32 %v3564_v28, %v2196_v15  ;;  %vm2205_vm0 = vweird.f32 %v3564_v28  ;;  %v3485_v15 = vld [vmem:[%s4231_s10 + $0x1] ss:$0 sm:$0xff] }
0x110c   :  { %3565 = vrsqrt.f32 %v2197_v3  ;;  %vm2206_vm2 = vmor %vm2204_vm1, %vm2205_vm0  ;;  %vm2214_vm4 = vweird.f32 %v2197_v3 }
0x110d   :  { %v2200_v30 = vmul.f32 %v3564_v28, %v2199_v8 }
0x110f   :  { %v2201_v32 = vmul.f32 0.5, %v2200_v30 }
0x1111   :  { %v2202_v53 = vsub.f32 1.5, %v2201_v32 }
0x1112   :  { %v3566_v34 = vpop.eup %3565 }
0x1113   :  { %v2203_v0 = vmul.f32 %v3564_v28, %v2202_v53  ;;  %v2209_v36 = vmul.f32 %v3566_v34, %v2197_v3  ;;  %vm2215_vm3 = vweird.f32 %v3566_v34 }
0x1114   :  { %vm2216_vm5 = vmor %vm2214_vm4, %vm2215_vm3 }
0x1115   :  { %v2210_v37 = vmul.f32 %v3566_v34, %v2209_v36  ;;  %v2207_v54 = vsel %vm2206_vm2, %v3564_v28, %v2203_v0  ;;  %v3460_v0 = vld [vmem:[%s4234_s13 + $0x30] sm:$0xff] }
0x1116   :  { %v2218_v39 = vmul.f32 %v2207_v54, %v4156_v24  ;;  %v3442_v24 = vld [vmem:[#allocation7 + $0xa0] sm:$0xff]  ;;  %v3459_v54 = vld [vmem:[%s4234_s13 + $0x28] sm:$0xff] }
0x1117   :  { %v2211_v31 = vmul.f32 0.5, %v2210_v37  ;;  %2506 = vmatpush.bf16.msra.mxu1 %v3442_v24 }
0x1118   :  { %v2223_v43 = vmul.f32 %v3483_v38, %v2218_v39 }
0x1119   :  { %v2212_v35 = vsub.f32 1.5, %v2211_v31 }
0x111a   :  { %v2228_v46 = vadd.f32 %v3484_v5, %v2223_v43 }
0x111b   :  { %v2213_v40 = vmul.f32 %v3566_v34, %v2212_v35  ;;  %2507 = vmatpush.bf16.msra.mxu1 %v3441_v56  ;;  %v3458_v35 = vld [vmem:[%s4234_s13 + $0x20] sm:$0xff] }
0x111c   :  { %v3454_v56 = vld [vmem:[%s4234_s13] sm:$0xff] }
0x111d   :  { %v2217_v59 = vsel %vm2216_vm5, %v3566_v34, %v2213_v40  ;;  %v3461_v34 = vld [vmem:[%s4234_s13 + $0x38] sm:$0xff] }
0x111e   :  { %v2219_v44 = vmul.f32 %v2217_v59, %v4161_v26  ;;  %v3439_v26 = vld [vmem:[#allocation7 + $0x88] sm:$0xff]  ;;  %2686 = vmatpush.bf16.msrb.mxu3 %v3461_v34  ;;  %v3457_v40 = vld [vmem:[%s4234_s13 + $0x18] sm:$0xff] }
0x111f   :  { %2508 = vmatpush.bf16.msra.mxu1 %v3440_v62 }
0x1120   :  { %v2224_v45 = vmul.f32 %v3483_v38, %v2219_v44  ;;  %v3456_v44 = vld [vmem:[%s4234_s13 + $0x10] sm:$0xff] }
0x1122   :  { %v2229_v47 = vadd.f32 %v3484_v5, %v2224_v45  ;;  %2687 = vmatpush.bf16.msrb.mxu3 %v3460_v0 }
0x1123   :  { %2509 = vmatpush.bf16.msra.mxu1 %v3439_v26 }
0x1124   :  { %v2230_v49 = vpack.c.bf16 %v2229_v47, %v2228_v46 }
0x1126   :  { %2343 = vmatmul.bf16.vlgmr.msra.gmra.mxu3 %v2230_v49  ;;  %2357 = vmatmul.bf16.vlgmr.msra.gmra.mxu0 %v2230_v49 }
0x1127   :  { %2510 = vmatpush.bf16.msra.mxu1 %v3438_v63  ;;  %2688 = vmatpush.bf16.msrb.mxu3 %v3459_v54  ;;  %v3487_v63 = vld [vmem:[%s4233_s12 + $0x1] ss:$0 sm:$0xff] }
0x112b   :  { %2689 = vmatpush.bf16.msrb.mxu3 %v3458_v35 }
0x112f   :  { %2690 = vmatpush.bf16.msrb.mxu3 %v3457_v40 }
0x1133   :  { %2691 = vmatpush.bf16.msrb.mxu3 %v3456_v44 }
0x11a3   :  { %v2358_v61 = vpop.f32.mrf.mxu0 }
0x11a4   :  { %v2359_v52 = vadd.f32 %v2358_v61, %v2252_v18 }
0x11a6   :  { %v2364_v41 = vmax.f32 %v2359_v52, 0.0 }
0x11a9   :  { %v2344_v42 = vpop.f32.mrf.mxu3 }
0x11aa   :  { %v2345_v9 = vadd.f32 %v2344_v42, %v2251_v27 }
0x11ab   :  { %v2360_v4 = vpop.f32.mrf.mxu0 }
0x11ac   :  { %v2361_v55 = vadd.f32 %v2360_v4, %v2252_v18  ;;  %v2363_v12 = vmax.f32 %v2345_v9, 0.0 }
0x11ae   :  { %v2366_v6 = vmax.f32 %v2361_v55, 0.0 }
0x11b0   :  { %v2368_v10 = vpack.c.bf16 %v2366_v6, %v2364_v41 }
0x11b1   :  { %v2346_v11 = vpop.f32.mrf.mxu3 }
0x11b2   :  { %v2347_v1 = vadd.f32 %v2346_v11, %v2251_v27  ;;  %2525 = vmatmul.bf16.vlgmr.msra.gmra.mxu2 %v2368_v10 }
0x11b4   :  { %v2365_v13 = vmax.f32 %v2347_v1, 0.0 }
0x11b6   :  { %v2367_v14 = vpack.c.bf16 %v2365_v13, %v2363_v12 }
0x11b8   :  { %2511 = vmatmul.bf16.vlgmr.msra.gmra.mxu1 %v2367_v14 }
0x1235   :  { %v2512_v16 = vpop.f32.mrf.mxu1  ;;  %v2526_v17 = vpop.f32.mrf.mxu2 }
0x1236   :  { %v2513_v19 = vadd.f32 %v3485_v15, %v2512_v16 }
0x1238   :  { %v2527_v20 = vadd.f32 %v2526_v17, %v2513_v19 }
0x123a   :  { %v2531_v21 = vadd.f32 %v2527_v20, %v2228_v46 }
0x123c   :  { %2537 = vadd.xlane.f32.xlu2 %v2531_v21 }
0x123d   :  { %v2514_v22 = vpop.f32.mrf.mxu1  ;;  %v2528_v60 = vpop.f32.mrf.mxu2 }
0x123e   :  { %v2515_v23 = vadd.f32 %v3485_v15, %v2514_v22 }
0x1240   :  { %v2529_v48 = vadd.f32 %v2528_v60, %v2515_v23 }
0x1242   :  { %v2532_v28 = vadd.f32 %v2529_v48, %v2229_v47  ;;  %v3687_v47 = vmov 8.0  }
0x1244   :  { %2539 = vadd.xlane.f32.xlu1 %v2532_v28 }
0x12af   :  { %v2538_v3 = vpop.xlane.xlu2 %2537 }
0x12b0   :  { %v2541_v8 = vmul.f32 %v2538_v3, %v3945_v58 }
0x12b2   :  { %v2543_v29 = vsub.f32 %v2531_v21, %v2541_v8 }
0x12b4   :  { %v2545_v25 = vmul.f32 %v2543_v29, %v2543_v29 }
0x12b6   :  { %2547 = vadd.xlane.f32.xlu1 %v2545_v25 }
0x12b7   :  { %v2540_v30 = vpop.xlane.xlu1 %2539 }
0x12b8   :  { %v2542_v32 = vmul.f32 %v2540_v30, %v3945_v58 }
0x12ba   :  { %v2544_v33 = vsub.f32 %v2532_v28, %v2542_v32 }
0x12bc   :  { %v2546_v53 = vmul.f32 %v2544_v33, %v2544_v33 }
0x12be   :  { %2549 = vadd.xlane.f32.xlu1 %v2546_v53  ;;  %v3488_v53 = vld [vmem:[%s4235_s14] ss:$0 sm:$0xff] }
0x1329   :  { %v2548_v36 = vpop.xlane.xlu1 %2547 }
0x132a   :  { %v2551_v37 = vmul.f32 %v2548_v36, %v3945_v58 }
0x132c   :  { %v2553_v31 = vadd.f32 1e-05, %v2551_v37 }
0x132e   :  { %3567 = vrsqrt.f32 %v2553_v31  ;;  %vm2561_vm7 = vweird.f32 %v2553_v31 }
0x1331   :  { %v2550_v38 = vpop.xlane.xlu1 %2549 }
0x1332   :  { %v2552_v39 = vmul.f32 %v2550_v38, %v3945_v58  ;;  %v3455_v58 = vld [vmem:[%s4234_s13 + $0x8] sm:$0xff]  ;;  %s3688_s13 = smov [#allocation8]  }
0x1333   :  { %2692 = vmatpush.bf16.msrb.mxu3 %v3455_v58  ;;  %s2705_s0 = sshll.u32 %s3688_s13, 4  ;;  %s2706_s0 = int_to_ptr.vmem [resolvable:$true] %s2705_s0 }
0x1334   :  { %v3568_v59 = vpop.eup %3567  ;;  %v2554_v5 = vadd.f32 1e-05, %v2552_v39 }
0x1335   :  { %v2556_v43 = vmul.f32 %v3568_v59, %v2553_v31  ;;  %vm2562_vm6 = vweird.f32 %v3568_v59 }
0x1336   :  { %3569 = vrsqrt.f32 %v2554_v5  ;;  %vm2563_vm8 = vmor %vm2561_vm7, %vm2562_vm6  ;;  %vm2571_vm10 = vweird.f32 %v2554_v5 }
0x1337   :  { %v2557_v45 = vmul.f32 %v3568_v59, %v2556_v43  ;;  %3571 = vrcp.f32 %v3687_v47  ;;  %2693 = vmatpush.bf16.msrb.mxu3 %v3454_v56 }
0x1339   :  { %v2558_v46 = vmul.f32 0.5, %v2557_v45 }
0x133b   :  { %v2559_v49 = vsub.f32 1.5, %v2558_v46 }
0x133c   :  { %v3570_v50 = vpop.eup %3569 }
0x133d   :  { %v2560_v24 = vmul.f32 %v3568_v59, %v2559_v49  ;;  %v2566_v51 = vmul.f32 %v3570_v50, %v2554_v5  ;;  %v3572_v26 = vpop.eup %3571  ;;  %vm2572_vm9 = vweird.f32 %v3570_v50 }
0x133e   :  { %v2600_v52 = vmul.f32 8.0, %v3572_v26  ;;  %vm2573_vm11 = vmor %vm2571_vm10, %vm2572_vm9  ;;  %vm2604_vm12 = vweird.f32 %v3572_v26 }
0x133f   :  { %v2564_v62 = vsel %vm2563_vm8, %v3568_v59, %v2560_v24  ;;  %v2567_v7 = vmul.f32 %v3570_v50, %v2566_v51 }
0x1340   :  { %v2575_v2 = vmul.f32 %v2564_v62, %v2543_v29  ;;  %v2601_v6 = vsub.f32 1.0, %v2600_v52 }
0x1341   :  { %v2568_v61 = vmul.f32 0.5, %v2567_v7 }
0x1342   :  { %v2580_v18 = vmul.f32 %v3486_v57, %v2575_v2  ;;  %v2602_v12 = vmul.f32 %v3572_v26, %v2601_v6 }
0x1343   :  { %v2569_v42 = vsub.f32 1.5, %v2568_v61 }
0x1344   :  { %v2585_v4 = vadd.f32 %v3487_v63, %v2580_v18  ;;  %v2603_v17 = vadd.f32 %v3572_v26, %v2602_v12 }
0x1345   :  { %v2570_v27 = vmul.f32 %v3570_v50, %v2569_v42 }
0x1346   :  { %v2587_v55 = vrot.slane %v2585_v4, 4  ;;  %v2605_v22 = vsel %vm2604_vm12, %v3572_v26, %v2603_v17 }
0x1347   :  { %v2574_v41 = vsel %vm2573_vm11, %v3570_v50, %v2570_v27 }
0x1348   :  { %v2588_v9 = vadd.f32 %v2587_v55, %v2585_v4  ;;  %v2576_v10 = vmul.f32 %v2574_v41, %v2544_v33 }
0x134a   :  { %v2589_v11 = vrot.slane %v2588_v9, 2  ;;  %v2581_v1 = vmul.f32 %v3486_v57, %v2576_v10 }
0x134c   :  { %v2590_v13 = vadd.f32 %v2589_v11, %v2588_v9  ;;  %v2586_v14 = vadd.f32 %v3487_v63, %v2581_v1 }
0x134e   :  { %v2591_v15 = vrot.slane %v2590_v13, 1  ;;  %v2593_v16 = vrot.slane %v2586_v14, 4 }
0x1350   :  { %v2594_v19 = vadd.f32 %v2593_v16, %v2586_v14  ;;  %v2592_v21 = vadd.f32 %v2591_v15, %v2590_v13 }
0x1352   :  { %v2595_v20 = vrot.slane %v2594_v19, 2  ;;  %v2606_v48 = vmul.f32 %v2605_v22, %v2592_v21 }
0x1354   :  { %v2596_v23 = vadd.f32 %v2595_v20, %v2594_v19  ;;  %v2608_v8 = vpack.c.bf16 %v2606_v48, %v2606_v48 }
0x1356   :  { %v2597_v60 = vrot.slane %v2596_v23, 1  ;;  %v2632_v25 = vunpack.c.l.b16 %v2608_v8 }
0x1358   :  { %v2598_v28 = vadd.f32 %v2597_v60, %v2596_v23 }
0x135a   :  { %v2607_v3 = vmul.f32 %v2605_v22, %v2598_v28 }
0x135c   :  { %v2609_v29 = vpack.c.bf16 %v2607_v3, %v2607_v3 }
0x135e   :  { %v2633_v30 = vunpack.c.l.b16 %v2609_v29 }
0x1360   :  { %v2635_v32 = vsel %vm2634_vm13, %v2633_v30, %v2632_v25 }
0x1361   :  { %v2636_v33 = vpack.c.b16 %v2635_v32, %v2635_v32 }
0x1363   :  { %2694 = vmatmul.bf16.vlgmr.msrb.gmra.mxu3 %v2636_v33 }
0x13e6   :  { %v2695_v34 = vpop.f32.mrf.mxu3 }
0x13e7   :  { %v2696_v0 = vadd.f32 %v3488_v53, %v2695_v34 }
0x13e9   :  { %2699 = vst [vmem:[#allocation8] sm:$0x3] %v2696_v0 }
0x13ea   :  { %2710 = dma.vmem_to_hbm [thread:$0]  %s2706_s0, 32, %s2708_s6, [#allocation4]  }
0x13ee   :  { %v2697_v36 = vpop.f32.mrf.mxu3 }
0x13ef   :  { %3673 = dma.done.wait [#allocation4], 32  }
0x13f0   :  { %3674 = vsyncadd [#allocation4], 4294967264 }
0x13f1   :  { %2715 = vsyncpa [#allocation3], 1 }
0x13f2   :  { %2716 = vsyncpa [#allocation6], 1 }
0x13f3   :  { %2717 = vsyncpa [#allocation4], 1 }

</bundles_post_ra>
